<compile_context>
chip_gen: v7x
topology: tpu7x:2x2x1
jax: 0.10.0
libtpu: 0.0.40
codegen_flags: <defaults>
</compile_context>

<pallas_src>
import functools

import jax
import jax.numpy as jnp
from jax import lax
from jax.experimental import pallas as pl
from jax.experimental.pallas import tpu as pltpu


_EPS = 1e-5
# Row-tile cap: double-buffered (TILE_M, Cpad) f32/bf16 blocks stay far below the
# 32 MiB scoped VMEM default on every generation (v5e/v6e 128 MiB, v7x 64 MiB).
_MAX_TILE_M = 512


def _round_up(x, m):
    return ((x + m - 1) // m) * m


def _pick_tile_m(m, max_tile=_MAX_TILE_M):
    """Largest row tile that divides m, is a multiple of 8 and <= max_tile."""
    if m <= max_tile:
        return m
    for t in range(max_tile, 7, -1):
        if m % t == 0 and t % 8 == 0:
            return t
    return m  # fallback: single block (only for awkward row counts)


def _compiler_params(semantics):
    return pltpu.CompilerParams(
        dimension_semantics=semantics,
        vmem_limit_bytes=32 * 1024 * 1024,
    )


# ----------------------------- Pallas kernels ------------------------------ #

def _matmul_bias_kernel(x_ref, w_ref, b_ref, o_ref):
    # ConvTranspose2d(k=2, s=2) has no overlap -> plain tiled matmul + bias.
    acc = jnp.dot(x_ref[...], w_ref[...], preferred_element_type=jnp.float32)
    o_ref[...] = (acc + b_ref[...]).astype(o_ref.dtype)


def _conv3x3_stats_kernel(x0_ref, x1_ref, x2_ref, w_ref, b_ref,
                          y_ref, sum_ref, sq_ref):
    """One grid step = one output row (all W columns) of one image.

    x{0,1,2}_ref: (W+2, Cin) bf16 — padded input rows h, h+1, h+2.
    w_ref:        (9, Cin, Cout_p) bf16, resident across the grid.
    y_ref:        (W, Cout_p) f32 conv+bias output.
    sum_ref/sq_ref: (1, Cout_p) f32 accumulators (constant block index =>
                    resident; init on first step, written back at grid end).
    """
    @pl.when(jnp.logical_and(pl.program_id(0) == 0, pl.program_id(1) == 0))
    def _init():
        sum_ref[...] = jnp.zeros_like(sum_ref)
        sq_ref[...] = jnp.zeros_like(sq_ref)

    w_out, cout = y_ref.shape
    acc = jnp.zeros((w_out, cout), jnp.float32)
    xs = (x0_ref[...], x1_ref[...], x2_ref[...])
    for dh in range(3):
        for dw in range(3):
            acc = acc + jnp.dot(xs[dh][dw:dw + w_out, :],
                                w_ref[dh * 3 + dw],
                                preferred_element_type=jnp.float32)
    acc = acc + b_ref[...]
    y_ref[...] = acc
    sum_ref[...] += jnp.sum(acc, axis=0, keepdims=True)
    sq_ref[...] += jnp.sum(acc * acc, axis=0, keepdims=True)


def _bn_relu_kernel(y_ref, sum_ref, sq_ref, g_ref, b_ref, o_ref, *,
                    inv_count, eps):
    # BatchNorm2d in training mode: batch stats over (N, H, W), biased variance.
    mean = sum_ref[...] * inv_count
    var = jnp.maximum(sq_ref[...] * inv_count - mean * mean, 0.0)
    scale = g_ref[...] * lax.rsqrt(var + eps)
    shift = b_ref[...] - mean * scale
    o_ref[...] = jnp.maximum(y_ref[...] * scale + shift, 0.0).astype(o_ref.dtype)


# ------------------------------ kernel wrappers ----------------------------- #

def _up_matmul(x2d, w2d, b2d, out_dtype):
    m, k = x2d.shape
    ncols = w2d.shape[1]
    tm = _pick_tile_m(m)
    return pl.pallas_call(
        _matmul_bias_kernel,
        out_shape=jax.ShapeDtypeStruct((m, ncols), out_dtype),
        grid=(m // tm,),
        in_specs=[
            pl.BlockSpec((tm, k), lambda i: (i, 0)),
            pl.BlockSpec((k, ncols), lambda i: (0, 0)),   # resident weight
            pl.BlockSpec((1, ncols), lambda i: (0, 0)),   # resident bias
        ],
        out_specs=pl.BlockSpec((tm, ncols), lambda i: (i, 0)),
        compiler_params=_compiler_params(("parallel",)),
    )(x2d, w2d, b2d)


def _conv3x3_bn_relu(x_nhwc, w9, bias, gamma, beta, out_dtype):
    """3x3 reflect-pad conv + train-mode BatchNorm + ReLU (two Pallas passes)."""
    n, h, w, c = x_nhwc.shape
    cout = w9.shape[-1]
    xp = jnp.pad(x_nhwc, ((0, 0), (1, 1), (1, 1), (0, 0)), mode="reflect")
    wp2 = w + 2

    def x_spec(dh):
        # Same padded array, three row-shifted views (in-kernel "im2col").
        return pl.BlockSpec((None, None, wp2, c),
                            lambda ni, hi, d=dh: (ni, hi + d, 0, 0))

    # Pass 1: conv + bias, and accumulate per-channel sum / sum-of-squares.
    # Grid axes must be "arbitrary" because the stats accumulate across them.
    y, s_sum, s_sq = pl.pallas_call(
        _conv3x3_stats_kernel,
        out_shape=(
            jax.ShapeDtypeStruct((n, h, w, cout), jnp.float32),
            jax.ShapeDtypeStruct((1, cout), jnp.float32),
            jax.ShapeDtypeStruct((1, cout), jnp.float32),
        ),
        grid=(n, h),
        in_specs=[
            x_spec(0), x_spec(1), x_spec(2),
            pl.BlockSpec((9, c, cout), lambda ni, hi: (0, 0, 0)),
            pl.BlockSpec((1, cout), lambda ni, hi: (0, 0)),
        ],
        out_specs=(
            pl.BlockSpec((None, None, w, cout), lambda ni, hi: (ni, hi, 0, 0)),
            pl.BlockSpec((1, cout), lambda ni, hi: (0, 0)),
            pl.BlockSpec((1, cout), lambda ni, hi: (0, 0)),
        ),
        compiler_params=_compiler_params(("arbitrary", "arbitrary")),
    )(xp, xp, xp, w9, bias)

    # Pass 2: normalize + ReLU, tiled and parallel over rows.
    m = n * h * w
    tm = _pick_tile_m(m)
    out2d = pl.pallas_call(
        functools.partial(_bn_relu_kernel, inv_count=1.0 / float(m), eps=_EPS),
        out_shape=jax.ShapeDtypeStruct((m, cout), out_dtype),
        grid=(m // tm,),
        in_specs=[
            pl.BlockSpec((tm, cout), lambda i: (i, 0)),
            pl.BlockSpec((1, cout), lambda i: (0, 0)),
            pl.BlockSpec((1, cout), lambda i: (0, 0)),
            pl.BlockSpec((1, cout), lambda i: (0, 0)),
            pl.BlockSpec((1, cout), lambda i: (0, 0)),
        ],
        out_specs=pl.BlockSpec((tm, cout), lambda i: (i, 0)),
        compiler_params=_compiler_params(("parallel",)),
    )(y.reshape(m, cout), s_sum, s_sq, gamma, beta)
    return out2d.reshape(n, h, w, cout)


# --------------------------------- params ----------------------------------- #

def init_params(key, in_channels, out_channels):
    c_half = in_channels // 2
    keys = jax.random.split(key, 6)

    def u(k, shape, fan_in):
        bound = 1.0 / (fan_in ** 0.5)
        return jax.random.uniform(k, shape, jnp.float32, -bound, bound)

    return {
        # nn.ConvTranspose2d(in, in//2, kernel_size=2, stride=2)
        "up_w": u(keys[0], (in_channels, c_half, 2, 2), c_half * 4),
        "up_b": u(keys[1], (c_half,), c_half * 4),
        # BaseDoubleConv
        "c1_w": u(keys[2], (out_channels, in_channels, 3, 3), in_channels * 9),
        "c1_b": u(keys[3], (out_channels,), in_channels * 9),
        "bn1_g": jnp.ones((out_channels,), jnp.float32),
        "bn1_b": jnp.zeros((out_channels,), jnp.float32),
        "c2_w": u(keys[4], (out_channels, out_channels, 3, 3), out_channels * 9),
        "c2_b": u(keys[5], (out_channels,), out_channels * 9),
        "bn2_g": jnp.ones((out_channels,), jnp.float32),
        "bn2_b": jnp.zeros((out_channels,), jnp.float32),
    }


def prepare_params(params):
    """One-time weight preprocessing: reorder, pad to lane-dense widths, bf16."""
    cin = params["up_w"].shape[0]
    c_half = params["up_w"].shape[1]
    cout = params["c1_w"].shape[0]
    ccat = params["c1_w"].shape[1]              # skip channels + c_half
    c_half_p = _round_up(c_half, 32)            # => 4*c_half_p is a multiple of 128
    cout_p = _round_up(cout, 128)

    # ConvTranspose weight (cin, c_half, 2, 2) -> (cin, 2, 2, c_half_p) -> 2D.
    w_up = jnp.transpose(params["up_w"], (0, 2, 3, 1))
    w_up = jnp.pad(w_up, ((0, 0), (0, 0), (0, 0), (0, c_half_p - c_half)))
    w_up = w_up.reshape(cin, 4 * c_half_p).astype(jnp.bfloat16)
    b_up = jnp.tile(jnp.pad(params["up_b"], (0, c_half_p - c_half)), 4)
    b_up = b_up.reshape(1, 4 * c_half_p).astype(jnp.float32)

    def conv_w9(w, cin_pad):
        co, ci = w.shape[0], w.shape[1]
        w9 = jnp.transpose(w, (2, 3, 1, 0)).reshape(9, ci, co)
        w9 = jnp.pad(w9, ((0, 0), (0, cin_pad - ci), (0, cout_p - co)))
        return w9.astype(jnp.bfloat16)

    def pad_vec(v):
        return jnp.pad(v, (0, cout_p - v.shape[0])).reshape(1, -1).astype(jnp.float32)

    return {
        "cin": cin, "c_half": c_half, "c_half_p": c_half_p,
        "cout": cout, "cout_p": cout_p,
        "w_up": w_up, "b_up": b_up,
        "c1_w9": conv_w9(params["c1_w"], ccat), "c1_b": pad_vec(params["c1_b"]),
        "bn1_g": pad_vec(params["bn1_g"]), "bn1_b": pad_vec(params["bn1_b"]),
        "c2_w9": conv_w9(params["c2_w"], cout_p), "c2_b": pad_vec(params["c2_b"]),
        "bn2_g": pad_vec(params["bn2_g"]), "bn2_b": pad_vec(params["bn2_b"]),
    }


# --------------------------------- forward ----------------------------------- #

def up_block_forward(prep, x_nchw, skip_nchw):
    n, cin, h, w = x_nchw.shape
    c_half, c_half_p = prep["c_half"], prep["c_half_p"]
    cout = prep["cout"]

    x = jnp.transpose(x_nchw, (0, 2, 3, 1)).astype(jnp.bfloat16)         # NHWC
    skip = jnp.transpose(skip_nchw, (0, 2, 3, 1)).astype(jnp.bfloat16)   # NHWC

    # 1) ConvTranspose2d(cin, cin//2, k=2, s=2) as a tiled Pallas matmul,
    #    then pixel-shuffle the (a, b) sub-blocks back into the spatial grid.
    y = _up_matmul(x.reshape(n * h * w, cin), prep["w_up"], prep["b_up"],
                   jnp.bfloat16)
    y = y.reshape(n, h, w, 2, 2, c_half_p)
    y = jnp.transpose(y, (0, 1, 3, 2, 4, 5)).reshape(n, 2 * h, 2 * w, c_half_p)
    y = y[..., :c_half]

    # 2) bilinear resize (align_corners=False) if spatial sizes mismatch.
    # TODO(synk): resize stays as an XLA jax.image.resize fallback (rare path);
    # not fused into the Pallas conv input pipeline.
    if y.shape[1:3] != skip.shape[1:3]:
        y = jax.image.resize(y, (n, skip.shape[1], skip.shape[2], c_half),
                             method="bilinear").astype(jnp.bfloat16)

    # 3) concat([skip, up(x)], channel).
    xcat = jnp.concatenate([skip, y], axis=-1)

    # 4) DoubleConv: (Conv3x3 reflect -> BN(train stats) -> ReLU) x 2.
    a1 = _conv3x3_bn_relu(xcat, prep["c1_w9"], prep["c1_b"],
                          prep["bn1_g"], prep["bn1_b"], jnp.bfloat16)
    a2 = _conv3x3_bn_relu(a1, prep["c2_w9"], prep["c2_b"],
                          prep["bn2_g"], prep["bn2_b"], jnp.float32)

    a2 = a2[..., :cout]                       # drop lane-padding channels
    return jnp.transpose(a2, (0, 3, 1, 2))    # NHWC -> NCHW


# ----------------------------------- main ------------------------------------ #

if __name__ == "__main__":
    key = jax.random.PRNGKey(0)
    kx, ks, kp = jax.random.split(key, 3)

    in_channels, out_channels = 8, 8
    batch, h, w = 2, 8, 8

    # x has `in_channels` channels; skip has in_channels // 2 (UNet convention),
    # at twice the spatial resolution so the concat is valid.
    x = jax.random.normal(kx, (batch, in_channels, h, w), jnp.float32)
    skip = jax.random.normal(ks, (batch, in_channels // 2, 2 * h, 2 * w),
                             jnp.float32)

    params = init_params(kp, in_channels, out_channels)
    prep = prepare_params(params)

    fwd = jax.jit(functools.partial(up_block_forward, prep))
    out = jax.block_until_ready(fwd(x, skip))

    assert out.shape == (batch, out_channels, 2 * h, 2 * w), out.shape
    assert bool(jnp.all(jnp.isfinite(out)))
    print("KERNEL_OK")
</pallas_src>

<mosaic_0001>
module attributes {stable_mosaic.version = 11 : i64} {
  func.func @_matmul_bias_kernel(%arg0: i32, %arg1: memref<128x8xbf16, #tpu.memory_space<vmem>>, %arg2: memref<8x128xbf16, #tpu.memory_space<vmem>>, %arg3: memref<1x128xf32, #tpu.memory_space<vmem>>, %arg4: memref<128x128xbf16, #tpu.memory_space<vmem>>) attributes {dimension_semantics = [#tpu.dimension_semantics<parallel>], iteration_bounds = array<i64: 1>, scalar_prefetch = 0 : i64, scratch_operands = 0 : i64, tpu.core_type = #tpu.core_type<tc>, window_params = [{transform_indices = @transform_0, window_bounds = array<i64: 128, 8>}, {pipeline_mode = #tpu.pipeline_mode<synchronous>, transform_indices = @transform_1, window_bounds = array<i64: 8, 128>}, {pipeline_mode = #tpu.pipeline_mode<synchronous>, transform_indices = @transform_2, window_bounds = array<i64: 1, 128>}, {transform_indices = @transform_3, window_bounds = array<i64: 128, 128>}]} {
    %c0 = arith.constant 0 : index
    %c0_0 = arith.constant 0 : index
    %0 = vector.load %arg1[%c0, %c0_0] : memref<128x8xbf16, #tpu.memory_space<vmem>>, vector<128x8xbf16>
    %c0_1 = arith.constant 0 : index
    %c0_2 = arith.constant 0 : index
    %1 = vector.load %arg2[%c0_1, %c0_2] : memref<8x128xbf16, #tpu.memory_space<vmem>>, vector<8x128xbf16>
    %cst = arith.constant dense<0.000000e+00> : vector<128x128xf32>
    %2 = tpu.matmul %0, %1, %cst {dimension_numbers = #tpu.dot_dimension_numbers<[1], [0], [0], [1], [0, 0, 1, 1], [], []>} : vector<128x8xbf16>, vector<8x128xbf16>, vector<128x128xf32> -> vector<128x128xf32>
    %c0_3 = arith.constant 0 : index
    %c0_4 = arith.constant 0 : index
    %3 = vector.load %arg3[%c0_3, %c0_4] : memref<1x128xf32, #tpu.memory_space<vmem>>, vector<1x128xf32>
    %4 = vector.broadcast %3 : vector<1x128xf32> to vector<128x128xf32>
    %5 = arith.addf %2, %4 : vector<128x128xf32>
    %6 = arith.truncf %5 : vector<128x128xf32> to vector<128x128xbf16>
    %c0_5 = arith.constant 0 : index
    %c0_6 = arith.constant 0 : index
    %7 = vector.load %arg4[%c0_5, %c0_6] : memref<128x128xbf16, #tpu.memory_space<vmem>>, vector<128x128xbf16>
    tpu.vector_store %arg4[%c0_5, %c0_6], %6 {strides = array<i32>} : memref<128x128xbf16, #tpu.memory_space<vmem>>, vector<128x128xbf16>,
    return
  }
  func.func @transform_0(%arg0: i32) -> (i32, i32) {
    %c0_i32 = arith.constant 0 : i32
    %c0_i32_0 = arith.constant 0 : i32
    return %arg0, %c0_i32 : i32, i32
  }
  func.func @transform_1(%arg0: i32) -> (i32, i32) {
    %c0_i32 = arith.constant 0 : i32
    %c0_i32_0 = arith.constant 0 : i32
    %c0_i32_1 = arith.constant 0 : i32
    return %c0_i32, %c0_i32_0 : i32, i32
  }
  func.func @transform_2(%arg0: i32) -> (i32, i32) {
    %c0_i32 = arith.constant 0 : i32
    %c0_i32_0 = arith.constant 0 : i32
    %c0_i32_1 = arith.constant 0 : i32
    return %c0_i32, %c0_i32_0 : i32, i32
  }
  func.func @transform_3(%arg0: i32) -> (i32, i32) {
    %c0_i32 = arith.constant 0 : i32
    %c0_i32_0 = arith.constant 0 : i32
    return %arg0, %c0_i32 : i32, i32
  }
}

module attributes {stable_mosaic.version = 11 : i64} {
  func.func @_conv3x3_stats_kernel(%arg0: i32, %arg1: i32, %arg2: memref<1x1x18x8xbf16, #tpu.memory_space<vmem>>, %arg3: memref<1x1x18x8xbf16, #tpu.memory_space<vmem>>, %arg4: memref<1x1x18x8xbf16, #tpu.memory_space<vmem>>, %arg5: memref<9x8x128xbf16, #tpu.memory_space<vmem>>, %arg6: memref<1x128xf32, #tpu.memory_space<vmem>>, %arg7: memref<1x1x16x128xf32, #tpu.memory_space<vmem>>, %arg8: memref<1x128xf32, #tpu.memory_space<vmem>>, %arg9: memref<1x128xf32, #tpu.memory_space<vmem>>) attributes {dimension_semantics = [#tpu.dimension_semantics<arbitrary>, #tpu.dimension_semantics<arbitrary>], iteration_bounds = array<i64: 2, 16>, scalar_prefetch = 0 : i64, scratch_operands = 0 : i64, tpu.core_type = #tpu.core_type<tc>, window_params = [{transform_indices = @transform_0, window_bounds = array<i64: 1, 1, 18, 8>}, {transform_indices = @transform_1, window_bounds = array<i64: 1, 1, 18, 8>}, {transform_indices = @transform_2, window_bounds = array<i64: 1, 1, 18, 8>}, {pipeline_mode = #tpu.pipeline_mode<synchronous>, transform_indices = @transform_3, window_bounds = array<i64: 9, 8, 128>}, {pipeline_mode = #tpu.pipeline_mode<synchronous>, transform_indices = @transform_4, window_bounds = array<i64: 1, 128>}, {transform_indices = @transform_5, window_bounds = array<i64: 1, 1, 16, 128>}, {pipeline_mode = #tpu.pipeline_mode<synchronous>, transform_indices = @transform_6, window_bounds = array<i64: 1, 128>}, {pipeline_mode = #tpu.pipeline_mode<synchronous>, transform_indices = @transform_7, window_bounds = array<i64: 1, 128>}]} {
    %c0_i32 = arith.constant 0 : i32
    %0 = arith.cmpi eq, %arg0, %c0_i32 : i32
    %c0_i32_0 = arith.constant 0 : i32
    %1 = arith.cmpi eq, %arg1, %c0_i32_0 : i32
    %2 = arith.andi %0, %1 : i1
    %3 = arith.extui %2 : i1 to i32
    %c0_i32_1 = arith.constant 0 : i32
    %4 = arith.cmpi ne, %3, %c0_i32_1 : i32
    scf.if %4 {
      %cst_57 = arith.constant 0.000000e+00 : f32
      %74 = vector.broadcast %cst_57 : f32 to vector<1x128xf32>
      %c0_58 = arith.constant 0 : index
      %c0_59 = arith.constant 0 : index
      %75 = vector.load %arg8[%c0_58, %c0_59] : memref<1x128xf32, #tpu.memory_space<vmem>>, vector<1x128xf32>
      tpu.vector_store %arg8[%c0_58, %c0_59], %74 {strides = array<i32>} : memref<1x128xf32, #tpu.memory_space<vmem>>, vector<1x128xf32>,
      %cst_60 = arith.constant 0.000000e+00 : f32
      %76 = vector.broadcast %cst_60 : f32 to vector<1x128xf32>
      %c0_61 = arith.constant 0 : index
      %c0_62 = arith.constant 0 : index
      %77 = vector.load %arg9[%c0_61, %c0_62] : memref<1x128xf32, #tpu.memory_space<vmem>>, vector<1x128xf32>
      tpu.vector_store %arg9[%c0_61, %c0_62], %76 {strides = array<i32>} : memref<1x128xf32, #tpu.memory_space<vmem>>, vector<1x128xf32>,
    } else {
    }
    %cst = arith.constant 0.000000e+00 : f32
    %5 = vector.broadcast %cst : f32 to vector<16x128xf32>
    %c0 = arith.constant 0 : index
    %c0_2 = arith.constant 0 : index
    %c0_3 = arith.constant 0 : index
    %c0_4 = arith.constant 0 : index
    %6 = vector.load %arg2[%c0, %c0_2, %c0_3, %c0_4] : memref<1x1x18x8xbf16, #tpu.memory_space<vmem>>, vector<1x1x18x8xbf16>
    %7 = vector.shape_cast %6 : vector<1x1x18x8xbf16> to vector<18x8xbf16>
    %c0_5 = arith.constant 0 : index
    %c0_6 = arith.constant 0 : index
    %c0_7 = arith.constant 0 : index
    %c0_8 = arith.constant 0 : index
    %8 = vector.load %arg3[%c0_5, %c0_6, %c0_7, %c0_8] : memref<1x1x18x8xbf16, #tpu.memory_space<vmem>>, vector<1x1x18x8xbf16>
    %9 = vector.shape_cast %8 : vector<1x1x18x8xbf16> to vector<18x8xbf16>
    %c0_9 = arith.constant 0 : index
    %c0_10 = arith.constant 0 : index
    %c0_11 = arith.constant 0 : index
    %c0_12 = arith.constant 0 : index
    %10 = vector.load %arg4[%c0_9, %c0_10, %c0_11, %c0_12] : memref<1x1x18x8xbf16, #tpu.memory_space<vmem>>, vector<1x1x18x8xbf16>
    %11 = vector.shape_cast %10 : vector<1x1x18x8xbf16> to vector<18x8xbf16>
    %12 = vector.extract_strided_slice %7 {offsets = [0, 0], sizes = [16, 8], strides = [1, 1]} : vector<18x8xbf16> to vector<16x8xbf16>
    %c0_13 = arith.constant 0 : index
    %c0_14 = arith.constant 0 : index
    %c0_15 = arith.constant 0 : index
    %13 = vector.load %arg5[%c0_13, %c0_14, %c0_15] : memref<9x8x128xbf16, #tpu.memory_space<vmem>>, vector<1x8x128xbf16>
    %14 = vector.shape_cast %13 : vector<1x8x128xbf16> to vector<8x128xbf16>
    %cst_16 = arith.constant dense<0.000000e+00> : vector<16x128xf32>
    %15 = tpu.matmul %12, %14, %cst_16 {dimension_numbers = #tpu.dot_dimension_numbers<[1], [0], [0], [1], [0, 0, 1, 1], [], []>} : vector<16x8xbf16>, vector<8x128xbf16>, vector<16x128xf32> -> vector<16x128xf32>
    %16 = arith.addf %5, %15 : vector<16x128xf32>
    %17 = vector.extract_strided_slice %7 {offsets = [1, 0], sizes = [16, 8], strides = [1, 1]} : vector<18x8xbf16> to vector<16x8xbf16>
    %c1 = arith.constant 1 : index
    %c0_17 = arith.constant 0 : index
    %c0_18 = arith.constant 0 : index
    %18 = vector.load %arg5[%c1, %c0_17, %c0_18] : memref<9x8x128xbf16, #tpu.memory_space<vmem>>, vector<1x8x128xbf16>
    %19 = vector.shape_cast %18 : vector<1x8x128xbf16> to vector<8x128xbf16>
    %cst_19 = arith.constant dense<0.000000e+00> : vector<16x128xf32>
    %20 = tpu.matmul %17, %19, %cst_19 {dimension_numbers = #tpu.dot_dimension_numbers<[1], [0], [0], [1], [0, 0, 1, 1], [], []>} : vector<16x8xbf16>, vector<8x128xbf16>, vector<16x128xf32> -> vector<16x128xf32>
    %21 = arith.addf %16, %20 : vector<16x128xf32>
    %22 = vector.extract_strided_slice %7 {offsets = [2, 0], sizes = [16, 8], strides = [1, 1]} : vector<18x8xbf16> to vector<16x8xbf16>
    %c2 = arith.constant 2 : index
    %c0_20 = arith.constant 0 : index
    %c0_21 = arith.constant 0 : index
    %23 = vector.load %arg5[%c2, %c0_20, %c0_21] : memref<9x8x128xbf16, #tpu.memory_space<vmem>>, vector<1x8x128xbf16>
    %24 = vector.shape_cast %23 : vector<1x8x128xbf16> to vector<8x128xbf16>
    %cst_22 = arith.constant dense<0.000000e+00> : vector<16x128xf32>
    %25 = tpu.matmul %22, %24, %cst_22 {dimension_numbers = #tpu.dot_dimension_numbers<[1], [0], [0], [1], [0, 0, 1, 1], [], []>} : vector<16x8xbf16>, vector<8x128xbf16>, vector<16x128xf32> -> vector<16x128xf32>
    %26 = arith.addf %21, %25 : vector<16x128xf32>
    %27 = vector.extract_strided_slice %9 {offsets = [0, 0], sizes = [16, 8], strides = [1, 1]} : vector<18x8xbf16> to vector<16x8xbf16>
    %c3 = arith.constant 3 : index
    %c0_23 = arith.constant 0 : index
    %c0_24 = arith.constant 0 : index
    %28 = vector.load %arg5[%c3, %c0_23, %c0_24] : memref<9x8x128xbf16, #tpu.memory_space<vmem>>, vector<1x8x128xbf16>
    %29 = vector.shape_cast %28 : vector<1x8x128xbf16> to vector<8x128xbf16>
    %cst_25 = arith.constant dense<0.000000e+00> : vector<16x128xf32>
    %30 = tpu.matmul %27, %29, %cst_25 {dimension_numbers = #tpu.dot_dimension_numbers<[1], [0], [0], [1], [0, 0, 1, 1], [], []>} : vector<16x8xbf16>, vector<8x128xbf16>, vector<16x128xf32> -> vector<16x128xf32>
    %31 = arith.addf %26, %30 : vector<16x128xf32>
    %32 = vector.extract_strided_slice %9 {offsets = [1, 0], sizes = [16, 8], strides = [1, 1]} : vector<18x8xbf16> to vector<16x8xbf16>
    %c4 = arith.constant 4 : index
    %c0_26 = arith.constant 0 : index
    %c0_27 = arith.constant 0 : index
    %33 = vector.load %arg5[%c4, %c0_26, %c0_27] : memref<9x8x128xbf16, #tpu.memory_space<vmem>>, vector<1x8x128xbf16>
    %34 = vector.shape_cast %33 : vector<1x8x128xbf16> to vector<8x128xbf16>
    %cst_28 = arith.constant dense<0.000000e+00> : vector<16x128xf32>
    %35 = tpu.matmul %32, %34, %cst_28 {dimension_numbers = #tpu.dot_dimension_numbers<[1], [0], [0], [1], [0, 0, 1, 1], [], []>} : vector<16x8xbf16>, vector<8x128xbf16>, vector<16x128xf32> -> vector<16x128xf32>
    %36 = arith.addf %31, %35 : vector<16x128xf32>
    %37 = vector.extract_strided_slice %9 {offsets = [2, 0], sizes = [16, 8], strides = [1, 1]} : vector<18x8xbf16> to vector<16x8xbf16>
    %c5 = arith.constant 5 : index
    %c0_29 = arith.constant 0 : index
    %c0_30 = arith.constant 0 : index
    %38 = vector.load %arg5[%c5, %c0_29, %c0_30] : memref<9x8x128xbf16, #tpu.memory_space<vmem>>, vector<1x8x128xbf16>
    %39 = vector.shape_cast %38 : vector<1x8x128xbf16> to vector<8x128xbf16>
    %cst_31 = arith.constant dense<0.000000e+00> : vector<16x128xf32>
    %40 = tpu.matmul %37, %39, %cst_31 {dimension_numbers = #tpu.dot_dimension_numbers<[1], [0], [0], [1], [0, 0, 1, 1], [], []>} : vector<16x8xbf16>, vector<8x128xbf16>, vector<16x128xf32> -> vector<16x128xf32>
    %41 = arith.addf %36, %40 : vector<16x128xf32>
    %42 = vector.extract_strided_slice %11 {offsets = [0, 0], sizes = [16, 8], strides = [1, 1]} : vector<18x8xbf16> to vector<16x8xbf16>
    %c6 = arith.constant 6 : index
    %c0_32 = arith.constant 0 : index
    %c0_33 = arith.constant 0 : index
    %43 = vector.load %arg5[%c6, %c0_32, %c0_33] : memref<9x8x128xbf16, #tpu.memory_space<vmem>>, vector<1x8x128xbf16>
    %44 = vector.shape_cast %43 : vector<1x8x128xbf16> to vector<8x128xbf16>
    %cst_34 = arith.constant dense<0.000000e+00> : vector<16x128xf32>
    %45 = tpu.matmul %42, %44, %cst_34 {dimension_numbers = #tpu.dot_dimension_numbers<[1], [0], [0], [1], [0, 0, 1, 1], [], []>} : vector<16x8xbf16>, vector<8x128xbf16>, vector<16x128xf32> -> vector<16x128xf32>
    %46 = arith.addf %41, %45 : vector<16x128xf32>
    %47 = vector.extract_strided_slice %11 {offsets = [1, 0], sizes = [16, 8], strides = [1, 1]} : vector<18x8xbf16> to vector<16x8xbf16>
    %c7 = arith.constant 7 : index
    %c0_35 = arith.constant 0 : index
    %c0_36 = arith.constant 0 : index
    %48 = vector.load %arg5[%c7, %c0_35, %c0_36] : memref<9x8x128xbf16, #tpu.memory_space<vmem>>, vector<1x8x128xbf16>
    %49 = vector.shape_cast %48 : vector<1x8x128xbf16> to vector<8x128xbf16>
    %cst_37 = arith.constant dense<0.000000e+00> : vector<16x128xf32>
    %50 = tpu.matmul %47, %49, %cst_37 {dimension_numbers = #tpu.dot_dimension_numbers<[1], [0], [0], [1], [0, 0, 1, 1], [], []>} : vector<16x8xbf16>, vector<8x128xbf16>, vector<16x128xf32> -> vector<16x128xf32>
    %51 = arith.addf %46, %50 : vector<16x128xf32>
    %52 = vector.extract_strided_slice %11 {offsets = [2, 0], sizes = [16, 8], strides = [1, 1]} : vector<18x8xbf16> to vector<16x8xbf16>
    %c8 = arith.constant 8 : index
    %c0_38 = arith.constant 0 : index
    %c0_39 = arith.constant 0 : index
    %53 = vector.load %arg5[%c8, %c0_38, %c0_39] : memref<9x8x128xbf16, #tpu.memory_space<vmem>>, vector<1x8x128xbf16>
    %54 = vector.shape_cast %53 : vector<1x8x128xbf16> to vector<8x128xbf16>
    %cst_40 = arith.constant dense<0.000000e+00> : vector<16x128xf32>
    %55 = tpu.matmul %52, %54, %cst_40 {dimension_numbers = #tpu.dot_dimension_numbers<[1], [0], [0], [1], [0, 0, 1, 1], [], []>} : vector<16x8xbf16>, vector<8x128xbf16>, vector<16x128xf32> -> vector<16x128xf32>
    %56 = arith.addf %51, %55 : vector<16x128xf32>
    %c0_41 = arith.constant 0 : index
    %c0_42 = arith.constant 0 : index
    %57 = vector.load %arg6[%c0_41, %c0_42] : memref<1x128xf32, #tpu.memory_space<vmem>>, vector<1x128xf32>
    %58 = vector.broadcast %57 : vector<1x128xf32> to vector<16x128xf32>
    %59 = arith.addf %56, %58 : vector<16x128xf32>
    %c0_43 = arith.constant 0 : index
    %c0_44 = arith.constant 0 : index
    %c0_45 = arith.constant 0 : index
    %c0_46 = arith.constant 0 : index
    %60 = vector.load %arg7[%c0_43, %c0_44, %c0_45, %c0_46] : memref<1x1x16x128xf32, #tpu.memory_space<vmem>>, vector<1x1x16x128xf32>
    %61 = vector.shape_cast %60 : vector<1x1x16x128xf32> to vector<16x128xf32>
    %62 = vector.shape_cast %59 : vector<16x128xf32> to vector<1x1x16x128xf32>
    tpu.vector_store %arg7[%c0_43, %c0_44, %c0_45, %c0_46], %62 {strides = array<i32>} : memref<1x1x16x128xf32, #tpu.memory_space<vmem>>, vector<1x1x16x128xf32>,
    %c0_47 = arith.constant 0 : index
    %c0_48 = arith.constant 0 : index
    %63 = vector.load %arg8[%c0_47, %c0_48] : memref<1x128xf32, #tpu.memory_space<vmem>>, vector<1x128xf32>
    %cst_49 = arith.constant dense<0.000000e+00> : vector<128xf32>
    %64 = vector.multi_reduction <add>, %59, %cst_49 [0] : vector<16x128xf32> to vector<128xf32>
    %65 = vector.shape_cast %64 : vector<128xf32> to vector<1x128xf32>
    %66 = arith.addf %63, %65 : vector<1x128xf32>
    %c0_50 = arith.constant 0 : index
    %c0_51 = arith.constant 0 : index
    %67 = vector.load %arg8[%c0_50, %c0_51] : memref<1x128xf32, #tpu.memory_space<vmem>>, vector<1x128xf32>
    tpu.vector_store %arg8[%c0_50, %c0_51], %66 {strides = array<i32>} : memref<1x128xf32, #tpu.memory_space<vmem>>, vector<1x128xf32>,
    %c0_52 = arith.constant 0 : index
    %c0_53 = arith.constant 0 : index
    %68 = vector.load %arg9[%c0_52, %c0_53] : memref<1x128xf32, #tpu.memory_space<vmem>>, vector<1x128xf32>
    %69 = arith.mulf %59, %59 : vector<16x128xf32>
    %cst_54 = arith.constant dense<0.000000e+00> : vector<128xf32>
    %70 = vector.multi_reduction <add>, %69, %cst_54 [0] : vector<16x128xf32> to vector<128xf32>
    %71 = vector.shape_cast %70 : vector<128xf32> to vector<1x128xf32>
    %72 = arith.addf %68, %71 : vector<1x128xf32>
    %c0_55 = arith.constant 0 : index
    %c0_56 = arith.constant 0 : index
    %73 = vector.load %arg9[%c0_55, %c0_56] : memref<1x128xf32, #tpu.memory_space<vmem>>, vector<1x128xf32>
    tpu.vector_store %arg9[%c0_55, %c0_56], %72 {strides = array<i32>} : memref<1x128xf32, #tpu.memory_space<vmem>>, vector<1x128xf32>,
    return
  }
  func.func @transform_0(%arg0: i32, %arg1: i32) -> (i32, i32, i32, i32) {
    %c0_i32 = arith.constant 0 : i32
    %0 = arith.addi %arg1, %c0_i32 : i32
    %c0_i32_0 = arith.constant 0 : i32
    %c0_i32_1 = arith.constant 0 : i32
    %c0_i32_2 = arith.constant 0 : i32
    return %arg0, %0, %c0_i32_0, %c0_i32_1 : i32, i32, i32, i32
  }
  func.func @transform_1(%arg0: i32, %arg1: i32) -> (i32, i32, i32, i32) {
    %c1_i32 = arith.constant 1 : i32
    %0 = arith.addi %arg1, %c1_i32 : i32
    %c0_i32 = arith.constant 0 : i32
    %c0_i32_0 = arith.constant 0 : i32
    %c0_i32_1 = arith.constant 0 : i32
    return %arg0, %0, %c0_i32, %c0_i32_0 : i32, i32, i32, i32
  }
  func.func @transform_2(%arg0: i32, %arg1: i32) -> (i32, i32, i32, i32) {
    %c2_i32 = arith.constant 2 : i32
    %0 = arith.addi %arg1, %c2_i32 : i32
    %c0_i32 = arith.constant 0 : i32
    %c0_i32_0 = arith.constant 0 : i32
    %c0_i32_1 = arith.constant 0 : i32
    return %arg0, %0, %c0_i32, %c0_i32_0 : i32, i32, i32, i32
  }
  func.func @transform_3(%arg0: i32, %arg1: i32) -> (i32, i32, i32) {
    %c0_i32 = arith.constant 0 : i32
    %c0_i32_0 = arith.constant 0 : i32
    %c0_i32_1 = arith.constant 0 : i32
    %c0_i32_2 = arith.constant 0 : i32
    return %c0_i32, %c0_i32_0, %c0_i32_1 : i32, i32, i32
  }
  func.func @transform_4(%arg0: i32, %arg1: i32) -> (i32, i32) {
    %c0_i32 = arith.constant 0 : i32
    %c0_i32_0 = arith.constant 0 : i32
    %c0_i32_1 = arith.constant 0 : i32
    return %c0_i32, %c0_i32_0 : i32, i32
  }
  func.func @transform_5(%arg0: i32, %arg1: i32) -> (i32, i32, i32, i32) {
    %c0_i32 = arith.constant 0 : i32
    %c0_i32_0 = arith.constant 0 : i32
    %c0_i32_1 = arith.constant 0 : i32
    return %arg0, %arg1, %c0_i32, %c0_i32_0 : i32, i32, i32, i32
  }
  func.func @transform_6(%arg0: i32, %arg1: i32) -> (i32, i32) {
    %c0_i32 = arith.constant 0 : i32
    %c0_i32_0 = arith.constant 0 : i32
    %c0_i32_1 = arith.constant 0 : i32
    return %c0_i32, %c0_i32_0 : i32, i32
  }
  func.func @transform_7(%arg0: i32, %arg1: i32) -> (i32, i32) {
    %c0_i32 = arith.constant 0 : i32
    %c0_i32_0 = arith.constant 0 : i32
    %c0_i32_1 = arith.constant 0 : i32
    return %c0_i32, %c0_i32_0 : i32, i32
  }
}

module attributes {stable_mosaic.version = 11 : i64} {
  func.func @_bn_relu_kernel(%arg0: i32, %arg1: memref<512x128xf32, #tpu.memory_space<vmem>>, %arg2: memref<1x128xf32, #tpu.memory_space<vmem>>, %arg3: memref<1x128xf32, #tpu.memory_space<vmem>>, %arg4: memref<1x128xf32, #tpu.memory_space<vmem>>, %arg5: memref<1x128xf32, #tpu.memory_space<vmem>>, %arg6: memref<512x128xbf16, #tpu.memory_space<vmem>>) attributes {dimension_semantics = [#tpu.dimension_semantics<parallel>], iteration_bounds = array<i64: 1>, scalar_prefetch = 0 : i64, scratch_operands = 0 : i64, tpu.core_type = #tpu.core_type<tc>, window_params = [{transform_indices = @transform_0, window_bounds = array<i64: 512, 128>}, {pipeline_mode = #tpu.pipeline_mode<synchronous>, transform_indices = @transform_1, window_bounds = array<i64: 1, 128>}, {pipeline_mode = #tpu.pipeline_mode<synchronous>, transform_indices = @transform_2, window_bounds = array<i64: 1, 128>}, {pipeline_mode = #tpu.pipeline_mode<synchronous>, transform_indices = @transform_3, window_bounds = array<i64: 1, 128>}, {pipeline_mode = #tpu.pipeline_mode<synchronous>, transform_indices = @transform_4, window_bounds = array<i64: 1, 128>}, {transform_indices = @transform_5, window_bounds = array<i64: 512, 128>}]} {
    %c0 = arith.constant 0 : index
    %c0_0 = arith.constant 0 : index
    %0 = vector.load %arg2[%c0, %c0_0] : memref<1x128xf32, #tpu.memory_space<vmem>>, vector<1x128xf32>
    %cst = arith.constant 0.001953125 : f32
    %1 = vector.broadcast %cst : f32 to vector<1x128xf32>
    %2 = arith.mulf %0, %1 : vector<1x128xf32>
    %c0_1 = arith.constant 0 : index
    %c0_2 = arith.constant 0 : index
    %3 = vector.load %arg3[%c0_1, %c0_2] : memref<1x128xf32, #tpu.memory_space<vmem>>, vector<1x128xf32>
    %cst_3 = arith.constant 0.001953125 : f32
    %4 = vector.broadcast %cst_3 : f32 to vector<1x128xf32>
    %5 = arith.mulf %3, %4 : vector<1x128xf32>
    %6 = arith.mulf %2, %2 : vector<1x128xf32>
    %7 = arith.subf %5, %6 : vector<1x128xf32>
    %cst_4 = arith.constant 0.000000e+00 : f32
    %8 = vector.broadcast %cst_4 : f32 to vector<1x128xf32>
    %9 = arith.maximumf %7, %8 : vector<1x128xf32>
    %c0_5 = arith.constant 0 : index
    %c0_6 = arith.constant 0 : index
    %10 = vector.load %arg4[%c0_5, %c0_6] : memref<1x128xf32, #tpu.memory_space<vmem>>, vector<1x128xf32>
    %cst_7 = arith.constant 9.99999974E-6 : f32
    %11 = vector.broadcast %cst_7 : f32 to vector<1x128xf32>
    %12 = arith.addf %9, %11 : vector<1x128xf32>
    %13 = math.rsqrt %12 : vector<1x128xf32>
    %14 = arith.mulf %10, %13 : vector<1x128xf32>
    %c0_8 = arith.constant 0 : index
    %c0_9 = arith.constant 0 : index
    %15 = vector.load %arg5[%c0_8, %c0_9] : memref<1x128xf32, #tpu.memory_space<vmem>>, vector<1x128xf32>
    %16 = arith.mulf %2, %14 : vector<1x128xf32>
    %17 = arith.subf %15, %16 : vector<1x128xf32>
    %c0_10 = arith.constant 0 : index
    %c0_11 = arith.constant 0 : index
    %18 = vector.load %arg1[%c0_10, %c0_11] : memref<512x128xf32, #tpu.memory_space<vmem>>, vector<512x128xf32>
    %19 = vector.broadcast %14 : vector<1x128xf32> to vector<512x128xf32>
    %20 = arith.mulf %18, %19 : vector<512x128xf32>
    %21 = vector.broadcast %17 : vector<1x128xf32> to vector<512x128xf32>
    %22 = arith.addf %20, %21 : vector<512x128xf32>
    %cst_12 = arith.constant 0.000000e+00 : f32
    %23 = vector.broadcast %cst_12 : f32 to vector<512x128xf32>
    %24 = arith.maximumf %22, %23 : vector<512x128xf32>
    %25 = arith.truncf %24 : vector<512x128xf32> to vector<512x128xbf16>
    %c0_13 = arith.constant 0 : index
    %c0_14 = arith.constant 0 : index
    %26 = vector.load %arg6[%c0_13, %c0_14] : memref<512x128xbf16, #tpu.memory_space<vmem>>, vector<512x128xbf16>
    tpu.vector_store %arg6[%c0_13, %c0_14], %25 {strides = array<i32>} : memref<512x128xbf16, #tpu.memory_space<vmem>>, vector<512x128xbf16>,
    return
  }
  func.func @transform_0(%arg0: i32) -> (i32, i32) {
    %c0_i32 = arith.constant 0 : i32
    %c0_i32_0 = arith.constant 0 : i32
    return %arg0, %c0_i32 : i32, i32
  }
  func.func @transform_1(%arg0: i32) -> (i32, i32) {
    %c0_i32 = arith.constant 0 : i32
    %c0_i32_0 = arith.constant 0 : i32
    %c0_i32_1 = arith.constant 0 : i32
    return %c0_i32, %c0_i32_0 : i32, i32
  }
  func.func @transform_2(%arg0: i32) -> (i32, i32) {
    %c0_i32 = arith.constant 0 : i32
    %c0_i32_0 = arith.constant 0 : i32
    %c0_i32_1 = arith.constant 0 : i32
    return %c0_i32, %c0_i32_0 : i32, i32
  }
  func.func @transform_3(%arg0: i32) -> (i32, i32) {
    %c0_i32 = arith.constant 0 : i32
    %c0_i32_0 = arith.constant 0 : i32
    %c0_i32_1 = arith.constant 0 : i32
    return %c0_i32, %c0_i32_0 : i32, i32
  }
  func.func @transform_4(%arg0: i32) -> (i32, i32) {
    %c0_i32 = arith.constant 0 : i32
    %c0_i32_0 = arith.constant 0 : i32
    %c0_i32_1 = arith.constant 0 : i32
    return %c0_i32, %c0_i32_0 : i32, i32
  }
  func.func @transform_5(%arg0: i32) -> (i32, i32) {
    %c0_i32 = arith.constant 0 : i32
    %c0_i32_0 = arith.constant 0 : i32
    return %arg0, %c0_i32 : i32, i32
  }
}

module attributes {stable_mosaic.version = 11 : i64} {
  func.func @_conv3x3_stats_kernel(%arg0: i32, %arg1: i32, %arg2: memref<1x1x18x128xbf16, #tpu.memory_space<vmem>>, %arg3: memref<1x1x18x128xbf16, #tpu.memory_space<vmem>>, %arg4: memref<1x1x18x128xbf16, #tpu.memory_space<vmem>>, %arg5: memref<9x128x128xbf16, #tpu.memory_space<vmem>>, %arg6: memref<1x128xf32, #tpu.memory_space<vmem>>, %arg7: memref<1x1x16x128xf32, #tpu.memory_space<vmem>>, %arg8: memref<1x128xf32, #tpu.memory_space<vmem>>, %arg9: memref<1x128xf32, #tpu.memory_space<vmem>>) attributes {dimension_semantics = [#tpu.dimension_semantics<arbitrary>, #tpu.dimension_semantics<arbitrary>], iteration_bounds = array<i64: 2, 16>, scalar_prefetch = 0 : i64, scratch_operands = 0 : i64, tpu.core_type = #tpu.core_type<tc>, window_params = [{transform_indices = @transform_0, window_bounds = array<i64: 1, 1, 18, 128>}, {transform_indices = @transform_1, window_bounds = array<i64: 1, 1, 18, 128>}, {transform_indices = @transform_2, window_bounds = array<i64: 1, 1, 18, 128>}, {pipeline_mode = #tpu.pipeline_mode<synchronous>, transform_indices = @transform_3, window_bounds = array<i64: 9, 128, 128>}, {pipeline_mode = #tpu.pipeline_mode<synchronous>, transform_indices = @transform_4, window_bounds = array<i64: 1, 128>}, {transform_indices = @transform_5, window_bounds = array<i64: 1, 1, 16, 128>}, {pipeline_mode = #tpu.pipeline_mode<synchronous>, transform_indices = @transform_6, window_bounds = array<i64: 1, 128>}, {pipeline_mode = #tpu.pipeline_mode<synchronous>, transform_indices = @transform_7, window_bounds = array<i64: 1, 128>}]} {
    %c0_i32 = arith.constant 0 : i32
    %0 = arith.cmpi eq, %arg0, %c0_i32 : i32
    %c0_i32_0 = arith.constant 0 : i32
    %1 = arith.cmpi eq, %arg1, %c0_i32_0 : i32
    %2 = arith.andi %0, %1 : i1
    %3 = arith.extui %2 : i1 to i32
    %c0_i32_1 = arith.constant 0 : i32
    %4 = arith.cmpi ne, %3, %c0_i32_1 : i32
    scf.if %4 {
      %cst_57 = arith.constant 0.000000e+00 : f32
      %74 = vector.broadcast %cst_57 : f32 to vector<1x128xf32>
      %c0_58 = arith.constant 0 : index
      %c0_59 = arith.constant 0 : index
      %75 = vector.load %arg8[%c0_58, %c0_59] : memref<1x128xf32, #tpu.memory_space<vmem>>, vector<1x128xf32>
      tpu.vector_store %arg8[%c0_58, %c0_59], %74 {strides = array<i32>} : memref<1x128xf32, #tpu.memory_space<vmem>>, vector<1x128xf32>,
      %cst_60 = arith.constant 0.000000e+00 : f32
      %76 = vector.broadcast %cst_60 : f32 to vector<1x128xf32>
      %c0_61 = arith.constant 0 : index
      %c0_62 = arith.constant 0 : index
      %77 = vector.load %arg9[%c0_61, %c0_62] : memref<1x128xf32, #tpu.memory_space<vmem>>, vector<1x128xf32>
      tpu.vector_store %arg9[%c0_61, %c0_62], %76 {strides = array<i32>} : memref<1x128xf32, #tpu.memory_space<vmem>>, vector<1x128xf32>,
    } else {
    }
    %cst = arith.constant 0.000000e+00 : f32
    %5 = vector.broadcast %cst : f32 to vector<16x128xf32>
    %c0 = arith.constant 0 : index
    %c0_2 = arith.constant 0 : index
    %c0_3 = arith.constant 0 : index
    %c0_4 = arith.constant 0 : index
    %6 = vector.load %arg2[%c0, %c0_2, %c0_3, %c0_4] : memref<1x1x18x128xbf16, #tpu.memory_space<vmem>>, vector<1x1x18x128xbf16>
    %7 = vector.shape_cast %6 : vector<1x1x18x128xbf16> to vector<18x128xbf16>
    %c0_5 = arith.constant 0 : index
    %c0_6 = arith.constant 0 : index
    %c0_7 = arith.constant 0 : index
    %c0_8 = arith.constant 0 : index
    %8 = vector.load %arg3[%c0_5, %c0_6, %c0_7, %c0_8] : memref<1x1x18x128xbf16, #tpu.memory_space<vmem>>, vector<1x1x18x128xbf16>
    %9 = vector.shape_cast %8 : vector<1x1x18x128xbf16> to vector<18x128xbf16>
    %c0_9 = arith.constant 0 : index
    %c0_10 = arith.constant 0 : index
    %c0_11 = arith.constant 0 : index
    %c0_12 = arith.constant 0 : index
    %10 = vector.load %arg4[%c0_9, %c0_10, %c0_11, %c0_12] : memref<1x1x18x128xbf16, #tpu.memory_space<vmem>>, vector<1x1x18x128xbf16>
    %11 = vector.shape_cast %10 : vector<1x1x18x128xbf16> to vector<18x128xbf16>
    %12 = vector.extract_strided_slice %7 {offsets = [0, 0], sizes = [16, 128], strides = [1, 1]} : vector<18x128xbf16> to vector<16x128xbf16>
    %c0_13 = arith.constant 0 : index
    %c0_14 = arith.constant 0 : index
    %c0_15 = arith.constant 0 : index
    %13 = vector.load %arg5[%c0_13, %c0_14, %c0_15] : memref<9x128x128xbf16, #tpu.memory_space<vmem>>, vector<1x128x128xbf16>
    %14 = vector.shape_cast %13 : vector<1x128x128xbf16> to vector<128x128xbf16>
    %cst_16 = arith.constant dense<0.000000e+00> : vector<16x128xf32>
    %15 = tpu.matmul %12, %14, %cst_16 {dimension_numbers = #tpu.dot_dimension_numbers<[1], [0], [0], [1], [0, 0, 1, 1], [], []>} : vector<16x128xbf16>, vector<128x128xbf16>, vector<16x128xf32> -> vector<16x128xf32>
    %16 = arith.addf %5, %15 : vector<16x128xf32>
    %17 = vector.extract_strided_slice %7 {offsets = [1, 0], sizes = [16, 128], strides = [1, 1]} : vector<18x128xbf16> to vector<16x128xbf16>
    %c1 = arith.constant 1 : index
    %c0_17 = arith.constant 0 : index
    %c0_18 = arith.constant 0 : index
    %18 = vector.load %arg5[%c1, %c0_17, %c0_18] : memref<9x128x128xbf16, #tpu.memory_space<vmem>>, vector<1x128x128xbf16>
    %19 = vector.shape_cast %18 : vector<1x128x128xbf16> to vector<128x128xbf16>
    %cst_19 = arith.constant dense<0.000000e+00> : vector<16x128xf32>
    %20 = tpu.matmul %17, %19, %cst_19 {dimension_numbers = #tpu.dot_dimension_numbers<[1], [0], [0], [1], [0, 0, 1, 1], [], []>} : vector<16x128xbf16>, vector<128x128xbf16>, vector<16x128xf32> -> vector<16x128xf32>
    %21 = arith.addf %16, %20 : vector<16x128xf32>
    %22 = vector.extract_strided_slice %7 {offsets = [2, 0], sizes = [16, 128], strides = [1, 1]} : vector<18x128xbf16> to vector<16x128xbf16>
    %c2 = arith.constant 2 : index
    %c0_20 = arith.constant 0 : index
    %c0_21 = arith.constant 0 : index
    %23 = vector.load %arg5[%c2, %c0_20, %c0_21] : memref<9x128x128xbf16, #tpu.memory_space<vmem>>, vector<1x128x128xbf16>
    %24 = vector.shape_cast %23 : vector<1x128x128xbf16> to vector<128x128xbf16>
    %cst_22 = arith.constant dense<0.000000e+00> : vector<16x128xf32>
    %25 = tpu.matmul %22, %24, %cst_22 {dimension_numbers = #tpu.dot_dimension_numbers<[1], [0], [0], [1], [0, 0, 1, 1], [], []>} : vector<16x128xbf16>, vector<128x128xbf16>, vector<16x128xf32> -> vector<16x128xf32>
    %26 = arith.addf %21, %25 : vector<16x128xf32>
    %27 = vector.extract_strided_slice %9 {offsets = [0, 0], sizes = [16, 128], strides = [1, 1]} : vector<18x128xbf16> to vector<16x128xbf16>
    %c3 = arith.constant 3 : index
    %c0_23 = arith.constant 0 : index
    %c0_24 = arith.constant 0 : index
    %28 = vector.load %arg5[%c3, %c0_23, %c0_24] : memref<9x128x128xbf16, #tpu.memory_space<vmem>>, vector<1x128x128xbf16>
    %29 = vector.shape_cast %28 : vector<1x128x128xbf16> to vector<128x128xbf16>
    %cst_25 = arith.constant dense<0.000000e+00> : vector<16x128xf32>
    %30 = tpu.matmul %27, %29, %cst_25 {dimension_numbers = #tpu.dot_dimension_numbers<[1], [0], [0], [1], [0, 0, 1, 1], [], []>} : vector<16x128xbf16>, vector<128x128xbf16>, vector<16x128xf32> -> vector<16x128xf32>
    %31 = arith.addf %26, %30 : vector<16x128xf32>
    %32 = vector.extract_strided_slice %9 {offsets = [1, 0], sizes = [16, 128], strides = [1, 1]} : vector<18x128xbf16> to vector<16x128xbf16>
    %c4 = arith.constant 4 : index
    %c0_26 = arith.constant 0 : index
    %c0_27 = arith.constant 0 : index
    %33 = vector.load %arg5[%c4, %c0_26, %c0_27] : memref<9x128x128xbf16, #tpu.memory_space<vmem>>, vector<1x128x128xbf16>
    %34 = vector.shape_cast %33 : vector<1x128x128xbf16> to vector<128x128xbf16>
    %cst_28 = arith.constant dense<0.000000e+00> : vector<16x128xf32>
    %35 = tpu.matmul %32, %34, %cst_28 {dimension_numbers = #tpu.dot_dimension_numbers<[1], [0], [0], [1], [0, 0, 1, 1], [], []>} : vector<16x128xbf16>, vector<128x128xbf16>, vector<16x128xf32> -> vector<16x128xf32>
    %36 = arith.addf %31, %35 : vector<16x128xf32>
    %37 = vector.extract_strided_slice %9 {offsets = [2, 0], sizes = [16, 128], strides = [1, 1]} : vector<18x128xbf16> to vector<16x128xbf16>
    %c5 = arith.constant 5 : index
    %c0_29 = arith.constant 0 : index
    %c0_30 = arith.constant 0 : index
    %38 = vector.load %arg5[%c5, %c0_29, %c0_30] : memref<9x128x128xbf16, #tpu.memory_space<vmem>>, vector<1x128x128xbf16>
    %39 = vector.shape_cast %38 : vector<1x128x128xbf16> to vector<128x128xbf16>
    %cst_31 = arith.constant dense<0.000000e+00> : vector<16x128xf32>
    %40 = tpu.matmul %37, %39, %cst_31 {dimension_numbers = #tpu.dot_dimension_numbers<[1], [0], [0], [1], [0, 0, 1, 1], [], []>} : vector<16x128xbf16>, vector<128x128xbf16>, vector<16x128xf32> -> vector<16x128xf32>
    %41 = arith.addf %36, %40 : vector<16x128xf32>
    %42 = vector.extract_strided_slice %11 {offsets = [0, 0], sizes = [16, 128], strides = [1, 1]} : vector<18x128xbf16> to vector<16x128xbf16>
    %c6 = arith.constant 6 : index
    %c0_32 = arith.constant 0 : index
    %c0_33 = arith.constant 0 : index
    %43 = vector.load %arg5[%c6, %c0_32, %c0_33] : memref<9x128x128xbf16, #tpu.memory_space<vmem>>, vector<1x128x128xbf16>
    %44 = vector.shape_cast %43 : vector<1x128x128xbf16> to vector<128x128xbf16>
    %cst_34 = arith.constant dense<0.000000e+00> : vector<16x128xf32>
    %45 = tpu.matmul %42, %44, %cst_34 {dimension_numbers = #tpu.dot_dimension_numbers<[1], [0], [0], [1], [0, 0, 1, 1], [], []>} : vector<16x128xbf16>, vector<128x128xbf16>, vector<16x128xf32> -> vector<16x128xf32>
    %46 = arith.addf %41, %45 : vector<16x128xf32>
    %47 = vector.extract_strided_slice %11 {offsets = [1, 0], sizes = [16, 128], strides = [1, 1]} : vector<18x128xbf16> to vector<16x128xbf16>
    %c7 = arith.constant 7 : index
    %c0_35 = arith.constant 0 : index
    %c0_36 = arith.constant 0 : index
    %48 = vector.load %arg5[%c7, %c0_35, %c0_36] : memref<9x128x128xbf16, #tpu.memory_space<vmem>>, vector<1x128x128xbf16>
    %49 = vector.shape_cast %48 : vector<1x128x128xbf16> to vector<128x128xbf16>
    %cst_37 = arith.constant dense<0.000000e+00> : vector<16x128xf32>
    %50 = tpu.matmul %47, %49, %cst_37 {dimension_numbers = #tpu.dot_dimension_numbers<[1], [0], [0], [1], [0, 0, 1, 1], [], []>} : vector<16x128xbf16>, vector<128x128xbf16>, vector<16x128xf32> -> vector<16x128xf32>
    %51 = arith.addf %46, %50 : vector<16x128xf32>
    %52 = vector.extract_strided_slice %11 {offsets = [2, 0], sizes = [16, 128], strides = [1, 1]} : vector<18x128xbf16> to vector<16x128xbf16>
    %c8 = arith.constant 8 : index
    %c0_38 = arith.constant 0 : index
    %c0_39 = arith.constant 0 : index
    %53 = vector.load %arg5[%c8, %c0_38, %c0_39] : memref<9x128x128xbf16, #tpu.memory_space<vmem>>, vector<1x128x128xbf16>
    %54 = vector.shape_cast %53 : vector<1x128x128xbf16> to vector<128x128xbf16>
    %cst_40 = arith.constant dense<0.000000e+00> : vector<16x128xf32>
    %55 = tpu.matmul %52, %54, %cst_40 {dimension_numbers = #tpu.dot_dimension_numbers<[1], [0], [0], [1], [0, 0, 1, 1], [], []>} : vector<16x128xbf16>, vector<128x128xbf16>, vector<16x128xf32> -> vector<16x128xf32>
    %56 = arith.addf %51, %55 : vector<16x128xf32>
    %c0_41 = arith.constant 0 : index
    %c0_42 = arith.constant 0 : index
    %57 = vector.load %arg6[%c0_41, %c0_42] : memref<1x128xf32, #tpu.memory_space<vmem>>, vector<1x128xf32>
    %58 = vector.broadcast %57 : vector<1x128xf32> to vector<16x128xf32>
    %59 = arith.addf %56, %58 : vector<16x128xf32>
    %c0_43 = arith.constant 0 : index
    %c0_44 = arith.constant 0 : index
    %c0_45 = arith.constant 0 : index
    %c0_46 = arith.constant 0 : index
    %60 = vector.load %arg7[%c0_43, %c0_44, %c0_45, %c0_46] : memref<1x1x16x128xf32, #tpu.memory_space<vmem>>, vector<1x1x16x128xf32>
    %61 = vector.shape_cast %60 : vector<1x1x16x128xf32> to vector<16x128xf32>
    %62 = vector.shape_cast %59 : vector<16x128xf32> to vector<1x1x16x128xf32>
    tpu.vector_store %arg7[%c0_43, %c0_44, %c0_45, %c0_46], %62 {strides = array<i32>} : memref<1x1x16x128xf32, #tpu.memory_space<vmem>>, vector<1x1x16x128xf32>,
    %c0_47 = arith.constant 0 : index
    %c0_48 = arith.constant 0 : index
    %63 = vector.load %arg8[%c0_47, %c0_48] : memref<1x128xf32, #tpu.memory_space<vmem>>, vector<1x128xf32>
    %cst_49 = arith.constant dense<0.000000e+00> : vector<128xf32>
    %64 = vector.multi_reduction <add>, %59, %cst_49 [0] : vector<16x128xf32> to vector<128xf32>
    %65 = vector.shape_cast %64 : vector<128xf32> to vector<1x128xf32>
    %66 = arith.addf %63, %65 : vector<1x128xf32>
    %c0_50 = arith.constant 0 : index
    %c0_51 = arith.constant 0 : index
    %67 = vector.load %arg8[%c0_50, %c0_51] : memref<1x128xf32, #tpu.memory_space<vmem>>, vector<1x128xf32>
    tpu.vector_store %arg8[%c0_50, %c0_51], %66 {strides = array<i32>} : memref<1x128xf32, #tpu.memory_space<vmem>>, vector<1x128xf32>,
    %c0_52 = arith.constant 0 : index
    %c0_53 = arith.constant 0 : index
    %68 = vector.load %arg9[%c0_52, %c0_53] : memref<1x128xf32, #tpu.memory_space<vmem>>, vector<1x128xf32>
    %69 = arith.mulf %59, %59 : vector<16x128xf32>
    %cst_54 = arith.constant dense<0.000000e+00> : vector<128xf32>
    %70 = vector.multi_reduction <add>, %69, %cst_54 [0] : vector<16x128xf32> to vector<128xf32>
    %71 = vector.shape_cast %70 : vector<128xf32> to vector<1x128xf32>
    %72 = arith.addf %68, %71 : vector<1x128xf32>
    %c0_55 = arith.constant 0 : index
    %c0_56 = arith.constant 0 : index
    %73 = vector.load %arg9[%c0_55, %c0_56] : memref<1x128xf32, #tpu.memory_space<vmem>>, vector<1x128xf32>
    tpu.vector_store %arg9[%c0_55, %c0_56], %72 {strides = array<i32>} : memref<1x128xf32, #tpu.memory_space<vmem>>, vector<1x128xf32>,
    return
  }
  func.func @transform_0(%arg0: i32, %arg1: i32) -> (i32, i32, i32, i32) {
    %c0_i32 = arith.constant 0 : i32
    %0 = arith.addi %arg1, %c0_i32 : i32
    %c0_i32_0 = arith.constant 0 : i32
    %c0_i32_1 = arith.constant 0 : i32
    %c0_i32_2 = arith.constant 0 : i32
    return %arg0, %0, %c0_i32_0, %c0_i32_1 : i32, i32, i32, i32
  }
  func.func @transform_1(%arg0: i32, %arg1: i32) -> (i32, i32, i32, i32) {
    %c1_i32 = arith.constant 1 : i32
    %0 = arith.addi %arg1, %c1_i32 : i32
    %c0_i32 = arith.constant 0 : i32
    %c0_i32_0 = arith.constant 0 : i32
    %c0_i32_1 = arith.constant 0 : i32
    return %arg0, %0, %c0_i32, %c0_i32_0 : i32, i32, i32, i32
  }
  func.func @transform_2(%arg0: i32, %arg1: i32) -> (i32, i32, i32, i32) {
    %c2_i32 = arith.constant 2 : i32
    %0 = arith.addi %arg1, %c2_i32 : i32
    %c0_i32 = arith.constant 0 : i32
    %c0_i32_0 = arith.constant 0 : i32
    %c0_i32_1 = arith.constant 0 : i32
    return %arg0, %0, %c0_i32, %c0_i32_0 : i32, i32, i32, i32
  }
  func.func @transform_3(%arg0: i32, %arg1: i32) -> (i32, i32, i32) {
    %c0_i32 = arith.constant 0 : i32
    %c0_i32_0 = arith.constant 0 : i32
    %c0_i32_1 = arith.constant 0 : i32
    %c0_i32_2 = arith.constant 0 : i32
    return %c0_i32, %c0_i32_0, %c0_i32_1 : i32, i32, i32
  }
  func.func @transform_4(%arg0: i32, %arg1: i32) -> (i32, i32) {
    %c0_i32 = arith.constant 0 : i32
    %c0_i32_0 = arith.constant 0 : i32
    %c0_i32_1 = arith.constant 0 : i32
    return %c0_i32, %c0_i32_0 : i32, i32
  }
  func.func @transform_5(%arg0: i32, %arg1: i32) -> (i32, i32, i32, i32) {
    %c0_i32 = arith.constant 0 : i32
    %c0_i32_0 = arith.constant 0 : i32
    %c0_i32_1 = arith.constant 0 : i32
    return %arg0, %arg1, %c0_i32, %c0_i32_0 : i32, i32, i32, i32
  }
  func.func @transform_6(%arg0: i32, %arg1: i32) -> (i32, i32) {
    %c0_i32 = arith.constant 0 : i32
    %c0_i32_0 = arith.constant 0 : i32
    %c0_i32_1 = arith.constant 0 : i32
    return %c0_i32, %c0_i32_0 : i32, i32
  }
  func.func @transform_7(%arg0: i32, %arg1: i32) -> (i32, i32) {
    %c0_i32 = arith.constant 0 : i32
    %c0_i32_0 = arith.constant 0 : i32
    %c0_i32_1 = arith.constant 0 : i32
    return %c0_i32, %c0_i32_0 : i32, i32
  }
}

module attributes {stable_mosaic.version = 11 : i64} {
  func.func @_bn_relu_kernel(%arg0: i32, %arg1: memref<512x128xf32, #tpu.memory_space<vmem>>, %arg2: memref<1x128xf32, #tpu.memory_space<vmem>>, %arg3: memref<1x128xf32, #tpu.memory_space<vmem>>, %arg4: memref<1x128xf32, #tpu.memory_space<vmem>>, %arg5: memref<1x128xf32, #tpu.memory_space<vmem>>, %arg6: memref<512x128xf32, #tpu.memory_space<vmem>>) attributes {dimension_semantics = [#tpu.dimension_semantics<parallel>], iteration_bounds = array<i64: 1>, scalar_prefetch = 0 : i64, scratch_operands = 0 : i64, tpu.core_type = #tpu.core_type<tc>, window_params = [{transform_indices = @transform_0, window_bounds = array<i64: 512, 128>}, {pipeline_mode = #tpu.pipeline_mode<synchronous>, transform_indices = @transform_1, window_bounds = array<i64: 1, 128>}, {pipeline_mode = #tpu.pipeline_mode<synchronous>, transform_indices = @transform_2, window_bounds = array<i64: 1, 128>}, {pipeline_mode = #tpu.pipeline_mode<synchronous>, transform_indices = @transform_3, window_bounds = array<i64: 1, 128>}, {pipeline_mode = #tpu.pipeline_mode<synchronous>, transform_indices = @transform_4, window_bounds = array<i64: 1, 128>}, {transform_indices = @transform_5, window_bounds = array<i64: 512, 128>}]} {
    %c0 = arith.constant 0 : index
    %c0_0 = arith.constant 0 : index
    %0 = vector.load %arg2[%c0, %c0_0] : memref<1x128xf32, #tpu.memory_space<vmem>>, vector<1x128xf32>
    %cst = arith.constant 0.001953125 : f32
    %1 = vector.broadcast %cst : f32 to vector<1x128xf32>
    %2 = arith.mulf %0, %1 : vector<1x128xf32>
    %c0_1 = arith.constant 0 : index
    %c0_2 = arith.constant 0 : index
    %3 = vector.load %arg3[%c0_1, %c0_2] : memref<1x128xf32, #tpu.memory_space<vmem>>, vector<1x128xf32>
    %cst_3 = arith.constant 0.001953125 : f32
    %4 = vector.broadcast %cst_3 : f32 to vector<1x128xf32>
    %5 = arith.mulf %3, %4 : vector<1x128xf32>
    %6 = arith.mulf %2, %2 : vector<1x128xf32>
    %7 = arith.subf %5, %6 : vector<1x128xf32>
    %cst_4 = arith.constant 0.000000e+00 : f32
    %8 = vector.broadcast %cst_4 : f32 to vector<1x128xf32>
    %9 = arith.maximumf %7, %8 : vector<1x128xf32>
    %c0_5 = arith.constant 0 : index
    %c0_6 = arith.constant 0 : index
    %10 = vector.load %arg4[%c0_5, %c0_6] : memref<1x128xf32, #tpu.memory_space<vmem>>, vector<1x128xf32>
    %cst_7 = arith.constant 9.99999974E-6 : f32
    %11 = vector.broadcast %cst_7 : f32 to vector<1x128xf32>
    %12 = arith.addf %9, %11 : vector<1x128xf32>
    %13 = math.rsqrt %12 : vector<1x128xf32>
    %14 = arith.mulf %10, %13 : vector<1x128xf32>
    %c0_8 = arith.constant 0 : index
    %c0_9 = arith.constant 0 : index
    %15 = vector.load %arg5[%c0_8, %c0_9] : memref<1x128xf32, #tpu.memory_space<vmem>>, vector<1x128xf32>
    %16 = arith.mulf %2, %14 : vector<1x128xf32>
    %17 = arith.subf %15, %16 : vector<1x128xf32>
    %c0_10 = arith.constant 0 : index
    %c0_11 = arith.constant 0 : index
    %18 = vector.load %arg1[%c0_10, %c0_11] : memref<512x128xf32, #tpu.memory_space<vmem>>, vector<512x128xf32>
    %19 = vector.broadcast %14 : vector<1x128xf32> to vector<512x128xf32>
    %20 = arith.mulf %18, %19 : vector<512x128xf32>
    %21 = vector.broadcast %17 : vector<1x128xf32> to vector<512x128xf32>
    %22 = arith.addf %20, %21 : vector<512x128xf32>
    %cst_12 = arith.constant 0.000000e+00 : f32
    %23 = vector.broadcast %cst_12 : f32 to vector<512x128xf32>
    %24 = arith.maximumf %22, %23 : vector<512x128xf32>
    %c0_13 = arith.constant 0 : index
    %c0_14 = arith.constant 0 : index
    %25 = vector.load %arg6[%c0_13, %c0_14] : memref<512x128xf32, #tpu.memory_space<vmem>>, vector<512x128xf32>
    tpu.vector_store %arg6[%c0_13, %c0_14], %24 {strides = array<i32>} : memref<512x128xf32, #tpu.memory_space<vmem>>, vector<512x128xf32>,
    return
  }
  func.func @transform_0(%arg0: i32) -> (i32, i32) {
    %c0_i32 = arith.constant 0 : i32
    %c0_i32_0 = arith.constant 0 : i32
    return %arg0, %c0_i32 : i32, i32
  }
  func.func @transform_1(%arg0: i32) -> (i32, i32) {
    %c0_i32 = arith.constant 0 : i32
    %c0_i32_0 = arith.constant 0 : i32
    %c0_i32_1 = arith.constant 0 : i32
    return %c0_i32, %c0_i32_0 : i32, i32
  }
  func.func @transform_2(%arg0: i32) -> (i32, i32) {
    %c0_i32 = arith.constant 0 : i32
    %c0_i32_0 = arith.constant 0 : i32
    %c0_i32_1 = arith.constant 0 : i32
    return %c0_i32, %c0_i32_0 : i32, i32
  }
  func.func @transform_3(%arg0: i32) -> (i32, i32) {
    %c0_i32 = arith.constant 0 : i32
    %c0_i32_0 = arith.constant 0 : i32
    %c0_i32_1 = arith.constant 0 : i32
    return %c0_i32, %c0_i32_0 : i32, i32
  }
  func.func @transform_4(%arg0: i32) -> (i32, i32) {
    %c0_i32 = arith.constant 0 : i32
    %c0_i32_0 = arith.constant 0 : i32
    %c0_i32_1 = arith.constant 0 : i32
    return %c0_i32, %c0_i32_0 : i32, i32
  }
  func.func @transform_5(%arg0: i32) -> (i32, i32) {
    %c0_i32 = arith.constant 0 : i32
    %c0_i32_0 = arith.constant 0 : i32
    return %arg0, %c0_i32 : i32, i32
  }
}

</mosaic_0001>

<bundles_post_ra>
// kernel: up_block_forward.5
= control target key start
LH: loop header
LB: loop body
LE: loop exit
PB: predicated region body
PF: predicated region fallthrough
CT: control target
= control target key end

     0   :  { %vm104_vm0 = vcmask 1043456   ;;  %vm79_vm1 = vcmask 64512   ;;  %s506_s1 = inlined_call_operand.vmem [shape: bf16[8,128], index: 1, kind: input, shape index: {}]   ;;  %s507_s0 = inlined_call_operand.vmem [shape: bf16[128,8], index: 0, kind: input, shape index: {}]   ;;  %s508_s2 = inlined_call_operand.vmem [shape: f32[1,128], index: 2, kind: input, shape index: {}]   ;;  %s509_s3 = inlined_call_operand.vmem [shape: bf16[128,128], index: 3, kind: output, shape index: {}]  }
   0x1   :  { %v31_v0 = vld [vmem:[%s506_s1] sm:$0xf]  ;;  %v418_v4 = vld [vmem:[%s507_s0 + $0x8] sm:$0xff]   ;;  %v420_v6 = vld [vmem:[%s507_s0 + $0x10] sm:$0xff]  }
   0x2   :  { %414 = vmatprep.subr.msk.bf16.mxu0 %vm104_vm0, %v31_v0  ;;  %415 = vmatprep.subr.msk.bf16.mxu1 %vm104_vm0, %v31_v0  ;;  %v106_v1 = vsel %vm104_vm0, %v31_v0, 0  ;;  %v416_v2 = vld [vmem:[%s507_s0] sm:$0xff]   ;;  %v419_v5 = vld [vmem:[%s507_s0 + $0x28] sm:$0xff]   ;;  %v421_v7 = vld [vmem:[%s507_s0 + $0x30] sm:$0xff]  }
   0x3   :  { %395 = vmatpush3.bf16.msra.mxu0 %v106_v1  ;;  %413 = vmatpush3.bf16.msra.mxu1 %v106_v1  ;;  %v417_v3 = vld [vmem:[%s507_s0 + $0x20] sm:$0xff]   ;;  %v422_v8 = vld [vmem:[%s507_s0 + $0x18] sm:$0xff]  }
   0x4   :  { %396 = vmatprep.mubr.msk.bf16.mxu0 %vm79_vm1, %v416_v2  ;;  %404 = vmatprep.mubr.msk.bf16.mxu1 %vm79_vm1, %v417_v3  ;;  %v423_v9 = vld [vmem:[%s507_s0 + $0x38] sm:$0xff]   ;;  %v289_v11 = vld [vmem:[%s508_s2] ss:$0 sm:$0xff] }
   0x6   :  { %397 = vmatmul.mubr.msk.bf16.vlgmr.msra.gmra.mrb[0].mxu0 %vm79_vm1, %v418_v4  ;;  %405 = vmatmul.mubr.msk.bf16.vlgmr.msra.gmra.mrb[0].mxu1 %vm79_vm1, %v419_v5 }
   0x7   :  { %400 = vmatprep.mubr.msk.bf16.mxu0 %vm79_vm1, %v420_v6  ;;  %408 = vmatprep.mubr.msk.bf16.mxu1 %vm79_vm1, %v421_v7 }
   0xe   :  { %401 = vmatmul.mubr.msk.bf16.gmra.mrb[4].mxu0 %vm79_vm1, %v422_v8  ;;  %409 = vmatmul.mubr.msk.bf16.gmra.mrb[4].mxu1 %vm79_vm1, %v423_v9 }
  0xd9   :  { %v398_v10 = vpop.f32.mrb[0].mxu0  ;;  %v406_v12 = vpop.f32.mrb[0].mxu1 }
  0xda   :  { %v142_v13 = vpop.f32.mrb[1].mxu0  ;;  %v174_v14 = vpop.f32.mrb[1].mxu1  ;;  %v151_v16 = vadd.f32 %v398_v10, %v289_v11  ;;  %v183_v20 = vadd.f32 %v406_v12, %v289_v11 }
  0xdb   :  { %v399_v15 = vpop.f32.mrb[2].mxu0  ;;  %v407_v18 = vpop.f32.mrb[2].mxu1  ;;  %v143_v21 = vadd.f32 %v289_v11, %v142_v13  ;;  %v175_v25 = vadd.f32 %v289_v11, %v174_v14 }
  0xdc   :  { %v154_v17 = vadd.f32 %v399_v15, %v289_v11  ;;  %v145_v19 = vpop.f32.mrb[3].mxu0  ;;  %v186_v22 = vadd.f32 %v407_v18, %v289_v11  ;;  %v177_v24 = vpop.f32.mrb[3].mxu1 }
  0xdd   :  { %v146_v23 = vadd.f32 %v289_v11, %v145_v19  ;;  %v178_v27 = vadd.f32 %v289_v11, %v177_v24 }
  0xde   :  { %v346_v26 = vpack.c.bf16 %v154_v17, %v151_v16  ;;  %v366_v28 = vpack.c.bf16 %v186_v22, %v183_v20 }
  0xdf   :  { %v341_v29 = vpack.c.bf16 %v146_v23, %v143_v21  ;;  %v361_v30 = vpack.c.bf16 %v178_v27, %v175_v25 }
  0xe0   :  { %378 = vst [vmem:[%s509_s3 + $0x8] sm:$0xff] %v346_v26   ;;  %382 = vst [vmem:[%s509_s3 + $0x28] sm:$0xff] %v366_v28  }
  0xe1   :  { %342 = vst [vmem:[%s509_s3] sm:$0xff] %v341_v29   ;;  %v402_v31 = vpop.f32.mrb[4].mxu0  ;;  %381 = vst [vmem:[%s509_s3 + $0x20] sm:$0xff] %v361_v30   ;;  %v410_v32 = vpop.f32.mrb[4].mxu1 }
  0xe2   :  { %v158_v33 = vpop.f32.mrb[5].mxu0  ;;  %v190_v34 = vpop.f32.mrb[5].mxu1  ;;  %v167_v36 = vadd.f32 %v402_v31, %v289_v11  ;;  %v199_v40 = vadd.f32 %v410_v32, %v289_v11 }
  0xe3   :  { %v403_v35 = vpop.f32.mrb[6].mxu0  ;;  %v411_v38 = vpop.f32.mrb[6].mxu1  ;;  %v159_v41 = vadd.f32 %v289_v11, %v158_v33  ;;  %v191_v45 = vadd.f32 %v289_v11, %v190_v34 }
  0xe4   :  { %v170_v37 = vadd.f32 %v403_v35, %v289_v11  ;;  %v161_v39 = vpop.f32.mrb[7].mxu0  ;;  %v202_v42 = vadd.f32 %v411_v38, %v289_v11  ;;  %v193_v44 = vpop.f32.mrb[7].mxu1 }
  0xe5   :  { %v162_v43 = vadd.f32 %v289_v11, %v161_v39  ;;  %v194_v47 = vadd.f32 %v289_v11, %v193_v44 }
  0xe6   :  { %v356_v46 = vpack.c.bf16 %v170_v37, %v167_v36  ;;  %v376_v48 = vpack.c.bf16 %v202_v42, %v199_v40 }
  0xe7   :  { %v351_v49 = vpack.c.bf16 %v162_v43, %v159_v41  ;;  %v371_v50 = vpack.c.bf16 %v194_v47, %v191_v45 }
  0xe8   :  { %380 = vst [vmem:[%s509_s3 + $0x18] sm:$0xff] %v356_v46   ;;  %384 = vst [vmem:[%s509_s3 + $0x38] sm:$0xff] %v376_v48  }
  0xe9   :  { %379 = vst [vmem:[%s509_s3 + $0x10] sm:$0xff] %v351_v49   ;;  %383 = vst [vmem:[%s509_s3 + $0x30] sm:$0xff] %v371_v50  }

// kernel: up_block_forward.7
= control target key start
LH: loop header
LB: loop body
LE: loop exit
PB: predicated region body
PF: predicated region fallthrough
CT: control target
= control target key end

     0   :  { %v99_v8 = vlaneseq  ;;  %s1409_s1 = inlined_call_operand.vmem [shape: f32[1,128], index: 1, kind: input, shape index: {}]   ;;  %s1410_s2 = inlined_call_operand.vmem [shape: f32[1,128], index: 2, kind: input, shape index: {}]   ;;  %s1411_s3 = inlined_call_operand.vmem [shape: f32[1,128], index: 3, kind: input, shape index: {}]   ;;  %s1412_s0 = inlined_call_operand.vmem [shape: f32[512,128], index: 0, kind: input, shape index: {}]   ;;  %s1413_s4 = inlined_call_operand.vmem [shape: f32[1,128], index: 4, kind: input, shape index: {}]   ;;  %s1414_s5 = inlined_call_operand.vmem [shape: bf16[512,128], index: 5, kind: output, shape index: {}]  }
   0x1   :  { %v20_v0 = vld [vmem:[%s1409_s1] sm:$0x1]  ;;  %v35_v16 = vld [vmem:[%s1412_s0 + $0x8] sm:$0xff]  ;;  %v36_v17 = vld [vmem:[%s1412_s0 + $0x10] sm:$0xff] }
   0x2   :  { %v22_v1 = vld [vmem:[%s1410_s2] sm:$0x1]  ;;  %v21_v2 = vmul.f32 0.001953125, %v20_v0  ;;  %v100_v9 = vshrl.u32 %v99_v8, 7  ;;  %v37_v18 = vld [vmem:[%s1412_s0 + $0x18] sm:$0xff]  ;;  %v39_v22 = vld [vmem:[%s1412_s0 + $0x28] sm:$0xff] }
   0x3   :  { %v23_v3 = vmul.f32 0.001953125, %v22_v1  ;;  %v27_v10 = vld [vmem:[%s1411_s3] sm:$0x1]  ;;  %v40_v23 = vld [vmem:[%s1412_s0 + $0x30] sm:$0xff]  ;;  %v41_v24 = vld [vmem:[%s1412_s0 + $0x38] sm:$0xff] }
   0x4   :  { %v24_v4 = vmul.f32 %v21_v2, %v21_v2  ;;  %v101_v11 = vsub.s32 0, %v100_v9  ;;  %v31_v14 = vld [vmem:[%s1413_s4] sm:$0x1]  ;;  %v43_v26 = vld [vmem:[%s1412_s0 + $0x48] sm:$0xff]  ;;  %v44_v27 = vld [vmem:[%s1412_s0 + $0x50] sm:$0xff] }
   0x5   :  { %v34_v15 = vld [vmem:[%s1412_s0] sm:$0xff]  ;;  %v45_v32 = vld [vmem:[%s1412_s0 + $0x58] sm:$0xff]  ;;  %v47_v34 = vld [vmem:[%s1412_s0 + $0x68] sm:$0xff] }
   0x6   :  { %v25_v5 = vsub.f32 %v23_v3, %v24_v4  ;;  %v38_v19 = vld [vmem:[%s1412_s0 + $0x20] sm:$0xff]  ;;  %v48_v3 = vld [vmem:[%s1412_s0 + $0x70] sm:$0xff]  ;;  %v49_v4 = vld [vmem:[%s1412_s0 + $0x78] sm:$0xff] }
   0x7   :  { %v42_v25 = vld [vmem:[%s1412_s0 + $0x40] sm:$0xff] }
   0x8   :  { %v26_v6 = vmax.f32 %v25_v5, 0.0  ;;  %v46_v33 = vld [vmem:[%s1412_s0 + $0x60] sm:$0xff] }
   0x9   :  { %v50_v9 = vld [vmem:[%s1412_s0 + $0x80] sm:$0xff] }
   0xa   :  { %v28_v7 = vadd.f32 1e-05, %v26_v6 }
   0xc   :  { %945 = vrsqrt.f32 %v28_v7 }
  0x16   :  { %v946_v12 = vpop.eup %945 }
  0x17   :  { %v30_v13 = vmul.f32 %v946_v12, %v27_v10 }
  0x19   :  { %v32_v20 = vmul.f32 %v30_v13, %v21_v2  ;;  %v1004_v21 = vrot.slane %v30_v13, %v101_v11 }
  0x1b   :  { %v33_v28 = vsub.f32 %v31_v14, %v32_v20  ;;  %v104_v29 = vmul.f32 %v1004_v21, %v34_v15  ;;  %v105_v30 = vmul.f32 %v1004_v21, %v35_v16  ;;  %v106_v31 = vmul.f32 %v1004_v21, %v36_v17  ;;  %v51_v14 = vld [vmem:[%s1412_s0 + $0x88] sm:$0xff]  ;;  %v53_v20 = vld [vmem:[%s1412_s0 + $0x98] sm:$0xff] }
  0x1c   :  { %v107_v35 = vmul.f32 %v1004_v21, %v37_v18  ;;  %v108_v36 = vmul.f32 %v1004_v21, %v38_v19  ;;  %v109_v37 = vmul.f32 %v1004_v21, %v39_v22  ;;  %v110_v38 = vmul.f32 %v1004_v21, %v40_v23  ;;  %v52_v19 = vld [vmem:[%s1412_s0 + $0x90] sm:$0xff] }
  0x1d   :  { %v1040_v39 = vrot.slane %v33_v28, %v101_v11  ;;  %v111_v40 = vmul.f32 %v1004_v21, %v41_v24  ;;  %v112_v41 = vmul.f32 %v1004_v21, %v42_v25  ;;  %v113_v42 = vmul.f32 %v1004_v21, %v43_v26  ;;  %v54_v26 = vld [vmem:[%s1412_s0 + $0xa0] sm:$0xff] }
  0x1e   :  { %v114_v43 = vmul.f32 %v1004_v21, %v44_v27  ;;  %v115_v44 = vmul.f32 %v1004_v21, %v45_v32  ;;  %v116_v45 = vmul.f32 %v1004_v21, %v46_v33  ;;  %v117_v46 = vmul.f32 %v1004_v21, %v47_v34 }
  0x1f   :  { %v174_v47 = vadd.f32 %v1040_v39, %v104_v29  ;;  %v175_v48 = vadd.f32 %v1040_v39, %v105_v30  ;;  %v176_v49 = vadd.f32 %v1040_v39, %v106_v31  ;;  %v177_v50 = vadd.f32 %v1040_v39, %v107_v35  ;;  %v55_v31 = vld [vmem:[%s1412_s0 + $0xa8] sm:$0xff] }
  0x20   :  { %v178_v51 = vadd.f32 %v1040_v39, %v108_v36  ;;  %v179_v52 = vadd.f32 %v1040_v39, %v109_v37  ;;  %v180_v53 = vadd.f32 %v1040_v39, %v110_v38  ;;  %v181_v54 = vadd.f32 %v1040_v39, %v111_v40  ;;  %v56_v36 = vld [vmem:[%s1412_s0 + $0xb0] sm:$0xff] }
  0x21   :  { %v238_v55 = vmax.f32 %v174_v47, 0.0  ;;  %v239_v56 = vmax.f32 %v175_v48, 0.0  ;;  %v240_v57 = vmax.f32 %v176_v49, 0.0  ;;  %v241_v58 = vmax.f32 %v177_v50, 0.0  ;;  %v58_v47 = vld [vmem:[%s1412_s0 + $0xc0] sm:$0xff] }
  0x22   :  { %v242_v59 = vmax.f32 %v178_v51, 0.0  ;;  %v243_v60 = vmax.f32 %v179_v52, 0.0  ;;  %v244_v61 = vmax.f32 %v180_v53, 0.0  ;;  %v245_v62 = vmax.f32 %v181_v54, 0.0  ;;  %v59_v52 = vld [vmem:[%s1412_s0 + $0xc8] sm:$0xff] }
  0x23   :  { %v757_v63 = vpack.c.bf16 %v239_v56, %v238_v55  ;;  %v762_v0 = vpack.c.bf16 %v241_v58, %v240_v57  ;;  %v182_v1 = vadd.f32 %v1040_v39, %v112_v41  ;;  %v183_v2 = vadd.f32 %v1040_v39, %v113_v42  ;;  %v57_v42 = vld [vmem:[%s1412_s0 + $0xb8] sm:$0xff]  ;;  %v60_v57 = vld [vmem:[%s1412_s0 + $0xd0] sm:$0xff] }
  0x24   :  { %v767_v5 = vpack.c.bf16 %v243_v60, %v242_v59  ;;  %v772_v6 = vpack.c.bf16 %v245_v62, %v244_v61  ;;  %v184_v7 = vadd.f32 %v1040_v39, %v114_v43  ;;  %v185_v8 = vadd.f32 %v1040_v39, %v115_v44  ;;  %v61_v58 = vld [vmem:[%s1412_s0 + $0xd8] sm:$0xff] }
  0x25   :  { %758 = vst [vmem:[%s1414_s5] sm:$0xff] %v757_v63   ;;  %914 = vst [vmem:[%s1414_s5 + $0x8] sm:$0xff] %v762_v0   ;;  %v246_v10 = vmax.f32 %v182_v1, 0.0  ;;  %v247_v11 = vmax.f32 %v183_v2, 0.0  ;;  %v186_v12 = vadd.f32 %v1040_v39, %v116_v45  ;;  %v187_v13 = vadd.f32 %v1040_v39, %v117_v46  ;;  %v62_v63 = vld [vmem:[%s1412_s0 + $0xe0] sm:$0xff] }
  0x26   :  { %915 = vst [vmem:[%s1414_s5 + $0x10] sm:$0xff] %v767_v5   ;;  %916 = vst [vmem:[%s1414_s5 + $0x18] sm:$0xff] %v772_v6   ;;  %v248_v15 = vmax.f32 %v184_v7, 0.0  ;;  %v249_v16 = vmax.f32 %v185_v8, 0.0  ;;  %v118_v17 = vmul.f32 %v1004_v21, %v48_v3  ;;  %v119_v18 = vmul.f32 %v1004_v21, %v49_v4  ;;  %v63_v4 = vld [vmem:[%s1412_s0 + $0xe8] sm:$0xff] }
  0x27   :  { %v777_v22 = vpack.c.bf16 %v247_v11, %v246_v10  ;;  %v250_v23 = vmax.f32 %v186_v12, 0.0  ;;  %v251_v24 = vmax.f32 %v187_v13, 0.0  ;;  %v120_v25 = vmul.f32 %v1004_v21, %v50_v9  ;;  %v64_v9 = vld [vmem:[%s1412_s0 + $0xf0] sm:$0xff] }
  0x28   :  { %v782_v27 = vpack.c.bf16 %v249_v16, %v248_v15  ;;  %v188_v28 = vadd.f32 %v1040_v39, %v118_v17  ;;  %v189_v29 = vadd.f32 %v1040_v39, %v119_v18  ;;  %v121_v30 = vmul.f32 %v1004_v21, %v51_v14  ;;  %v65_v14 = vld [vmem:[%s1412_s0 + $0xf8] sm:$0xff] }
  0x29   :  { %917 = vst [vmem:[%s1414_s5 + $0x20] sm:$0xff] %v777_v22   ;;  %v787_v32 = vpack.c.bf16 %v251_v24, %v250_v23  ;;  %v190_v33 = vadd.f32 %v1040_v39, %v120_v25  ;;  %v122_v34 = vmul.f32 %v1004_v21, %v52_v19  ;;  %v123_v35 = vmul.f32 %v1004_v21, %v53_v20  ;;  %v66_v19 = vld [vmem:[%s1412_s0 + $0x100] sm:$0xff]  ;;  %v67_v25 = vld [vmem:[%s1412_s0 + $0x108] sm:$0xff] }
  0x2a   :  { %918 = vst [vmem:[%s1414_s5 + $0x28] sm:$0xff] %v782_v27   ;;  %v252_v37 = vmax.f32 %v188_v28, 0.0  ;;  %v253_v38 = vmax.f32 %v189_v29, 0.0  ;;  %v191_v40 = vadd.f32 %v1040_v39, %v121_v30  ;;  %v124_v41 = vmul.f32 %v1004_v21, %v54_v26  ;;  %v68_v30 = vld [vmem:[%s1412_s0 + $0x110] sm:$0xff] }
  0x2b   :  { %919 = vst [vmem:[%s1414_s5 + $0x30] sm:$0xff] %v787_v32   ;;  %v254_v43 = vmax.f32 %v190_v33, 0.0  ;;  %v192_v44 = vadd.f32 %v1040_v39, %v122_v34  ;;  %v193_v45 = vadd.f32 %v1040_v39, %v123_v35  ;;  %v125_v46 = vmul.f32 %v1004_v21, %v55_v31  ;;  %v69_v31 = vld [vmem:[%s1412_s0 + $0x118] sm:$0xff] }
  0x2c   :  { %v792_v48 = vpack.c.bf16 %v253_v38, %v252_v37  ;;  %v255_v49 = vmax.f32 %v191_v40, 0.0  ;;  %v194_v50 = vadd.f32 %v1040_v39, %v124_v41  ;;  %v126_v51 = vmul.f32 %v1004_v21, %v56_v36  ;;  %v70_v36 = vld [vmem:[%s1412_s0 + $0x120] sm:$0xff] }
  0x2d   :  { %v256_v53 = vmax.f32 %v192_v44, 0.0  ;;  %v257_v54 = vmax.f32 %v193_v45, 0.0  ;;  %v195_v55 = vadd.f32 %v1040_v39, %v125_v46  ;;  %v127_v56 = vmul.f32 %v1004_v21, %v57_v42  ;;  %v71_v42 = vld [vmem:[%s1412_s0 + $0x128] sm:$0xff] }
  0x2e   :  { %920 = vst [vmem:[%s1414_s5 + $0x38] sm:$0xff] %v792_v48   ;;  %v797_v59 = vpack.c.bf16 %v255_v49, %v254_v43  ;;  %v258_v60 = vmax.f32 %v194_v50, 0.0  ;;  %v196_v61 = vadd.f32 %v1040_v39, %v126_v51  ;;  %v128_v62 = vmul.f32 %v1004_v21, %v58_v47  ;;  %v72_v47 = vld [vmem:[%s1412_s0 + $0x130] sm:$0xff] }
  0x2f   :  { %v802_v0 = vpack.c.bf16 %v257_v54, %v256_v53  ;;  %v259_v1 = vmax.f32 %v195_v55, 0.0  ;;  %v197_v2 = vadd.f32 %v1040_v39, %v127_v56  ;;  %v129_v3 = vmul.f32 %v1004_v21, %v59_v52  ;;  %v73_v52 = vld [vmem:[%s1412_s0 + $0x138] sm:$0xff] }
  0x30   :  { %921 = vst [vmem:[%s1414_s5 + $0x40] sm:$0xff] %v797_v59   ;;  %v260_v5 = vmax.f32 %v196_v61, 0.0  ;;  %v198_v6 = vadd.f32 %v1040_v39, %v128_v62  ;;  %v130_v7 = vmul.f32 %v1004_v21, %v60_v57  ;;  %v131_v8 = vmul.f32 %v1004_v21, %v61_v58  ;;  %v74_v57 = vld [vmem:[%s1412_s0 + $0x140] sm:$0xff]  ;;  %v75_v62 = vld [vmem:[%s1412_s0 + $0x148] sm:$0xff] }
  0x31   :  { %922 = vst [vmem:[%s1414_s5 + $0x48] sm:$0xff] %v802_v0   ;;  %v807_v10 = vpack.c.bf16 %v259_v1, %v258_v60  ;;  %v261_v11 = vmax.f32 %v197_v2, 0.0  ;;  %v199_v12 = vadd.f32 %v1040_v39, %v129_v3  ;;  %v132_v13 = vmul.f32 %v1004_v21, %v62_v63  ;;  %v76_v3 = vld [vmem:[%s1412_s0 + $0x150] sm:$0xff] }
  0x32   :  { %v262_v15 = vmax.f32 %v198_v6, 0.0  ;;  %v200_v16 = vadd.f32 %v1040_v39, %v130_v7  ;;  %v201_v17 = vadd.f32 %v1040_v39, %v131_v8  ;;  %v133_v18 = vmul.f32 %v1004_v21, %v63_v4  ;;  %v77_v4 = vld [vmem:[%s1412_s0 + $0x158] sm:$0xff] }
  0x33   :  { %923 = vst [vmem:[%s1414_s5 + $0x50] sm:$0xff] %v807_v10   ;;  %v812_v20 = vpack.c.bf16 %v261_v11, %v260_v5  ;;  %v263_v22 = vmax.f32 %v199_v12, 0.0  ;;  %v202_v23 = vadd.f32 %v1040_v39, %v132_v13  ;;  %v134_v24 = vmul.f32 %v1004_v21, %v64_v9  ;;  %v78_v9 = vld [vmem:[%s1412_s0 + $0x160] sm:$0xff] }
  0x34   :  { %v264_v26 = vmax.f32 %v200_v16, 0.0  ;;  %v265_v27 = vmax.f32 %v201_v17, 0.0  ;;  %v203_v28 = vadd.f32 %v1040_v39, %v133_v18  ;;  %v135_v29 = vmul.f32 %v1004_v21, %v65_v14  ;;  %v79_v14 = vld [vmem:[%s1412_s0 + $0x168] sm:$0xff] }
  0x35   :  { %924 = vst [vmem:[%s1414_s5 + $0x58] sm:$0xff] %v812_v20   ;;  %v817_v32 = vpack.c.bf16 %v263_v22, %v262_v15  ;;  %v266_v33 = vmax.f32 %v202_v23, 0.0  ;;  %v204_v34 = vadd.f32 %v1040_v39, %v134_v24  ;;  %v136_v35 = vmul.f32 %v1004_v21, %v66_v19  ;;  %v80_v19 = vld [vmem:[%s1412_s0 + $0x170] sm:$0xff] }
  0x36   :  { %v822_v37 = vpack.c.bf16 %v265_v27, %v264_v26  ;;  %v267_v38 = vmax.f32 %v203_v28, 0.0  ;;  %v205_v40 = vadd.f32 %v1040_v39, %v135_v29  ;;  %v137_v41 = vmul.f32 %v1004_v21, %v67_v25  ;;  %v81_v25 = vld [vmem:[%s1412_s0 + $0x178] sm:$0xff] }
  0x37   :  { %925 = vst [vmem:[%s1414_s5 + $0x60] sm:$0xff] %v817_v32   ;;  %v268_v43 = vmax.f32 %v204_v34, 0.0  ;;  %v206_v44 = vadd.f32 %v1040_v39, %v136_v35  ;;  %v138_v45 = vmul.f32 %v1004_v21, %v68_v30  ;;  %v139_v46 = vmul.f32 %v1004_v21, %v69_v31  ;;  %v82_v30 = vld [vmem:[%s1412_s0 + $0x180] sm:$0xff]  ;;  %v83_v35 = vld [vmem:[%s1412_s0 + $0x188] sm:$0xff] }
  0x38   :  { %926 = vst [vmem:[%s1414_s5 + $0x68] sm:$0xff] %v822_v37   ;;  %v827_v48 = vpack.c.bf16 %v267_v38, %v266_v33  ;;  %v269_v49 = vmax.f32 %v205_v40, 0.0  ;;  %v207_v50 = vadd.f32 %v1040_v39, %v137_v41  ;;  %v140_v51 = vmul.f32 %v1004_v21, %v70_v36  ;;  %v84_v41 = vld [vmem:[%s1412_s0 + $0x190] sm:$0xff] }
  0x39   :  { %v270_v53 = vmax.f32 %v206_v44, 0.0  ;;  %v208_v54 = vadd.f32 %v1040_v39, %v138_v45  ;;  %v209_v55 = vadd.f32 %v1040_v39, %v139_v46  ;;  %v141_v56 = vmul.f32 %v1004_v21, %v71_v42  ;;  %v85_v42 = vld [vmem:[%s1412_s0 + $0x198] sm:$0xff] }
  0x3a   :  { %927 = vst [vmem:[%s1414_s5 + $0x70] sm:$0xff] %v827_v48   ;;  %v832_v58 = vpack.c.bf16 %v269_v49, %v268_v43  ;;  %v271_v59 = vmax.f32 %v207_v50, 0.0  ;;  %v210_v60 = vadd.f32 %v1040_v39, %v140_v51  ;;  %v142_v61 = vmul.f32 %v1004_v21, %v72_v47  ;;  %v86_v47 = vld [vmem:[%s1412_s0 + $0x1a0] sm:$0xff] }
  0x3b   :  { %v272_v63 = vmax.f32 %v208_v54, 0.0  ;;  %v273_v0 = vmax.f32 %v209_v55, 0.0  ;;  %v211_v1 = vadd.f32 %v1040_v39, %v141_v56  ;;  %v143_v2 = vmul.f32 %v1004_v21, %v73_v52  ;;  %v87_v52 = vld [vmem:[%s1412_s0 + $0x1a8] sm:$0xff] }
  0x3c   :  { %928 = vst [vmem:[%s1414_s5 + $0x78] sm:$0xff] %v832_v58   ;;  %v837_v5 = vpack.c.bf16 %v271_v59, %v270_v53  ;;  %v274_v6 = vmax.f32 %v210_v60, 0.0  ;;  %v212_v7 = vadd.f32 %v1040_v39, %v142_v61  ;;  %v144_v8 = vmul.f32 %v1004_v21, %v74_v57  ;;  %v88_v57 = vld [vmem:[%s1412_s0 + $0x1b0] sm:$0xff] }
  0x3d   :  { %v842_v10 = vpack.c.bf16 %v273_v0, %v272_v63  ;;  %v275_v11 = vmax.f32 %v211_v1, 0.0  ;;  %v213_v12 = vadd.f32 %v1040_v39, %v143_v2  ;;  %v145_v13 = vmul.f32 %v1004_v21, %v75_v62  ;;  %v89_v62 = vld [vmem:[%s1412_s0 + $0x1b8] sm:$0xff] }
  0x3e   :  { %929 = vst [vmem:[%s1414_s5 + $0x80] sm:$0xff] %v837_v5   ;;  %v276_v15 = vmax.f32 %v212_v7, 0.0  ;;  %v214_v16 = vadd.f32 %v1040_v39, %v144_v8  ;;  %v146_v17 = vmul.f32 %v1004_v21, %v76_v3  ;;  %v147_v18 = vmul.f32 %v1004_v21, %v77_v4  ;;  %v90_v3 = vld [vmem:[%s1412_s0 + $0x1c0] sm:$0xff]  ;;  %v91_v8 = vld [vmem:[%s1412_s0 + $0x1c8] sm:$0xff] }
  0x3f   :  { %930 = vst [vmem:[%s1414_s5 + $0x88] sm:$0xff] %v842_v10   ;;  %v847_v20 = vpack.c.bf16 %v275_v11, %v274_v6  ;;  %v277_v22 = vmax.f32 %v213_v12, 0.0  ;;  %v215_v23 = vadd.f32 %v1040_v39, %v145_v13  ;;  %v148_v24 = vmul.f32 %v1004_v21, %v78_v9  ;;  %v92_v13 = vld [vmem:[%s1412_s0 + $0x1d0] sm:$0xff] }
  0x40   :  { %v278_v26 = vmax.f32 %v214_v16, 0.0  ;;  %v216_v27 = vadd.f32 %v1040_v39, %v146_v17  ;;  %v217_v28 = vadd.f32 %v1040_v39, %v147_v18  ;;  %v149_v29 = vmul.f32 %v1004_v21, %v79_v14  ;;  %v93_v14 = vld [vmem:[%s1412_s0 + $0x1d8] sm:$0xff] }
  0x41   :  { %931 = vst [vmem:[%s1414_s5 + $0x90] sm:$0xff] %v847_v20   ;;  %v852_v31 = vpack.c.bf16 %v277_v22, %v276_v15  ;;  %v279_v32 = vmax.f32 %v215_v23, 0.0  ;;  %v218_v33 = vadd.f32 %v1040_v39, %v148_v24  ;;  %v150_v34 = vmul.f32 %v1004_v21, %v80_v19  ;;  %v94_v19 = vld [vmem:[%s1412_s0 + $0x1e0] sm:$0xff] }
  0x42   :  { %v280_v36 = vmax.f32 %v216_v27, 0.0  ;;  %v281_v37 = vmax.f32 %v217_v28, 0.0  ;;  %v219_v38 = vadd.f32 %v1040_v39, %v149_v29  ;;  %v151_v40 = vmul.f32 %v1004_v21, %v81_v25  ;;  %v95_v25 = vld [vmem:[%s1412_s0 + $0x1e8] sm:$0xff] }
  0x43   :  { %932 = vst [vmem:[%s1414_s5 + $0x98] sm:$0xff] %v852_v31   ;;  %v857_v43 = vpack.c.bf16 %v279_v32, %v278_v26  ;;  %v282_v44 = vmax.f32 %v218_v33, 0.0  ;;  %v220_v45 = vadd.f32 %v1040_v39, %v150_v34  ;;  %v152_v46 = vmul.f32 %v1004_v21, %v82_v30  ;;  %v96_v30 = vld [vmem:[%s1412_s0 + $0x1f0] sm:$0xff] }
  0x44   :  { %v862_v48 = vpack.c.bf16 %v281_v37, %v280_v36  ;;  %v283_v49 = vmax.f32 %v219_v38, 0.0  ;;  %v221_v50 = vadd.f32 %v1040_v39, %v151_v40  ;;  %v153_v51 = vmul.f32 %v1004_v21, %v83_v35  ;;  %v97_v35 = vld [vmem:[%s1412_s0 + $0x1f8] sm:$0xff] }
  0x45   :  { %933 = vst [vmem:[%s1414_s5 + $0xa0] sm:$0xff] %v857_v43   ;;  %v284_v53 = vmax.f32 %v220_v45, 0.0  ;;  %v222_v54 = vadd.f32 %v1040_v39, %v152_v46  ;;  %v154_v55 = vmul.f32 %v1004_v21, %v84_v41  ;;  %v155_v56 = vmul.f32 %v1004_v21, %v85_v42 }
  0x46   :  { %934 = vst [vmem:[%s1414_s5 + $0xa8] sm:$0xff] %v862_v48   ;;  %v867_v58 = vpack.c.bf16 %v283_v49, %v282_v44  ;;  %v285_v59 = vmax.f32 %v221_v50, 0.0  ;;  %v223_v60 = vadd.f32 %v1040_v39, %v153_v51  ;;  %v156_v61 = vmul.f32 %v1004_v21, %v86_v47 }
  0x47   :  { %v286_v63 = vmax.f32 %v222_v54, 0.0  ;;  %v224_v0 = vadd.f32 %v1040_v39, %v154_v55  ;;  %v225_v1 = vadd.f32 %v1040_v39, %v155_v56  ;;  %v157_v2 = vmul.f32 %v1004_v21, %v87_v52 }
  0x48   :  { %935 = vst [vmem:[%s1414_s5 + $0xb0] sm:$0xff] %v867_v58   ;;  %v872_v4 = vpack.c.bf16 %v285_v59, %v284_v53  ;;  %v287_v5 = vmax.f32 %v223_v60, 0.0  ;;  %v226_v6 = vadd.f32 %v1040_v39, %v156_v61  ;;  %v158_v7 = vmul.f32 %v1004_v21, %v88_v57 }
  0x49   :  { %v288_v9 = vmax.f32 %v224_v0, 0.0  ;;  %v289_v10 = vmax.f32 %v225_v1, 0.0  ;;  %v227_v11 = vadd.f32 %v1040_v39, %v157_v2  ;;  %v159_v12 = vmul.f32 %v1004_v21, %v89_v62 }
  0x4a   :  { %936 = vst [vmem:[%s1414_s5 + $0xb8] sm:$0xff] %v872_v4   ;;  %v877_v15 = vpack.c.bf16 %v287_v5, %v286_v63  ;;  %v290_v16 = vmax.f32 %v226_v6, 0.0  ;;  %v228_v17 = vadd.f32 %v1040_v39, %v158_v7  ;;  %v160_v18 = vmul.f32 %v1004_v21, %v90_v3 }
  0x4b   :  { %v882_v20 = vpack.c.bf16 %v289_v10, %v288_v9  ;;  %v291_v22 = vmax.f32 %v227_v11, 0.0  ;;  %v229_v23 = vadd.f32 %v1040_v39, %v159_v12  ;;  %v161_v24 = vmul.f32 %v1004_v21, %v91_v8 }
  0x4c   :  { %937 = vst [vmem:[%s1414_s5 + $0xc0] sm:$0xff] %v877_v15   ;;  %v292_v26 = vmax.f32 %v228_v17, 0.0  ;;  %v230_v27 = vadd.f32 %v1040_v39, %v160_v18  ;;  %v162_v28 = vmul.f32 %v1004_v21, %v92_v13  ;;  %v163_v29 = vmul.f32 %v1004_v21, %v93_v14 }
  0x4d   :  { %938 = vst [vmem:[%s1414_s5 + $0xc8] sm:$0xff] %v882_v20   ;;  %v887_v31 = vpack.c.bf16 %v291_v22, %v290_v16  ;;  %v293_v32 = vmax.f32 %v229_v23, 0.0  ;;  %v231_v33 = vadd.f32 %v1040_v39, %v161_v24  ;;  %v164_v34 = vmul.f32 %v1004_v21, %v94_v19 }
  0x4e   :  { %v294_v36 = vmax.f32 %v230_v27, 0.0  ;;  %v232_v37 = vadd.f32 %v1040_v39, %v162_v28  ;;  %v233_v38 = vadd.f32 %v1040_v39, %v163_v29  ;;  %v165_v40 = vmul.f32 %v1004_v21, %v95_v25 }
  0x4f   :  { %939 = vst [vmem:[%s1414_s5 + $0xd0] sm:$0xff] %v887_v31   ;;  %v892_v41 = vpack.c.bf16 %v293_v32, %v292_v26  ;;  %v295_v42 = vmax.f32 %v231_v33, 0.0  ;;  %v234_v43 = vadd.f32 %v1040_v39, %v164_v34  ;;  %v166_v44 = vmul.f32 %v1004_v21, %v96_v30 }
  0x50   :  { %v296_v45 = vmax.f32 %v232_v37, 0.0  ;;  %v297_v46 = vmax.f32 %v233_v38, 0.0  ;;  %v235_v47 = vadd.f32 %v1040_v39, %v165_v40  ;;  %v167_v48 = vmul.f32 %v1004_v21, %v97_v35 }
  0x51   :  { %940 = vst [vmem:[%s1414_s5 + $0xd8] sm:$0xff] %v892_v41   ;;  %v897_v49 = vpack.c.bf16 %v295_v42, %v294_v36  ;;  %v298_v50 = vmax.f32 %v234_v43, 0.0  ;;  %v236_v51 = vadd.f32 %v1040_v39, %v166_v44 }
  0x52   :  { %v902_v52 = vpack.c.bf16 %v297_v46, %v296_v45  ;;  %v299_v53 = vmax.f32 %v235_v47, 0.0  ;;  %v237_v54 = vadd.f32 %v1040_v39, %v167_v48 }
  0x53   :  { %941 = vst [vmem:[%s1414_s5 + $0xe0] sm:$0xff] %v897_v49   ;;  %v300_v55 = vmax.f32 %v236_v51, 0.0 }
  0x54   :  { %942 = vst [vmem:[%s1414_s5 + $0xe8] sm:$0xff] %v902_v52   ;;  %v907_v21 = vpack.c.bf16 %v299_v53, %v298_v50  ;;  %v301_v56 = vmax.f32 %v237_v54, 0.0 }
  0x56   :  { %943 = vst [vmem:[%s1414_s5 + $0xf0] sm:$0xff] %v907_v21   ;;  %v912_v57 = vpack.c.bf16 %v301_v56, %v300_v55 }
  0x58   :  { %944 = vst [vmem:[%s1414_s5 + $0xf8] sm:$0xff] %v912_v57  }

// kernel: up_block_forward.6
= control target key start
LH: loop header
LB: loop body
LE: loop exit
PB: predicated region body
PF: predicated region fallthrough
CT: control target
= control target key end

     0   :  { %s1361_s24 = smov 0   ;;  %s1363_s25 = smov 0   ;;  %s1547_s0 = inlined_call_operand.vmem [shape: bf16[2,18,18,8], index: 0, kind: input, shape index: {}, may-alias: {0,1,2}]   ;;  %s1548_s1 = inlined_call_operand.vmem [shape: bf16[2,18,18,8], index: 1, kind: input, shape index: {}, may-alias: {0,1,2}]   ;;  %s1549_s2 = inlined_call_operand.vmem [shape: bf16[2,18,18,8], index: 2, kind: input, shape index: {}, may-alias: {0,1,2}]   ;;  %s1550_s3 = inlined_call_operand.vmem [shape: bf16[9,8,128], index: 3, kind: input, shape index: {}]   ;;  %s1551_s4 = inlined_call_operand.vmem [shape: f32[1,128], index: 4, kind: input, shape index: {}]   ;;  %s1552_s5 = inlined_call_operand.vmem [shape: f32[2,16,16,128], index: 5, kind: output, shape index: {0}]   ;;  %s1553_s6 = inlined_call_operand.vmem [shape: f32[1,128], index: 6, kind: output, shape index: {1}]   ;;  %s1554_s7 = inlined_call_operand.vmem [shape: f32[1,128], index: 7, kind: output, shape index: {2}]  }
   0x1   :  { %1555 = sst [smem:[#allocation4_spill]] %s1547_s0  ;;  %s1365_s26 = smov 0  }
   0x2   :  { %s1367_s27 = smov 0   ;;  %s1369_s28 = smov 0  }
   0x3 LB: > { %s27_s29 = sadd.s32 1, %s1308_s26  ;;  %s30_s30 = sadd.s32 1, %s1312_s27  ;;  %s1316_s28 = sphi %s1369_s28, %s18_s28   ;;  %s1312_s27 = sphi %s1367_s27, %s1564_s27   ;;  %s1308_s26 = sphi %s1365_s26, %s1563_s26   ;;  %s1304_s25 = sphi %s1363_s25, %s1562_s25   ;;  %s1300_s24 = sphi %s1361_s24, %s1561_s24  }
   0x4   : > { %p28_p0 = scmp.ge.s32.totalorder %s27_s29, 16  ;;  %p1120_p1 = scmp.ge.s32.totalorder %s1316_s28, 1 }
   0x5   : > { %p292_p2 = scmp.lt.s32.totalorder %s1316_s28, 33 }
   0x6   : > { %s1566_s29 = smov (%p28_p0, %s27_s29), 0  ;;  %s1568_s30 = smov (!%p28_p0, %s30_s30), %s1312_s27 }
   0x7   : > { %1556 = sst [smem:[#allocation2_spill]] %s1566_s29  ;;  %p293_p3 = pnand %p1120_p1, %p292_p2 }
   0x8   : > { %p32_p4 = scmp.ge.s32.totalorder %s1568_s30, 2  ;;  %p352_p5 = scmp.lt.s32.totalorder (!%p293_p3), %s1304_s25, 1 }
   0x9   : > { %296 = sbr.rel (%p293_p3) target bundleno = 314 (0x13a), region = 40  ;;  %p354_p6 = scmp.lt.s32.totalorder (!%p293_p3), %s1300_s24, 17 }
   0xa   : > { %s1570_s30 = smov (%p32_p4, %s1568_s30), 0  ;;  %s361_s8 = sadd.s32 (!%p293_p3), 1, %s1300_s24 }
   0xb   : > { %1557 = sst [smem:[#allocation3_spill]] %s1570_s30  ;;  %s372_s9 = sadd.s32 (!%p293_p3), 2, %s1300_s24 }
   0xc   : > { %p364_p7 = scmp.lt.s32.totalorder (!%p293_p3), %s361_s8, 17  ;;  %p375_p8 = scmp.lt.s32.totalorder (!%p293_p3), %s372_s9, 17 }
   0xd   : > { %s1558_s0 = sld [smem:[#allocation4_spill]] (!%p293_p3)  ;;  %p385_p9 = scmp.lt.s32.totalorder (!%p293_p3), %s1300_s24, 15 }
   0xe   : > { %p393_p10 = scmp.eq.s32.totalorder (!%p293_p3), %s1304_s25, 0  ;;  %p394_p11 = scmp.eq.s32.totalorder (!%p293_p3), %s1300_s24, 0 }
  0x10   : > { %s353_s10 = scalar_select %p352_p5, %s1304_s25, 1 }
  0x11   : > { %s355_s11 = scalar_select %p354_p6, %s1300_s24, 17 }
  0x12   : > { %s1226_s12 = smul.u32 54, %s353_s10  ;;  %s1572_s8 = smov (!%p364_p7, %s361_s8), 17 }
  0x13   : > { %s1225_s13 = smul.u32 3, %s355_s11  ;;  %s1125_s11 = sshll.u32 %s353_s10, 5 }
  0x14   : > { %s1227_s16 = smul.u32 3, %s1572_s8  ;;  %s1574_s9 = smov (!%p375_p8, %s372_s9), 17 }
  0x15   : > { %s358_s14 = sadd.s32 %s1226_s12, %s1225_s13  ;;  %s1576_s24 = smov (!%p385_p9, %s1300_s24), 15 }
  0x16   : > { %s1121_s15 = sshll.u32 %s358_s14, 2  ;;  %s368_s20 = sadd.s32 %s1227_s16, %s1226_s12 }
  0x17   : > { %s1404_s19 = scalar_lea.vmem %s1558_s0, %s1121_s15  ;;  %s1122_s21 = sshll.u32 %s368_s20, 2 }
  0x18   : > { %s1412_s30 = scalar_lea.vmem %s1548_s1, %s1122_s21  ;;  %s1228_s13 = smul.u32 3, %s1574_s9 }
  0x19   : > { %p395_p12 = pnand %p394_p11, %p393_p10  ;;  %s1124_s8 = sshll.u32 %s1576_s24, 1 }
  0x1a   : > { %s379_s14 = sadd.s32 %s1228_s13, %s1226_s12  ;;  %s389_s17 = sadd.s32 %s1125_s11, %s1124_s8  ;;  %v1318_v0 = vmov (!%p395_p12), 0.0  }
  0x1b   : > { %s1123_s15 = sshll.u32 %s379_s14, 2  ;;  %s1126_s18 = sshll.u32 %s389_s17, 3  ;;  %399 = vst [vmem:[%s1553_s6] sm:$0x1] (!%p395_p12), %v1318_v0  ;;  %400 = vst [vmem:[%s1554_s7] sm:$0x1] (!%p395_p12), %v1318_v0 }
  0x1c   : > { %s1418_s25 = scalar_lea.vmem %s1549_s2, %s1123_s15  ;;  %s1423_s21 = scalar_lea.vmem %s1552_s5, %s1126_s18 }
  0x1d   : > { %398 = sbr.rel (%p395_p12) target bundleno = 36 (0x24), region = 44 }
  0x24 PF: > { %v1127_v1 = vld [vmem:[%s1550_s3 + $0x4] sm:$0xf]  ;;  %vm438_vm0 = vcmask 1043456   ;;  %v410_v2 = vld [vmem:[%s1550_s3] sm:$0xf]  ;;  %v1319_v3 = vmov 0.0  }
  0x25   : > { %1171 = vmatprep.subr.bf16.mxu0 %v1319_v3  ;;  %v440_v4 = vsel %vm438_vm0, %v1127_v1, 0  ;;  %1177 = vmatprep.subr.bf16.mxu1 %v1319_v3  ;;  %v486_v5 = vsel %vm438_vm0, %v410_v2, 0  ;;  %v1272_v6 = vld [vmem:[%s1404_s19] sm:$0xff]   ;;  %vm1320_vm1 = vmmov 0   ;;  %vm434_vm2 = vcmask 64512  }
  0x26   : > { %1172 = vmatpush3.bf16.msra.mxu0 %v440_v4  ;;  %1178 = vmatpush3.bf16.msra.mxu1 %v486_v5  ;;  %v1273_v7 = vld [vmem:[%s1404_s19 + $0x8] ss:$0 sps:$4 sm:$0x11]   ;;  %v423_v8 = vshrl.u32 %v1272_v6, 16  ;;  %v425_v9 = vshll.u32 %v1272_v6, 16  ;;  %v1274_v17 = vld [vmem:[%s1412_s30] sm:$0xff]  }
  0x27   : > { %1173 = vmatprep.mubr.msk.bf16.mxu0 %vm1320_vm1, %v1319_v3  ;;  %1179 = vmatprep.mubr.msk.bf16.mxu1 %vm1320_vm1, %v1319_v3  ;;  %v1134_v10 = vld [vmem:[%s1550_s3 + $0xc] sm:$0xf]  ;;  %v430_v12 = vshll.u32 %v1273_v7, 16  ;;  %v1132_v13 = vld [vmem:[%s1550_s3 + $0x8] sm:$0xf]  ;;  %v532_v21 = vrot.slane %v1272_v6, 1 }
  0x28   : > { %1183 = vmatprep.subr.bf16.mxu0 %v1319_v3  ;;  %1189 = vmatprep.subr.bf16.mxu1 %v1319_v3  ;;  %v427_v11 = vrot.slane %v425_v9, 1  ;;  %v595_v14 = vsel %vm438_vm0, %v1134_v10, 0  ;;  %vm421_vm3 = vsmask.f32 7424  ;;  %v1140_v18 = vld [vmem:[%s1550_s3 + $0x14] sm:$0xf] }
  0x29   : > { %1180 = vmatmul.mubr.msk.bf16.vlgmr.msra.gmra.mrb[0].mxu1 %vm434_vm2, %v1272_v6  ;;  %v432_v16 = vrot.slane %v430_v12, 1  ;;  %v539_v19 = vsel %vm438_vm0, %v1132_v13, 0  ;;  %v533_v22 = vrot.slane %v1273_v7, 1  ;;  %v714_v23 = vsel %vm438_vm0, %v1140_v18, 0  ;;  %v1276_v24 = vld [vmem:[%s1418_s25] sm:$0xff]  }
  0x2a   : > { %1190 = vmatpush3.bf16.msra.mxu1 %v595_v14  ;;  %1191 = vmatprep.mubr.msk.bf16.mxu1 %vm1320_vm1, %v1319_v3  ;;  %v428_v15 = vor.u32 %v427_v11, %v423_v8  ;;  %v1275_v25 = vld [vmem:[%s1412_s30 + $0x8] ss:$0 sps:$4 sm:$0x11]   ;;  %v647_v26 = vshll.u32 %v1274_v17, 16  ;;  %vm531_vm4 = vcmask 1046528   ;;  %v707_v28 = vrot.slane %v1274_v17, 1 }
  0x2b   : > { %1201 = vmatprep.subr.bf16.mxu1 %v1319_v3  ;;  %v1137_v27 = vld [vmem:[%s1550_s3 + $0x10] sm:$0xf]  ;;  %v708_v29 = vrot.slane %v1275_v25, 1  ;;  %v1277_v30 = vld [vmem:[%s1418_s25 + $0x8] ss:$0 sps:$4 sm:$0x11]   ;;  %v534_v32 = vsel %vm531_vm4, %v532_v21, %v533_v22 }
  0x2c   : > { %v433_v20 = vsel %vm421_vm3, %v428_v15, %v432_v16  ;;  %v822_v31 = vshll.u32 %v1276_v24, 16  ;;  %v645_v33 = vshrl.u32 %v1274_v17, 16  ;;  %v649_v34 = vrot.slane %v647_v26, 1  ;;  %v1145_v37 = vld [vmem:[%s1550_s3 + $0x1c] sm:$0xf] }
  0x2d   : > { %1174 = vmatmul.mubr.msk.bf16.vlgmr.msra.gmra.mrb[0].mxu0 %vm434_vm2, %v433_v20  ;;  %v652_v35 = vshll.u32 %v1275_v25, 16  ;;  %v660_v36 = vsel %vm438_vm0, %v1137_v27, 0  ;;  %v709_v38 = vsel %vm531_vm4, %v707_v28, %v708_v29  ;;  %v820_v39 = vshrl.u32 %v1276_v24, 16  ;;  %v1142_v45 = vld [vmem:[%s1550_s3 + $0x18] sm:$0xf] }
  0x2e   : > { %1184 = vmatpush3.bf16.msra.mxu0 %v539_v19  ;;  %1185 = vmatprep.mubr.msk.bf16.mxu0 %vm1320_vm1, %v1319_v3  ;;  %v824_v40 = vrot.slane %v822_v31, 1  ;;  %v827_v41 = vshll.u32 %v1277_v30, 16  ;;  %v650_v42 = vor.u32 %v649_v34, %v645_v33  ;;  %v835_v44 = vsel %vm438_vm0, %v1145_v37, 0  ;;  %v1148_v51 = vld [vmem:[%s1550_s3 + $0x20] sm:$0xf] }
  0x2f   : > { %1195 = vmatprep.subr.bf16.mxu0 %v1319_v3  ;;  %v654_v43 = vrot.slane %v652_v35, 1  ;;  %v770_v49 = vsel %vm438_vm0, %v1142_v45, 0  ;;  %v889_v52 = vsel %vm438_vm0, %v1148_v51, 0  ;;  %v882_v53 = vrot.slane %v1276_v24, 1 }
  0x30   : > { %v825_v46 = vor.u32 %v824_v40, %v820_v39  ;;  %v829_v47 = vrot.slane %v827_v41, 1  ;;  %v883_v54 = vrot.slane %v1277_v30, 1  ;;  %v1150_v39 = vld [vmem:[%s1551_s4] ss:$0 sm:$0xff] }
  0x31   : > { %1192 = vmatmul.mubr.msk.bf16.vlgmr.msra.gmra.mrb[4].mxu1 %vm434_vm2, %v1274_v17  ;;  %v655_v48 = vsel %vm421_vm3, %v650_v42, %v654_v43 }
  0x32   : > { %1202 = vmatpush3.bf16.msra.mxu1 %v714_v23  ;;  %1203 = vmatprep.mubr.msk.bf16.mxu1 %vm1320_vm1, %v1319_v3  ;;  %v830_v50 = vsel %vm421_vm3, %v825_v46, %v829_v47  ;;  %v884_v55 = vsel %vm531_vm4, %v882_v53, %v883_v54 }
  0x33   : > { %1213 = vmatprep.subr.bf16.mxu1 %v1319_v3 }
  0x35   : > { %1186 = vmatmul.mubr.msk.bf16.vlgmr.msra.gmra.mrb[4].mxu0 %vm434_vm2, %v534_v32 }
  0x36   : > { %1196 = vmatpush3.bf16.msra.mxu0 %v660_v36  ;;  %1197 = vmatprep.mubr.msk.bf16.mxu0 %vm1320_vm1, %v1319_v3 }
  0x37   : > { %1207 = vmatprep.subr.bf16.mxu0 %v1319_v3 }
  0x39   : > { %1204 = vmatmul.mubr.msk.bf16.vlgmr.msra.gmra.mrb[8].mxu1 %vm434_vm2, %v709_v38 }
  0x3a   : > { %1214 = vmatpush3.bf16.msra.mxu1 %v835_v44  ;;  %1215 = vmatprep.mubr.msk.bf16.mxu1 %vm1320_vm1, %v1319_v3 }
  0x3d   : > { %1198 = vmatmul.mubr.msk.bf16.vlgmr.msra.gmra.mrb[8].mxu0 %vm434_vm2, %v655_v48 }
  0x3e   : > { %1208 = vmatpush3.bf16.msra.mxu0 %v770_v49  ;;  %1209 = vmatprep.mubr.msk.bf16.mxu0 %vm1320_vm1, %v1319_v3 }
  0x3f   : > { %1219 = vmatprep.subr.bf16.mxu0 %v1319_v3 }
  0x41   : > { %1216 = vmatmul.mubr.msk.bf16.vlgmr.msra.gmra.mrb[12].mxu1 %vm434_vm2, %v830_v50 }
  0x45   : > { %1210 = vmatmul.mubr.msk.bf16.vlgmr.msra.gmra.mrb[12].mxu0 %vm434_vm2, %v1276_v24 }
  0x46   : > { %1220 = vmatpush3.bf16.msra.mxu0 %v889_v52  ;;  %1221 = vmatprep.mubr.msk.bf16.mxu0 %vm1320_vm1, %v1319_v3 }
  0x4d   : > { %1222 = vmatmul.mubr.msk.bf16.vlgmr.msra.gmra.mrb[16].mxu0 %vm434_vm2, %v884_v55 }
  0xfc   : > { %v522_v56 = vpop.f32.mrb[0].mxu1 }
  0xfd   : > { %v1181_v57 = vpop.f32.mrb[1].mxu1 }
  0xfe   : > { %v525_v58 = vpop.f32.mrb[2].mxu1 }
  0xff   : > { %v1182_v59 = vpop.f32.mrb[3].mxu1 }
 0x100   : > { %v476_v60 = vpop.f32.mrb[0].mxu0 }
 0x101   : > { %v523_v61 = vadd.f32 %v522_v56, %v476_v60  ;;  %v1175_v62 = vpop.f32.mrb[1].mxu0  ;;  %v945_v60 = vld [vmem:[%s1553_s6] sm:$0x1] }
 0x102   : > { %v479_v63 = vpop.f32.mrb[2].mxu0 }
 0x103   : > { %v526_v0 = vadd.f32 %v525_v58, %v479_v63  ;;  %v1176_v1 = vpop.f32.mrb[3].mxu0  ;;  %v955_v63 = vld [vmem:[%s1554_s7] sm:$0x1] }
 0x104   : > { %v631_v2 = vpop.f32.mrb[4].mxu1 }
 0x105   : > { %v1193_v4 = vpop.f32.mrb[5].mxu1 }
 0x106   : > { %v634_v5 = vpop.f32.mrb[6].mxu1 }
 0x107   : > { %v1194_v3 = vpop.f32.mrb[7].mxu1 }
 0x108   : > { %v575_v6 = vpop.f32.mrb[4].mxu0 }
 0x109   : > { %v582_v7 = vadd.f32 %v575_v6, %v523_v61  ;;  %v1187_v8 = vpop.f32.mrb[5].mxu0 }
 0x10a   : > { %v578_v9 = vpop.f32.mrb[6].mxu0 }
 0x10b   : > { %v583_v10 = vadd.f32 %v578_v9, %v526_v0  ;;  %v638_v11 = vadd.f32 %v631_v2, %v582_v7  ;;  %v1188_v12 = vpop.f32.mrb[7].mxu0 }
 0x10c   : > { %v750_v13 = vpop.f32.mrb[8].mxu1 }
 0x10d   : > { %v1205_v14 = vpop.f32.mrb[9].mxu1  ;;  %v639_v15 = vadd.f32 %v634_v5, %v583_v10 }
 0x10e   : > { %v753_v16 = vpop.f32.mrb[10].mxu1 }
 0x10f   : > { %v1206_v17 = vpop.f32.mrb[11].mxu1 }
 0x110   : > { %v696_v18 = vpop.f32.mrb[8].mxu0 }
 0x111   : > { %v703_v19 = vadd.f32 %v696_v18, %v638_v11  ;;  %v1199_v20 = vpop.f32.mrb[9].mxu0 }
 0x112   : > { %v699_v21 = vpop.f32.mrb[10].mxu0 }
 0x113   : > { %v704_v22 = vadd.f32 %v699_v21, %v639_v15  ;;  %v757_v23 = vadd.f32 %v750_v13, %v703_v19  ;;  %v1200_v24 = vpop.f32.mrb[11].mxu0 }
 0x114   : > { %v871_v25 = vpop.f32.mrb[12].mxu1 }
 0x115   : > { %v1217_v26 = vpop.f32.mrb[13].mxu1  ;;  %v758_v27 = vadd.f32 %v753_v16, %v704_v22 }
 0x116   : > { %v874_v28 = vpop.f32.mrb[14].mxu1 }
 0x117   : > { %v1218_v29 = vpop.f32.mrb[15].mxu1 }
 0x118   : > { %v806_v30 = vpop.f32.mrb[12].mxu0 }
 0x119   : > { %v813_v31 = vadd.f32 %v806_v30, %v757_v23  ;;  %v1211_v32 = vpop.f32.mrb[13].mxu0 }
 0x11a   : > { %v809_v33 = vpop.f32.mrb[14].mxu0 }
 0x11b   : > { %v814_v34 = vadd.f32 %v809_v33, %v758_v27  ;;  %v878_v35 = vadd.f32 %v871_v25, %v813_v31  ;;  %v1212_v36 = vpop.f32.mrb[15].mxu0 }
 0x11d   : > { %v879_v37 = vadd.f32 %v874_v28, %v814_v34 }
 0x120   : > { %v925_v38 = vpop.f32.mrb[16].mxu0 }
 0x121   : > { %v932_v40 = vadd.f32 %v925_v38, %v878_v35  ;;  %v1223_v41 = vpop.f32.mrb[17].mxu0 }
 0x122   : > { %v928_v42 = vpop.f32.mrb[18].mxu0 }
 0x123   : > { %v941_v43 = vadd.f32 %v1150_v39, %v932_v40  ;;  %v933_v44 = vadd.f32 %v928_v42, %v879_v37  ;;  %v1224_v45 = vpop.f32.mrb[19].mxu0 }
 0x125   : > { %943 = vst [vmem:[%s1423_s21] sm:$0xff] %v941_v43  ;;  %v942_v46 = vadd.f32 %v1150_v39, %v933_v44  ;;  %v956_v47 = vmul.f32 %v941_v43, %v941_v43 }
 0x127   : > { %944 = vst [vmem:[%s1423_s21 + $0x8] sm:$0xff] %v942_v46  ;;  %v946_v48 = vadd.f32 %v942_v46, %v941_v43  ;;  %v957_v49 = vmul.f32 %v942_v46, %v942_v46 }
 0x129   : > { %v947_v50 = vrot.slane %v946_v48, 4  ;;  %v958_v51 = vadd.f32 %v957_v49, %v956_v47 }
 0x12b   : > { %v948_v52 = vadd.f32 %v947_v50, %v946_v48  ;;  %v959_v53 = vrot.slane %v958_v51, 4 }
 0x12d   : > { %v949_v54 = vrot.slane %v948_v52, 2  ;;  %v960_v55 = vadd.f32 %v959_v53, %v958_v51 }
 0x12f   : > { %v950_v56 = vadd.f32 %v949_v54, %v948_v52  ;;  %v961_v57 = vrot.slane %v960_v55, 2 }
 0x131   : > { %v951_v58 = vrot.slane %v950_v56, 1  ;;  %v962_v59 = vadd.f32 %v961_v57, %v960_v55 }
 0x133   : > { %v952_v61 = vadd.f32 %v951_v58, %v950_v56  ;;  %v963_v62 = vrot.slane %v962_v59, 1 }
 0x135   : > { %v953_v0 = vadd.f32 %v952_v61, %v945_v60  ;;  %v964_v1 = vadd.f32 %v963_v62, %v962_v59 }
 0x137   : > { %954 = vst [vmem:[%s1553_s6] sm:$0x1] %v953_v0  ;;  %v965_v2 = vadd.f32 %v964_v1, %v955_v63 }
 0x139   : > { %966 = vst [vmem:[%s1554_s7] sm:$0x1] %v965_v2 }
 0x13a PF: > { %s18_s28 = sadd.s32 1, %s1316_s28   ;;  %s1559_s14 = sld [smem:[#allocation2_spill]] }
 0x13b   : > { %p15_p13 = scmp.ge.s32.totalorder %s18_s28, 34   ;;  %s1560_s19 = sld [smem:[#allocation3_spill]] }
 0x13c   : > { %s1561_s24 = smov %s1308_s26  ;;  %s1562_s25 = smov %s1312_s27 }
 0x13d   :  { %17 = sbr.rel (!%p15_p13) target bundleno = 3 (0x3), region = 104 }
 0x140   : > { %s1563_s26 = smov %s1559_s14 }
 0x141   : > { %s1564_s27 = smov %s1560_s19 }

// kernel: up_block_forward.9
= control target key start
LH: loop header
LB: loop body
LE: loop exit
PB: predicated region body
PF: predicated region fallthrough
CT: control target
= control target key end

     0   :  { %v99_v8 = vlaneseq  ;;  %s930_s1 = inlined_call_operand.vmem [shape: f32[1,128], index: 1, kind: input, shape index: {}]   ;;  %s931_s2 = inlined_call_operand.vmem [shape: f32[1,128], index: 2, kind: input, shape index: {}]   ;;  %s932_s3 = inlined_call_operand.vmem [shape: f32[1,128], index: 3, kind: input, shape index: {}]   ;;  %s933_s0 = inlined_call_operand.vmem [shape: f32[512,128], index: 0, kind: input, shape index: {}]   ;;  %s934_s4 = inlined_call_operand.vmem [shape: f32[1,128], index: 4, kind: input, shape index: {}]   ;;  %s935_s5 = inlined_call_operand.vmem [shape: f32[512,128], index: 5, kind: output, shape index: {}]  }
   0x1   :  { %v20_v0 = vld [vmem:[%s930_s1] sm:$0x1]  ;;  %v35_v16 = vld [vmem:[%s933_s0 + $0x8] sm:$0xff]  ;;  %v36_v17 = vld [vmem:[%s933_s0 + $0x10] sm:$0xff] }
   0x2   :  { %v22_v1 = vld [vmem:[%s931_s2] sm:$0x1]  ;;  %v21_v2 = vmul.f32 0.001953125, %v20_v0  ;;  %v100_v9 = vshrl.u32 %v99_v8, 7  ;;  %v37_v18 = vld [vmem:[%s933_s0 + $0x18] sm:$0xff]  ;;  %v39_v22 = vld [vmem:[%s933_s0 + $0x28] sm:$0xff] }
   0x3   :  { %v23_v3 = vmul.f32 0.001953125, %v22_v1  ;;  %v27_v10 = vld [vmem:[%s932_s3] sm:$0x1]  ;;  %v40_v23 = vld [vmem:[%s933_s0 + $0x30] sm:$0xff]  ;;  %v41_v24 = vld [vmem:[%s933_s0 + $0x38] sm:$0xff] }
   0x4   :  { %v24_v4 = vmul.f32 %v21_v2, %v21_v2  ;;  %v101_v11 = vsub.s32 0, %v100_v9  ;;  %v31_v14 = vld [vmem:[%s934_s4] sm:$0x1]  ;;  %v43_v26 = vld [vmem:[%s933_s0 + $0x48] sm:$0xff]  ;;  %v44_v27 = vld [vmem:[%s933_s0 + $0x50] sm:$0xff] }
   0x5   :  { %v34_v15 = vld [vmem:[%s933_s0] sm:$0xff]  ;;  %v45_v32 = vld [vmem:[%s933_s0 + $0x58] sm:$0xff]  ;;  %v47_v34 = vld [vmem:[%s933_s0 + $0x68] sm:$0xff] }
   0x6   :  { %v25_v5 = vsub.f32 %v23_v3, %v24_v4  ;;  %v38_v19 = vld [vmem:[%s933_s0 + $0x20] sm:$0xff]  ;;  %v48_v59 = vld [vmem:[%s933_s0 + $0x70] sm:$0xff]  ;;  %v49_v60 = vld [vmem:[%s933_s0 + $0x78] sm:$0xff] }
   0x7   :  { %v42_v25 = vld [vmem:[%s933_s0 + $0x40] sm:$0xff] }
   0x8   :  { %v26_v6 = vmax.f32 %v25_v5, 0.0  ;;  %v46_v33 = vld [vmem:[%s933_s0 + $0x60] sm:$0xff] }
   0x9   :  { %v50_v5 = vld [vmem:[%s933_s0 + $0x80] sm:$0xff] }
   0xa   :  { %v28_v7 = vadd.f32 1e-05, %v26_v6 }
   0xc   :  { %370 = vrsqrt.f32 %v28_v7 }
  0x16   :  { %v371_v12 = vpop.eup %370 }
  0x17   :  { %v30_v13 = vmul.f32 %v371_v12, %v27_v10  ;;  %v51_v10 = vld [vmem:[%s933_s0 + $0x88] sm:$0xff]  ;;  %v53_v12 = vld [vmem:[%s933_s0 + $0x98] sm:$0xff] }
  0x19   :  { %v32_v20 = vmul.f32 %v30_v13, %v21_v2  ;;  %v429_v21 = vrot.slane %v30_v13, %v101_v11 }
  0x1b   :  { %v33_v28 = vsub.f32 %v31_v14, %v32_v20  ;;  %v104_v29 = vmul.f32 %v429_v21, %v34_v15  ;;  %v105_v30 = vmul.f32 %v429_v21, %v35_v16  ;;  %v106_v31 = vmul.f32 %v429_v21, %v36_v17  ;;  %v54_v17 = vld [vmem:[%s933_s0 + $0xa0] sm:$0xff] }
  0x1c   :  { %v107_v35 = vmul.f32 %v429_v21, %v37_v18  ;;  %v108_v36 = vmul.f32 %v429_v21, %v38_v19  ;;  %v109_v37 = vmul.f32 %v429_v21, %v39_v22  ;;  %v110_v38 = vmul.f32 %v429_v21, %v40_v23  ;;  %v55_v18 = vld [vmem:[%s933_s0 + $0xa8] sm:$0xff] }
  0x1d   :  { %v465_v39 = vrot.slane %v33_v28, %v101_v11  ;;  %v111_v40 = vmul.f32 %v429_v21, %v41_v24  ;;  %v112_v41 = vmul.f32 %v429_v21, %v42_v25  ;;  %v113_v42 = vmul.f32 %v429_v21, %v43_v26  ;;  %v52_v11 = vld [vmem:[%s933_s0 + $0x90] sm:$0xff] }
  0x1e   :  { %v114_v43 = vmul.f32 %v429_v21, %v44_v27  ;;  %v115_v44 = vmul.f32 %v429_v21, %v45_v32  ;;  %v116_v45 = vmul.f32 %v429_v21, %v46_v33  ;;  %v117_v46 = vmul.f32 %v429_v21, %v47_v34  ;;  %v56_v28 = vld [vmem:[%s933_s0 + $0xb0] sm:$0xff] }
  0x1f   :  { %v174_v47 = vadd.f32 %v465_v39, %v104_v29  ;;  %v175_v48 = vadd.f32 %v465_v39, %v105_v30  ;;  %v176_v49 = vadd.f32 %v465_v39, %v106_v31  ;;  %v177_v50 = vadd.f32 %v465_v39, %v107_v35  ;;  %v57_v29 = vld [vmem:[%s933_s0 + $0xb8] sm:$0xff] }
  0x20   :  { %v178_v51 = vadd.f32 %v465_v39, %v108_v36  ;;  %v179_v52 = vadd.f32 %v465_v39, %v109_v37  ;;  %v180_v53 = vadd.f32 %v465_v39, %v110_v38  ;;  %v181_v54 = vadd.f32 %v465_v39, %v111_v40  ;;  %v58_v38 = vld [vmem:[%s933_s0 + $0xc0] sm:$0xff] }
  0x21   :  { %v238_v55 = vmax.f32 %v174_v47, 0.0  ;;  %v239_v56 = vmax.f32 %v175_v48, 0.0  ;;  %v240_v57 = vmax.f32 %v176_v49, 0.0  ;;  %v241_v58 = vmax.f32 %v177_v50, 0.0 }
  0x22   :  { %v242_v61 = vmax.f32 %v178_v51, 0.0  ;;  %v243_v62 = vmax.f32 %v179_v52, 0.0  ;;  %v244_v63 = vmax.f32 %v180_v53, 0.0  ;;  %v245_v0 = vmax.f32 %v181_v54, 0.0  ;;  %v62_v51 = vld [vmem:[%s933_s0 + $0xe0] sm:$0xff]  ;;  %v63_v52 = vld [vmem:[%s933_s0 + $0xe8] sm:$0xff] }
  0x23   :  { %302 = vst [vmem:[%s935_s5] sm:$0xff] %v238_v55  ;;  %303 = vst [vmem:[%s935_s5 + $0x8] sm:$0xff] %v239_v56  ;;  %v182_v1 = vadd.f32 %v465_v39, %v112_v41  ;;  %v183_v2 = vadd.f32 %v465_v39, %v113_v42  ;;  %v184_v3 = vadd.f32 %v465_v39, %v114_v43 }
  0x24   :  { %304 = vst [vmem:[%s935_s5 + $0x10] sm:$0xff] %v240_v57  ;;  %305 = vst [vmem:[%s935_s5 + $0x18] sm:$0xff] %v241_v58  ;;  %v185_v4 = vadd.f32 %v465_v39, %v115_v44  ;;  %v186_v6 = vadd.f32 %v465_v39, %v116_v45  ;;  %v187_v7 = vadd.f32 %v465_v39, %v117_v46  ;;  %v59_v44 = vld [vmem:[%s933_s0 + $0xc8] sm:$0xff]  ;;  %v60_v45 = vld [vmem:[%s933_s0 + $0xd0] sm:$0xff] }
  0x25   :  { %306 = vst [vmem:[%s935_s5 + $0x20] sm:$0xff] %v242_v61  ;;  %307 = vst [vmem:[%s935_s5 + $0x28] sm:$0xff] %v243_v62  ;;  %v118_v8 = vmul.f32 %v429_v21, %v48_v59  ;;  %v119_v9 = vmul.f32 %v429_v21, %v49_v60  ;;  %v246_v13 = vmax.f32 %v182_v1, 0.0  ;;  %v247_v14 = vmax.f32 %v183_v2, 0.0  ;;  %v61_v46 = vld [vmem:[%s933_s0 + $0xd8] sm:$0xff]  ;;  %v64_v61 = vld [vmem:[%s933_s0 + $0xf0] sm:$0xff] }
  0x26   :  { %308 = vst [vmem:[%s935_s5 + $0x30] sm:$0xff] %v244_v63  ;;  %309 = vst [vmem:[%s935_s5 + $0x38] sm:$0xff] %v245_v0  ;;  %v248_v15 = vmax.f32 %v184_v3, 0.0  ;;  %v249_v16 = vmax.f32 %v185_v4, 0.0  ;;  %v250_v19 = vmax.f32 %v186_v6, 0.0  ;;  %v251_v20 = vmax.f32 %v187_v7, 0.0 }
  0x27   :  { %v188_v22 = vadd.f32 %v465_v39, %v118_v8  ;;  %v189_v23 = vadd.f32 %v465_v39, %v119_v9  ;;  %310 = vst [vmem:[%s935_s5 + $0x40] sm:$0xff] %v246_v13  ;;  %311 = vst [vmem:[%s935_s5 + $0x48] sm:$0xff] %v247_v14  ;;  %v120_v24 = vmul.f32 %v429_v21, %v50_v5  ;;  %v65_v62 = vld [vmem:[%s933_s0 + $0xf8] sm:$0xff]  ;;  %v66_v7 = vld [vmem:[%s933_s0 + $0x100] sm:$0xff] }
  0x28   :  { %312 = vst [vmem:[%s935_s5 + $0x50] sm:$0xff] %v248_v15  ;;  %313 = vst [vmem:[%s935_s5 + $0x58] sm:$0xff] %v249_v16  ;;  %v121_v25 = vmul.f32 %v429_v21, %v51_v10  ;;  %v122_v26 = vmul.f32 %v429_v21, %v52_v11  ;;  %v123_v27 = vmul.f32 %v429_v21, %v53_v12  ;;  %v67_v12 = vld [vmem:[%s933_s0 + $0x108] sm:$0xff]  ;;  %v68_v13 = vld [vmem:[%s933_s0 + $0x110] sm:$0xff] }
  0x29   :  { %314 = vst [vmem:[%s935_s5 + $0x60] sm:$0xff] %v250_v19  ;;  %315 = vst [vmem:[%s935_s5 + $0x68] sm:$0xff] %v251_v20  ;;  %v252_v30 = vmax.f32 %v188_v22, 0.0  ;;  %v253_v31 = vmax.f32 %v189_v23, 0.0  ;;  %v124_v32 = vmul.f32 %v429_v21, %v54_v17  ;;  %v125_v33 = vmul.f32 %v429_v21, %v55_v18  ;;  %v69_v14 = vld [vmem:[%s933_s0 + $0x118] sm:$0xff]  ;;  %v70_v19 = vld [vmem:[%s933_s0 + $0x120] sm:$0xff] }
  0x2a   :  { %v190_v34 = vadd.f32 %v465_v39, %v120_v24  ;;  %v191_v35 = vadd.f32 %v465_v39, %v121_v25  ;;  %v192_v36 = vadd.f32 %v465_v39, %v122_v26  ;;  %v193_v37 = vadd.f32 %v465_v39, %v123_v27  ;;  %v71_v20 = vld [vmem:[%s933_s0 + $0x128] sm:$0xff] }
  0x2b   :  { %316 = vst [vmem:[%s935_s5 + $0x70] sm:$0xff] %v252_v30  ;;  %317 = vst [vmem:[%s935_s5 + $0x78] sm:$0xff] %v253_v31  ;;  %v194_v40 = vadd.f32 %v465_v39, %v124_v32  ;;  %v195_v41 = vadd.f32 %v465_v39, %v125_v33  ;;  %v126_v42 = vmul.f32 %v429_v21, %v56_v28  ;;  %v72_v30 = vld [vmem:[%s933_s0 + $0x130] sm:$0xff]  ;;  %v73_v31 = vld [vmem:[%s933_s0 + $0x138] sm:$0xff] }
  0x2c   :  { %v127_v43 = vmul.f32 %v429_v21, %v57_v29  ;;  %v254_v47 = vmax.f32 %v190_v34, 0.0  ;;  %v255_v48 = vmax.f32 %v191_v35, 0.0  ;;  %v256_v49 = vmax.f32 %v192_v36, 0.0 }
  0x2d   :  { %v257_v50 = vmax.f32 %v193_v37, 0.0  ;;  %v258_v53 = vmax.f32 %v194_v40, 0.0  ;;  %v259_v54 = vmax.f32 %v195_v41, 0.0  ;;  %v196_v55 = vadd.f32 %v465_v39, %v126_v42  ;;  %v74_v41 = vld [vmem:[%s933_s0 + $0x140] sm:$0xff] }
  0x2e   :  { %v197_v56 = vadd.f32 %v465_v39, %v127_v43  ;;  %318 = vst [vmem:[%s935_s5 + $0x80] sm:$0xff] %v254_v47  ;;  %319 = vst [vmem:[%s935_s5 + $0x88] sm:$0xff] %v255_v48  ;;  %v128_v57 = vmul.f32 %v429_v21, %v58_v38  ;;  %v129_v58 = vmul.f32 %v429_v21, %v59_v44  ;;  %v76_v47 = vld [vmem:[%s933_s0 + $0x150] sm:$0xff]  ;;  %v77_v48 = vld [vmem:[%s933_s0 + $0x158] sm:$0xff] }
  0x2f   :  { %320 = vst [vmem:[%s935_s5 + $0x90] sm:$0xff] %v256_v49  ;;  %321 = vst [vmem:[%s935_s5 + $0x98] sm:$0xff] %v257_v50  ;;  %v130_v59 = vmul.f32 %v429_v21, %v60_v45  ;;  %v131_v60 = vmul.f32 %v429_v21, %v61_v46  ;;  %v260_v63 = vmax.f32 %v196_v55, 0.0  ;;  %v132_v1 = vmul.f32 %v429_v21, %v62_v51  ;;  %v75_v46 = vld [vmem:[%s933_s0 + $0x148] sm:$0xff] }
  0x30   :  { %322 = vst [vmem:[%s935_s5 + $0xa0] sm:$0xff] %v258_v53  ;;  %323 = vst [vmem:[%s935_s5 + $0xa8] sm:$0xff] %v259_v54  ;;  %v261_v0 = vmax.f32 %v197_v56, 0.0  ;;  %v133_v2 = vmul.f32 %v429_v21, %v63_v52  ;;  %v198_v3 = vadd.f32 %v465_v39, %v128_v57  ;;  %v199_v4 = vadd.f32 %v465_v39, %v129_v58  ;;  %v78_v53 = vld [vmem:[%s933_s0 + $0x160] sm:$0xff]  ;;  %v79_v54 = vld [vmem:[%s933_s0 + $0x168] sm:$0xff] }
  0x31   :  { %v200_v5 = vadd.f32 %v465_v39, %v130_v59  ;;  %v201_v6 = vadd.f32 %v465_v39, %v131_v60  ;;  %324 = vst [vmem:[%s935_s5 + $0xb0] sm:$0xff] %v260_v63  ;;  %v202_v8 = vadd.f32 %v465_v39, %v132_v1  ;;  %v134_v10 = vmul.f32 %v429_v21, %v64_v61  ;;  %v80_v63 = vld [vmem:[%s933_s0 + $0x170] sm:$0xff] }
  0x32   :  { %325 = vst [vmem:[%s935_s5 + $0xb8] sm:$0xff] %v261_v0  ;;  %v203_v9 = vadd.f32 %v465_v39, %v133_v2  ;;  %v135_v11 = vmul.f32 %v429_v21, %v65_v62  ;;  %v262_v15 = vmax.f32 %v198_v3, 0.0  ;;  %v263_v16 = vmax.f32 %v199_v4, 0.0  ;;  %v81_v0 = vld [vmem:[%s933_s0 + $0x178] sm:$0xff] }
  0x33   :  { %v264_v17 = vmax.f32 %v200_v5, 0.0  ;;  %v265_v18 = vmax.f32 %v201_v6, 0.0  ;;  %v266_v22 = vmax.f32 %v202_v8, 0.0  ;;  %v204_v24 = vadd.f32 %v465_v39, %v134_v10 }
  0x34   :  { %v267_v23 = vmax.f32 %v203_v9, 0.0  ;;  %v205_v25 = vadd.f32 %v465_v39, %v135_v11  ;;  %326 = vst [vmem:[%s935_s5 + $0xc0] sm:$0xff] %v262_v15  ;;  %327 = vst [vmem:[%s935_s5 + $0xc8] sm:$0xff] %v263_v16  ;;  %v136_v26 = vmul.f32 %v429_v21, %v66_v7  ;;  %v137_v27 = vmul.f32 %v429_v21, %v67_v12  ;;  %v82_v9 = vld [vmem:[%s933_s0 + $0x180] sm:$0xff]  ;;  %v84_v15 = vld [vmem:[%s933_s0 + $0x190] sm:$0xff] }
  0x35   :  { %328 = vst [vmem:[%s935_s5 + $0xd0] sm:$0xff] %v264_v17  ;;  %329 = vst [vmem:[%s935_s5 + $0xd8] sm:$0xff] %v265_v18  ;;  %v138_v28 = vmul.f32 %v429_v21, %v68_v13  ;;  %v139_v29 = vmul.f32 %v429_v21, %v69_v14  ;;  %v268_v32 = vmax.f32 %v204_v24, 0.0  ;;  %v140_v34 = vmul.f32 %v429_v21, %v70_v19  ;;  %v83_v14 = vld [vmem:[%s933_s0 + $0x188] sm:$0xff]  ;;  %v85_v16 = vld [vmem:[%s933_s0 + $0x198] sm:$0xff] }
  0x36   :  { %330 = vst [vmem:[%s935_s5 + $0xe0] sm:$0xff] %v266_v22  ;;  %331 = vst [vmem:[%s935_s5 + $0xe8] sm:$0xff] %v267_v23  ;;  %v269_v33 = vmax.f32 %v205_v25, 0.0  ;;  %v141_v35 = vmul.f32 %v429_v21, %v71_v20  ;;  %v206_v36 = vadd.f32 %v465_v39, %v136_v26  ;;  %v207_v37 = vadd.f32 %v465_v39, %v137_v27  ;;  %v86_v22 = vld [vmem:[%s933_s0 + $0x1a0] sm:$0xff]  ;;  %v87_v23 = vld [vmem:[%s933_s0 + $0x1a8] sm:$0xff] }
  0x37   :  { %v208_v38 = vadd.f32 %v465_v39, %v138_v28  ;;  %v209_v40 = vadd.f32 %v465_v39, %v139_v29  ;;  %332 = vst [vmem:[%s935_s5 + $0xf0] sm:$0xff] %v268_v32  ;;  %v210_v42 = vadd.f32 %v465_v39, %v140_v34  ;;  %v142_v44 = vmul.f32 %v429_v21, %v72_v30  ;;  %v88_v32 = vld [vmem:[%s933_s0 + $0x1b0] sm:$0xff] }
  0x38   :  { %333 = vst [vmem:[%s935_s5 + $0xf8] sm:$0xff] %v269_v33  ;;  %v211_v43 = vadd.f32 %v465_v39, %v141_v35  ;;  %v143_v45 = vmul.f32 %v429_v21, %v73_v31  ;;  %v270_v49 = vmax.f32 %v206_v36, 0.0  ;;  %v271_v50 = vmax.f32 %v207_v37, 0.0  ;;  %v89_v33 = vld [vmem:[%s933_s0 + $0x1b8] sm:$0xff] }
  0x39   :  { %v272_v51 = vmax.f32 %v208_v38, 0.0  ;;  %v273_v52 = vmax.f32 %v209_v40, 0.0  ;;  %v274_v55 = vmax.f32 %v210_v42, 0.0  ;;  %v212_v57 = vadd.f32 %v465_v39, %v142_v44 }
  0x3a   :  { %v275_v56 = vmax.f32 %v211_v43, 0.0  ;;  %v213_v58 = vadd.f32 %v465_v39, %v143_v45  ;;  %334 = vst [vmem:[%s935_s5 + $0x100] sm:$0xff] %v270_v49  ;;  %335 = vst [vmem:[%s935_s5 + $0x108] sm:$0xff] %v271_v50  ;;  %v144_v59 = vmul.f32 %v429_v21, %v74_v41  ;;  %v145_v60 = vmul.f32 %v429_v21, %v75_v46  ;;  %v90_v43 = vld [vmem:[%s933_s0 + $0x1c0] sm:$0xff]  ;;  %v92_v49 = vld [vmem:[%s933_s0 + $0x1d0] sm:$0xff] }
  0x3b   :  { %336 = vst [vmem:[%s935_s5 + $0x110] sm:$0xff] %v272_v51  ;;  %337 = vst [vmem:[%s935_s5 + $0x118] sm:$0xff] %v273_v52  ;;  %v146_v61 = vmul.f32 %v429_v21, %v76_v47  ;;  %v147_v62 = vmul.f32 %v429_v21, %v77_v48  ;;  %v276_v1 = vmax.f32 %v212_v57, 0.0  ;;  %v148_v3 = vmul.f32 %v429_v21, %v78_v53  ;;  %v91_v48 = vld [vmem:[%s933_s0 + $0x1c8] sm:$0xff]  ;;  %v93_v50 = vld [vmem:[%s933_s0 + $0x1d8] sm:$0xff] }
  0x3c   :  { %338 = vst [vmem:[%s935_s5 + $0x120] sm:$0xff] %v274_v55  ;;  %339 = vst [vmem:[%s935_s5 + $0x128] sm:$0xff] %v275_v56  ;;  %v277_v2 = vmax.f32 %v213_v58, 0.0  ;;  %v149_v4 = vmul.f32 %v429_v21, %v79_v54  ;;  %v214_v5 = vadd.f32 %v465_v39, %v144_v59  ;;  %v215_v6 = vadd.f32 %v465_v39, %v145_v60  ;;  %v94_v55 = vld [vmem:[%s933_s0 + $0x1e0] sm:$0xff]  ;;  %v95_v56 = vld [vmem:[%s933_s0 + $0x1e8] sm:$0xff] }
  0x3d   :  { %v216_v7 = vadd.f32 %v465_v39, %v146_v61  ;;  %v217_v8 = vadd.f32 %v465_v39, %v147_v62  ;;  %340 = vst [vmem:[%s935_s5 + $0x130] sm:$0xff] %v276_v1  ;;  %v218_v10 = vadd.f32 %v465_v39, %v148_v3  ;;  %v150_v12 = vmul.f32 %v429_v21, %v80_v63  ;;  %v96_v1 = vld [vmem:[%s933_s0 + $0x1f0] sm:$0xff] }
  0x3e   :  { %341 = vst [vmem:[%s935_s5 + $0x138] sm:$0xff] %v277_v2  ;;  %v219_v11 = vadd.f32 %v465_v39, %v149_v4  ;;  %v151_v13 = vmul.f32 %v429_v21, %v81_v0  ;;  %v278_v17 = vmax.f32 %v214_v5, 0.0  ;;  %v279_v18 = vmax.f32 %v215_v6, 0.0  ;;  %v97_v2 = vld [vmem:[%s933_s0 + $0x1f8] sm:$0xff] }
  0x3f   :  { %v280_v19 = vmax.f32 %v216_v7, 0.0  ;;  %v281_v20 = vmax.f32 %v217_v8, 0.0  ;;  %v282_v24 = vmax.f32 %v218_v10, 0.0  ;;  %v220_v26 = vadd.f32 %v465_v39, %v150_v12 }
  0x40   :  { %v283_v25 = vmax.f32 %v219_v11, 0.0  ;;  %v221_v27 = vadd.f32 %v465_v39, %v151_v13  ;;  %342 = vst [vmem:[%s935_s5 + $0x140] sm:$0xff] %v278_v17  ;;  %343 = vst [vmem:[%s935_s5 + $0x148] sm:$0xff] %v279_v18  ;;  %v152_v28 = vmul.f32 %v429_v21, %v82_v9  ;;  %v153_v29 = vmul.f32 %v429_v21, %v83_v14 }
  0x41   :  { %344 = vst [vmem:[%s935_s5 + $0x150] sm:$0xff] %v280_v19  ;;  %345 = vst [vmem:[%s935_s5 + $0x158] sm:$0xff] %v281_v20  ;;  %v154_v30 = vmul.f32 %v429_v21, %v84_v15  ;;  %v155_v31 = vmul.f32 %v429_v21, %v85_v16  ;;  %v284_v34 = vmax.f32 %v220_v26, 0.0  ;;  %v156_v36 = vmul.f32 %v429_v21, %v86_v22 }
  0x42   :  { %346 = vst [vmem:[%s935_s5 + $0x160] sm:$0xff] %v282_v24  ;;  %347 = vst [vmem:[%s935_s5 + $0x168] sm:$0xff] %v283_v25  ;;  %v285_v35 = vmax.f32 %v221_v27, 0.0  ;;  %v157_v37 = vmul.f32 %v429_v21, %v87_v23  ;;  %v222_v38 = vadd.f32 %v465_v39, %v152_v28  ;;  %v223_v40 = vadd.f32 %v465_v39, %v153_v29 }
  0x43   :  { %v224_v41 = vadd.f32 %v465_v39, %v154_v30  ;;  %v225_v42 = vadd.f32 %v465_v39, %v155_v31  ;;  %348 = vst [vmem:[%s935_s5 + $0x170] sm:$0xff] %v284_v34  ;;  %v226_v44 = vadd.f32 %v465_v39, %v156_v36  ;;  %v158_v46 = vmul.f32 %v429_v21, %v88_v32 }
  0x44   :  { %349 = vst [vmem:[%s935_s5 + $0x178] sm:$0xff] %v285_v35  ;;  %v227_v45 = vadd.f32 %v465_v39, %v157_v37  ;;  %v159_v47 = vmul.f32 %v429_v21, %v89_v33  ;;  %v286_v51 = vmax.f32 %v222_v38, 0.0  ;;  %v287_v52 = vmax.f32 %v223_v40, 0.0 }
  0x45   :  { %v288_v53 = vmax.f32 %v224_v41, 0.0  ;;  %v289_v54 = vmax.f32 %v225_v42, 0.0  ;;  %v290_v57 = vmax.f32 %v226_v44, 0.0  ;;  %v228_v59 = vadd.f32 %v465_v39, %v158_v46 }
  0x46   :  { %v291_v58 = vmax.f32 %v227_v45, 0.0  ;;  %v229_v60 = vadd.f32 %v465_v39, %v159_v47  ;;  %350 = vst [vmem:[%s935_s5 + $0x180] sm:$0xff] %v286_v51  ;;  %351 = vst [vmem:[%s935_s5 + $0x188] sm:$0xff] %v287_v52  ;;  %v160_v61 = vmul.f32 %v429_v21, %v90_v43  ;;  %v161_v62 = vmul.f32 %v429_v21, %v91_v48 }
  0x47   :  { %352 = vst [vmem:[%s935_s5 + $0x190] sm:$0xff] %v288_v53  ;;  %353 = vst [vmem:[%s935_s5 + $0x198] sm:$0xff] %v289_v54  ;;  %v162_v63 = vmul.f32 %v429_v21, %v92_v49  ;;  %v163_v0 = vmul.f32 %v429_v21, %v93_v50  ;;  %v292_v3 = vmax.f32 %v228_v59, 0.0  ;;  %v164_v5 = vmul.f32 %v429_v21, %v94_v55 }
  0x48   :  { %354 = vst [vmem:[%s935_s5 + $0x1a0] sm:$0xff] %v290_v57  ;;  %355 = vst [vmem:[%s935_s5 + $0x1a8] sm:$0xff] %v291_v58  ;;  %v293_v4 = vmax.f32 %v229_v60, 0.0  ;;  %v165_v6 = vmul.f32 %v429_v21, %v95_v56  ;;  %v230_v7 = vadd.f32 %v465_v39, %v160_v61  ;;  %v231_v8 = vadd.f32 %v465_v39, %v161_v62 }
  0x49   :  { %v232_v9 = vadd.f32 %v465_v39, %v162_v63  ;;  %v233_v10 = vadd.f32 %v465_v39, %v163_v0  ;;  %356 = vst [vmem:[%s935_s5 + $0x1b0] sm:$0xff] %v292_v3  ;;  %v234_v11 = vadd.f32 %v465_v39, %v164_v5  ;;  %v166_v13 = vmul.f32 %v429_v21, %v96_v1 }
  0x4a   :  { %357 = vst [vmem:[%s935_s5 + $0x1b8] sm:$0xff] %v293_v4  ;;  %v235_v12 = vadd.f32 %v465_v39, %v165_v6  ;;  %v167_v14 = vmul.f32 %v429_v21, %v97_v2  ;;  %v294_v15 = vmax.f32 %v230_v7, 0.0  ;;  %v295_v16 = vmax.f32 %v231_v8, 0.0 }
  0x4b   :  { %v296_v17 = vmax.f32 %v232_v9, 0.0  ;;  %v297_v18 = vmax.f32 %v233_v10, 0.0  ;;  %v298_v19 = vmax.f32 %v234_v11, 0.0  ;;  %v236_v22 = vadd.f32 %v465_v39, %v166_v13 }
  0x4c   :  { %v299_v20 = vmax.f32 %v235_v12, 0.0  ;;  %v237_v23 = vadd.f32 %v465_v39, %v167_v14  ;;  %358 = vst [vmem:[%s935_s5 + $0x1c0] sm:$0xff] %v294_v15  ;;  %359 = vst [vmem:[%s935_s5 + $0x1c8] sm:$0xff] %v295_v16 }
  0x4d   :  { %360 = vst [vmem:[%s935_s5 + $0x1d0] sm:$0xff] %v296_v17  ;;  %361 = vst [vmem:[%s935_s5 + $0x1d8] sm:$0xff] %v297_v18  ;;  %v300_v21 = vmax.f32 %v236_v22, 0.0 }
  0x4e   :  { %362 = vst [vmem:[%s935_s5 + $0x1e0] sm:$0xff] %v298_v19  ;;  %363 = vst [vmem:[%s935_s5 + $0x1e8] sm:$0xff] %v299_v20  ;;  %v301_v39 = vmax.f32 %v237_v23, 0.0 }
  0x4f   :  { %364 = vst [vmem:[%s935_s5 + $0x1f0] sm:$0xff] %v300_v21 }
  0x50   :  { %365 = vst [vmem:[%s935_s5 + $0x1f8] sm:$0xff] %v301_v39 }

// kernel: up_block_forward.8
= control target key start
LH: loop header
LB: loop body
LE: loop exit
PB: predicated region body
PF: predicated region fallthrough
CT: control target
= control target key end

     0   :  { %s2328_s24 = smov 0   ;;  %s2330_s25 = smov 0   ;;  %s2764_s0 = inlined_call_operand.vmem [shape: bf16[2,18,18,128], index: 0, kind: input, shape index: {}, may-alias: {0,1,2}]   ;;  %s2765_s1 = inlined_call_operand.vmem [shape: bf16[2,18,18,128], index: 1, kind: input, shape index: {}, may-alias: {0,1,2}]   ;;  %s2766_s2 = inlined_call_operand.vmem [shape: bf16[2,18,18,128], index: 2, kind: input, shape index: {}, may-alias: {0,1,2}]   ;;  %s2767_s3 = inlined_call_operand.vmem [shape: bf16[9,128,128], index: 3, kind: input, shape index: {}]   ;;  %s2768_s4 = inlined_call_operand.vmem [shape: f32[1,128], index: 4, kind: input, shape index: {}]   ;;  %s2769_s5 = inlined_call_operand.vmem [shape: f32[2,16,16,128], index: 5, kind: output, shape index: {0}]   ;;  %s2770_s6 = inlined_call_operand.vmem [shape: f32[1,128], index: 6, kind: output, shape index: {1}]   ;;  %s2771_s7 = inlined_call_operand.vmem [shape: f32[1,128], index: 7, kind: output, shape index: {2}]  }
   0x1   :  { %2772 = sst [smem:[#allocation4_spill]] %s2764_s0  ;;  %s2332_s26 = smov 0  }
   0x2   :  { %s2334_s27 = smov 0   ;;  %s2336_s28 = smov 0  }
   0x3 LB: > { %s27_s29 = sadd.s32 1, %s2275_s26  ;;  %s30_s30 = sadd.s32 1, %s2279_s27  ;;  %s2283_s28 = sphi %s2336_s28, %s18_s28   ;;  %s2279_s27 = sphi %s2334_s27, %s2781_s27   ;;  %s2275_s26 = sphi %s2332_s26, %s2780_s26   ;;  %s2271_s25 = sphi %s2330_s25, %s2779_s25   ;;  %s2267_s24 = sphi %s2328_s24, %s2778_s24  }
   0x4   : > { %p28_p0 = scmp.ge.s32.totalorder %s27_s29, 16  ;;  %p1643_p1 = scmp.ge.s32.totalorder %s2283_s28, 1 }
   0x5   : > { %p292_p2 = scmp.lt.s32.totalorder %s2283_s28, 33 }
   0x6   : > { %s2783_s29 = smov (%p28_p0, %s27_s29), 0  ;;  %s2785_s30 = smov (!%p28_p0, %s30_s30), %s2279_s27 }
   0x7   : > { %2773 = sst [smem:[#allocation2_spill]] %s2783_s29  ;;  %p293_p3 = pnand %p1643_p1, %p292_p2 }
   0x8   : > { %p32_p4 = scmp.ge.s32.totalorder %s2785_s30, 2  ;;  %p352_p5 = scmp.lt.s32.totalorder (!%p293_p3), %s2271_s25, 1 }
   0x9   : > { %296 = sbr.rel (%p293_p3) target bundleno = 434 (0x1b2), region = 40  ;;  %p354_p6 = scmp.lt.s32.totalorder (!%p293_p3), %s2267_s24, 17 }
   0xa   : > { %s2787_s30 = smov (%p32_p4, %s2785_s30), 0  ;;  %s361_s8 = sadd.s32 (!%p293_p3), 1, %s2267_s24 }
   0xb   : > { %2774 = sst [smem:[#allocation3_spill]] %s2787_s30  ;;  %s372_s9 = sadd.s32 (!%p293_p3), 2, %s2267_s24 }
   0xc   : > { %p364_p7 = scmp.lt.s32.totalorder (!%p293_p3), %s361_s8, 17  ;;  %p375_p8 = scmp.lt.s32.totalorder (!%p293_p3), %s372_s9, 17 }
   0xd   : > { %s2775_s0 = sld [smem:[#allocation4_spill]] (!%p293_p3)  ;;  %p385_p9 = scmp.lt.s32.totalorder (!%p293_p3), %s2267_s24, 15 }
   0xe   : > { %p393_p10 = scmp.eq.s32.totalorder (!%p293_p3), %s2271_s25, 0  ;;  %p394_p11 = scmp.eq.s32.totalorder (!%p293_p3), %s2267_s24, 0 }
  0x10   : > { %s353_s10 = scalar_select %p352_p5, %s2271_s25, 1 }
  0x11   : > { %s355_s11 = scalar_select %p354_p6, %s2267_s24, 17 }
  0x12   : > { %s2121_s12 = smul.u32 54, %s353_s10  ;;  %s2789_s8 = smov (!%p364_p7, %s361_s8), 17 }
  0x13   : > { %s2120_s13 = smul.u32 3, %s355_s11  ;;  %s1648_s11 = sshll.u32 %s353_s10, 5 }
  0x14   : > { %s2122_s16 = smul.u32 3, %s2789_s8  ;;  %s2791_s9 = smov (!%p375_p8, %s372_s9), 17 }
  0x15   : > { %s358_s14 = sadd.s32 %s2121_s12, %s2120_s13  ;;  %s2793_s24 = smov (!%p385_p9, %s2267_s24), 15 }
  0x16   : > { %s1644_s15 = sshll.u32 %s358_s14, 2  ;;  %s368_s20 = sadd.s32 %s2122_s16, %s2121_s12 }
  0x17   : > { %s2371_s19 = scalar_lea.vmem %s2775_s0, %s1644_s15  ;;  %s1645_s21 = sshll.u32 %s368_s20, 2 }
  0x18   : > { %s2379_s30 = scalar_lea.vmem %s2765_s1, %s1645_s21  ;;  %s2123_s13 = smul.u32 3, %s2791_s9 }
  0x19   : > { %p395_p12 = pnand %p394_p11, %p393_p10  ;;  %s1647_s8 = sshll.u32 %s2793_s24, 1 }
  0x1a   : > { %s379_s14 = sadd.s32 %s2123_s13, %s2121_s12  ;;  %s389_s17 = sadd.s32 %s1648_s11, %s1647_s8  ;;  %v2285_v0 = vmov (!%p395_p12), 0.0  }
  0x1b   : > { %s1646_s15 = sshll.u32 %s379_s14, 2  ;;  %s1649_s18 = sshll.u32 %s389_s17, 3  ;;  %399 = vst [vmem:[%s2770_s6] sm:$0x1] (!%p395_p12), %v2285_v0  ;;  %400 = vst [vmem:[%s2771_s7] sm:$0x1] (!%p395_p12), %v2285_v0 }
  0x1c   : > { %s2385_s25 = scalar_lea.vmem %s2766_s2, %s1646_s15  ;;  %s2390_s21 = scalar_lea.vmem %s2769_s5, %s1649_s18 }
  0x1d   : > { %398 = sbr.rel (%p395_p12) target bundleno = 36 (0x24), region = 44 }
  0x24 PF: > { %v2167_v1 = vld [vmem:[%s2767_s3 + $0x40] sm:$0xff]   ;;  %v2286_v2 = vmov 0.0   ;;  %v2169_v4 = vld [vmem:[%s2767_s3 + $0x48] sm:$0xff]   ;;  %vm2287_vm0 = vmmov 0   ;;  %v2171_v6 = vld [vmem:[%s2767_s3 + $0x50] sm:$0xff]   ;;  %vm661_vm2 = vcmask 1046528  }
  0x25   : > { %1940 = vmatprep.subr.bf16.mxu0 %v2286_v2  ;;  %1960 = vmatprep.subr.bf16.mxu1 %v2286_v2  ;;  %v2168_v3 = vld [vmem:[%s2767_s3] sm:$0xff]   ;;  %v2170_v5 = vld [vmem:[%s2767_s3 + $0x8] sm:$0xff]   ;;  %v2172_v7 = vld [vmem:[%s2767_s3 + $0x10] sm:$0xff]   ;;  %vm451_vm1 = vsmask.f32 7424 }
  0x26   : > { %1941 = vmatpush3.bf16.msra.mxu0 %v2167_v1  ;;  %1956 = vmatprep.mubr.msk.bf16.mxu0 %vm2287_vm0, %v2286_v2  ;;  %v2173_v8 = vld [vmem:[%s2767_s3 + $0x58] sm:$0xff]   ;;  %v2175_v10 = vld [vmem:[%s2767_s3 + $0x60] sm:$0xff]   ;;  %v2446_v13 = vld [vmem:[%s2371_s19 + $0x8] ss:$0 sps:$4 sm:$0x11]  }
  0x27   : > { %1961 = vmatpush3.bf16.msra.mxu1 %v2168_v3  ;;  %1942 = vmatprep.subr.bf16.mxu0 %v2286_v2  ;;  %v2174_v9 = vld [vmem:[%s2767_s3 + $0x18] sm:$0xff]   ;;  %v2176_v11 = vld [vmem:[%s2767_s3 + $0x20] sm:$0xff]   ;;  %v2177_v14 = vld [vmem:[%s2767_s3 + $0x68] sm:$0xff]   ;;  %v460_v20 = vshll.u32 %v2446_v13, 16  ;;  %v663_v43 = vrot.slane %v2446_v13, 1 }
  0x28   : > { %1962 = vmatprep.subr.bf16.mxu1 %v2286_v2  ;;  %1976 = vmatprep.mubr.msk.bf16.mxu1 %vm2287_vm0, %v2286_v2  ;;  %v2443_v12 = vld [vmem:[%s2371_s19] sm:$0xff]   ;;  %v2178_v15 = vld [vmem:[%s2767_s3 + $0x28] sm:$0xff]   ;;  %v2179_v17 = vld [vmem:[%s2767_s3 + $0x70] sm:$0xff]  }
  0x29   : > { %v455_v16 = vshll.u32 %v2443_v12, 16  ;;  %v453_v18 = vshrl.u32 %v2443_v12, 16  ;;  %v2180_v21 = vld [vmem:[%s2767_s3 + $0x30] sm:$0xff]   ;;  %v2181_v22 = vld [vmem:[%s2767_s3 + $0x78] sm:$0xff]   ;;  %v462_v25 = vrot.slane %v460_v20, 1  ;;  %v2185_v27 = vld [vmem:[%s2767_s3 + $0x80] sm:$0xff]  }
  0x2a   : > { %1943 = vmatpush3.bf16.msra.mxu0 %v2169_v4  ;;  %v2182_v23 = vld [vmem:[%s2767_s3 + $0x38] sm:$0xff]   ;;  %v2186_v28 = vld [vmem:[%s2767_s3 + $0xc0] sm:$0xff]   ;;  %v2187_v29 = vld [vmem:[%s2767_s3 + $0x88] sm:$0xff]   ;;  %v662_v41 = vrot.slane %v2443_v12, 1 }
  0x2b   : > { %1963 = vmatpush3.bf16.msra.mxu1 %v2170_v5  ;;  %1944 = vmatprep.subr.bf16.mxu0 %v2286_v2  ;;  %v457_v19 = vrot.slane %v455_v16, 1  ;;  %v2188_v30 = vld [vmem:[%s2767_s3 + $0xc8] sm:$0xff]   ;;  %v2189_v31 = vld [vmem:[%s2767_s3 + $0x90] sm:$0xff]   ;;  %v2191_v33 = vld [vmem:[%s2767_s3 + $0x98] sm:$0xff]  }
  0x2c   : > { %1964 = vmatprep.subr.bf16.mxu1 %v2286_v2  ;;  %v2190_v32 = vld [vmem:[%s2767_s3 + $0xd0] sm:$0xff]   ;;  %v2192_v34 = vld [vmem:[%s2767_s3 + $0xd8] sm:$0xff]   ;;  %v2193_v35 = vld [vmem:[%s2767_s3 + $0xa0] sm:$0xff]   ;;  %v664_v46 = vsel %vm661_vm2, %v662_v41, %v663_v43 }
  0x2d   : > { %v458_v24 = vor.u32 %v457_v19, %v453_v18  ;;  %v2194_v36 = vld [vmem:[%s2767_s3 + $0xe0] sm:$0xff]   ;;  %v2195_v37 = vld [vmem:[%s2767_s3 + $0xa8] sm:$0xff]   ;;  %v2197_v39 = vld [vmem:[%s2767_s3 + $0xb0] sm:$0xff]  }
  0x2e   : > { %1945 = vmatpush3.bf16.msra.mxu0 %v2171_v6  ;;  %v2196_v38 = vld [vmem:[%s2767_s3 + $0xe8] sm:$0xff]   ;;  %v2198_v40 = vld [vmem:[%s2767_s3 + $0xf0] sm:$0xff]   ;;  %v2199_v42 = vld [vmem:[%s2767_s3 + $0xb8] sm:$0xff]  }
  0x2f   : > { %1965 = vmatpush3.bf16.msra.mxu1 %v2172_v7  ;;  %1946 = vmatprep.subr.bf16.mxu0 %v2286_v2  ;;  %v463_v26 = vsel %vm451_vm1, %v458_v24, %v462_v25  ;;  %v2200_v44 = vld [vmem:[%s2767_s3 + $0xf8] sm:$0xff]   ;;  %v2201_v45 = vld [vmem:[%s2767_s3 + $0x100] sm:$0xff]   ;;  %v2204_v49 = vld [vmem:[%s2767_s3 + $0x108] sm:$0xff]  }
  0x30   : > { %1966 = vmatprep.subr.bf16.mxu1 %v2286_v2  ;;  %v2552_v47 = vld [vmem:[%s2379_s30] sm:$0xff]   ;;  %v2205_v50 = vld [vmem:[%s2767_s3 + $0x148] sm:$0xff]   ;;  %v2206_v51 = vld [vmem:[%s2767_s3 + $0x110] sm:$0xff]  }
  0x31   : > { %v2203_v48 = vld [vmem:[%s2767_s3 + $0x140] sm:$0xff]   ;;  %v2207_v52 = vld [vmem:[%s2767_s3 + $0x150] sm:$0xff]   ;;  %v2208_v53 = vld [vmem:[%s2767_s3 + $0x118] sm:$0xff]   ;;  %v894_v59 = vshll.u32 %v2552_v47, 16  ;;  %v892_v62 = vshrl.u32 %v2552_v47, 16  ;;  %v1012_v7 = vrot.slane %v2552_v47, 1 }
  0x32   : > { %1947 = vmatpush3.bf16.msra.mxu0 %v2173_v8  ;;  %v2209_v54 = vld [vmem:[%s2767_s3 + $0x158] sm:$0xff]   ;;  %v2210_v55 = vld [vmem:[%s2767_s3 + $0x120] sm:$0xff]   ;;  %v2212_v57 = vld [vmem:[%s2767_s3 + $0x128] sm:$0xff]  }
  0x33   : > { %1967 = vmatpush3.bf16.msra.mxu1 %v2174_v9  ;;  %1948 = vmatprep.subr.bf16.mxu0 %v2286_v2  ;;  %v2211_v56 = vld [vmem:[%s2767_s3 + $0x160] sm:$0xff]   ;;  %v2218_v58 = vld [vmem:[%s2379_s30 + $0x8] ss:$0 sps:$4 sm:$0x11]   ;;  %v2214_v61 = vld [vmem:[%s2767_s3 + $0x130] sm:$0xff]   ;;  %v896_v63 = vrot.slane %v894_v59, 1 }
  0x34   : > { %1968 = vmatprep.subr.bf16.mxu1 %v2286_v2  ;;  %v2213_v60 = vld [vmem:[%s2767_s3 + $0x168] sm:$0xff]   ;;  %v899_v0 = vshll.u32 %v2218_v58, 16  ;;  %v2215_v1 = vld [vmem:[%s2767_s3 + $0x170] sm:$0xff]   ;;  %v2216_v3 = vld [vmem:[%s2767_s3 + $0x138] sm:$0xff]   ;;  %v1013_v8 = vrot.slane %v2218_v58, 1 }
  0x35   : > { %v897_v4 = vor.u32 %v896_v63, %v892_v62  ;;  %v2217_v6 = vld [vmem:[%s2767_s3 + $0x178] sm:$0xff]   ;;  %v2221_v13 = vld [vmem:[%s2767_s3 + $0x188] sm:$0xff]   ;;  %v2224_v16 = vld [vmem:[%s2767_s3 + $0x1d0] sm:$0xff]  }
  0x36   : > { %1949 = vmatpush3.bf16.msra.mxu0 %v2175_v10  ;;  %v901_v5 = vrot.slane %v899_v0, 1  ;;  %v2219_v10 = vld [vmem:[%s2767_s3 + $0x180] sm:$0xff]   ;;  %v2226_v18 = vld [vmem:[%s2767_s3 + $0x1d8] sm:$0xff]   ;;  %v2237_v24 = vld [vmem:[%s2385_s25 + $0x8] ss:$0 sps:$4 sm:$0x11]  }
  0x37   : > { %1969 = vmatpush3.bf16.msra.mxu1 %v2176_v11  ;;  %1950 = vmatprep.subr.bf16.mxu0 %v2286_v2  ;;  %v1014_v11 = vsel %vm661_vm2, %v1012_v7, %v1013_v8  ;;  %v2227_v19 = vld [vmem:[%s2767_s3 + $0x1a0] sm:$0xff]   ;;  %v2242_v41 = vld [vmem:[%s2767_s3 + $0x228] sm:$0xff]   ;;  %v2244_v43 = vld [vmem:[%s2767_s3 + $0x238] sm:$0xff]  }
  0x38   : > { %1970 = vmatprep.subr.bf16.mxu1 %v2286_v2  ;;  %v902_v9 = vsel %vm451_vm1, %v897_v4, %v901_v5  ;;  %v2228_v20 = vld [vmem:[%s2767_s3 + $0x1e0] sm:$0xff]  }
  0x3a   : > { %1951 = vmatpush3.bf16.msra.mxu0 %v2177_v14  ;;  %v2222_v14 = vld [vmem:[%s2767_s3 + $0x1c8] sm:$0xff]  }
  0x3b   : > { %1971 = vmatpush3.bf16.msra.mxu1 %v2178_v15  ;;  %1952 = vmatprep.subr.bf16.mxu0 %v2286_v2  ;;  %v2223_v15 = vld [vmem:[%s2767_s3 + $0x190] sm:$0xff]  }
  0x3c   : > { %1972 = vmatprep.subr.bf16.mxu1 %v2286_v2 }
  0x3e   : > { %1953 = vmatpush3.bf16.msra.mxu0 %v2179_v17  ;;  %v2225_v17 = vld [vmem:[%s2767_s3 + $0x198] sm:$0xff]  }
  0x3f   : > { %1973 = vmatpush3.bf16.msra.mxu1 %v2180_v21  ;;  %1954 = vmatprep.subr.bf16.mxu0 %v2286_v2  ;;  %v2235_v21 = vld [vmem:[%s2385_s25] sm:$0xff]  }
  0x40   : > { %1974 = vmatprep.subr.bf16.mxu1 %v2286_v2  ;;  %v1244_v25 = vshll.u32 %v2235_v21, 16 }
  0x42   : > { %1955 = vmatpush3.bf16.msra.mxu0 %v2181_v22  ;;  %v2229_v22 = vld [vmem:[%s2767_s3 + $0x1a8] sm:$0xff]  }
  0x43   : > { %1975 = vmatpush3.bf16.msra.mxu1 %v2182_v23  ;;  %1980 = vmatprep.subr.bf16.mxu0 %v2286_v2  ;;  %v2230_v23 = vld [vmem:[%s2767_s3 + $0x1e8] sm:$0xff]  }
  0x44   : > { %2000 = vmatprep.subr.bf16.mxu1 %v2286_v2 }
  0x45   : > { %1957 = vmatmul.mubr.bf16.vlgmr.msra.gmra.mrb[0].mxu0 %v463_v26  ;;  %v2231_v26 = vld [vmem:[%s2767_s3 + $0x1b0] sm:$0xff]  }
  0x46   : > { %1977 = vmatmul.mubr.bf16.vlgmr.msra.gmra.mrb[0].mxu1 %v2443_v12  ;;  %1981 = vmatpush3.bf16.msra.mxu0 %v2185_v27  ;;  %v2220_v12 = vld [vmem:[%s2767_s3 + $0x1c0] sm:$0xff]   ;;  %v2232_v27 = vld [vmem:[%s2767_s3 + $0x1f0] sm:$0xff]  }
  0x47   : > { %2001 = vmatpush3.bf16.msra.mxu1 %v2186_v28  ;;  %1982 = vmatprep.subr.bf16.mxu0 %v2286_v2  ;;  %v1242_v28 = vshrl.u32 %v2235_v21, 16 }
  0x48   : > { %2002 = vmatprep.subr.bf16.mxu1 %v2286_v2  ;;  %1996 = vmatprep.mubr.msk.bf16.mxu0 %vm2287_vm0, %v2286_v2 }
  0x49   : > { %2016 = vmatprep.mubr.msk.bf16.mxu1 %vm2287_vm0, %v2286_v2 }
  0x4a   : > { %1983 = vmatpush3.bf16.msra.mxu0 %v2187_v29  ;;  %v1246_v29 = vrot.slane %v1244_v25, 1 }
  0x4b   : > { %2003 = vmatpush3.bf16.msra.mxu1 %v2188_v30  ;;  %1984 = vmatprep.subr.bf16.mxu0 %v2286_v2  ;;  %v1249_v30 = vshll.u32 %v2237_v24, 16 }
  0x4c   : > { %2004 = vmatprep.subr.bf16.mxu1 %v2286_v2 }
  0x4e   : > { %1985 = vmatpush3.bf16.msra.mxu0 %v2189_v31  ;;  %v2233_v31 = vld [vmem:[%s2767_s3 + $0x1b8] sm:$0xff]  }
  0x4f   : > { %2005 = vmatpush3.bf16.msra.mxu1 %v2190_v32  ;;  %1986 = vmatprep.subr.bf16.mxu0 %v2286_v2  ;;  %v2234_v32 = vld [vmem:[%s2767_s3 + $0x1f8] sm:$0xff]  }
  0x50   : > { %2006 = vmatprep.subr.bf16.mxu1 %v2286_v2 }
  0x52   : > { %1987 = vmatpush3.bf16.msra.mxu0 %v2191_v33  ;;  %v1247_v33 = vor.u32 %v1246_v29, %v1242_v28 }
  0x53   : > { %2007 = vmatpush3.bf16.msra.mxu1 %v2192_v34  ;;  %1988 = vmatprep.subr.bf16.mxu0 %v2286_v2  ;;  %v1251_v34 = vrot.slane %v1249_v30, 1  ;;  %v1856_v30 = vld [vmem:[%s2768_s4] ss:$0 sm:$0xff] }
  0x54   : > { %2008 = vmatprep.subr.bf16.mxu1 %v2286_v2 }
  0x56   : > { %1989 = vmatpush3.bf16.msra.mxu0 %v2193_v35  ;;  %v2236_v35 = vld [vmem:[%s2767_s3 + $0x200] sm:$0xff]  }
  0x57   : > { %2009 = vmatpush3.bf16.msra.mxu1 %v2194_v36  ;;  %1990 = vmatprep.subr.bf16.mxu0 %v2286_v2  ;;  %v1252_v36 = vsel %vm451_vm1, %v1247_v33, %v1251_v34 }
  0x58   : > { %2010 = vmatprep.subr.bf16.mxu1 %v2286_v2 }
  0x5a   : > { %1991 = vmatpush3.bf16.msra.mxu0 %v2195_v37  ;;  %v2238_v37 = vld [vmem:[%s2767_s3 + $0x208] sm:$0xff]  }
  0x5b   : > { %2011 = vmatpush3.bf16.msra.mxu1 %v2196_v38  ;;  %1992 = vmatprep.subr.bf16.mxu0 %v2286_v2  ;;  %v2239_v38 = vld [vmem:[%s2767_s3 + $0x210] sm:$0xff]  }
  0x5c   : > { %2012 = vmatprep.subr.bf16.mxu1 %v2286_v2 }
  0x5e   : > { %1993 = vmatpush3.bf16.msra.mxu0 %v2197_v39  ;;  %v2240_v39 = vld [vmem:[%s2767_s3 + $0x218] sm:$0xff]  }
  0x5f   : > { %2013 = vmatpush3.bf16.msra.mxu1 %v2198_v40  ;;  %1994 = vmatprep.subr.bf16.mxu0 %v2286_v2  ;;  %v2241_v40 = vld [vmem:[%s2767_s3 + $0x220] sm:$0xff]  }
  0x60   : > { %2014 = vmatprep.subr.bf16.mxu1 %v2286_v2 }
  0x62   : > { %1995 = vmatpush3.bf16.msra.mxu0 %v2199_v42  ;;  %v2243_v42 = vld [vmem:[%s2767_s3 + $0x230] sm:$0xff]  }
  0x63   : > { %2015 = vmatpush3.bf16.msra.mxu1 %v2200_v44  ;;  %2020 = vmatprep.subr.bf16.mxu0 %v2286_v2  ;;  %v1362_v44 = vrot.slane %v2235_v21, 1 }
  0x64   : > { %2040 = vmatprep.subr.bf16.mxu1 %v2286_v2 }
  0x65   : > { %1997 = vmatmul.mubr.bf16.vlgmr.msra.gmra.mrb[4].mxu0 %v664_v46 }
  0x66   : > { %2021 = vmatpush3.bf16.msra.mxu0 %v2201_v45  ;;  %2017 = vmatmul.mubr.bf16.vlgmr.msra.gmra.mrb[4].mxu1 %v2552_v47  ;;  %v1363_v45 = vrot.slane %v2237_v24, 1 }
  0x67   : > { %2041 = vmatpush3.bf16.msra.mxu1 %v2203_v48  ;;  %2022 = vmatprep.subr.bf16.mxu0 %v2286_v2 }
  0x68   : > { %2042 = vmatprep.subr.bf16.mxu1 %v2286_v2  ;;  %2036 = vmatprep.mubr.msk.bf16.mxu0 %vm2287_vm0, %v2286_v2  ;;  %v1364_v46 = vsel %vm661_vm2, %v1362_v44, %v1363_v45 }
  0x69   : > { %2056 = vmatprep.mubr.msk.bf16.mxu1 %vm2287_vm0, %v2286_v2 }
  0x6a   : > { %2023 = vmatpush3.bf16.msra.mxu0 %v2204_v49 }
  0x6b   : > { %2043 = vmatpush3.bf16.msra.mxu1 %v2205_v50  ;;  %2024 = vmatprep.subr.bf16.mxu0 %v2286_v2 }
  0x6c   : > { %2044 = vmatprep.subr.bf16.mxu1 %v2286_v2 }
  0x6e   : > { %2025 = vmatpush3.bf16.msra.mxu0 %v2206_v51 }
  0x6f   : > { %2045 = vmatpush3.bf16.msra.mxu1 %v2207_v52  ;;  %2026 = vmatprep.subr.bf16.mxu0 %v2286_v2 }
  0x70   : > { %2046 = vmatprep.subr.bf16.mxu1 %v2286_v2 }
  0x72   : > { %2027 = vmatpush3.bf16.msra.mxu0 %v2208_v53 }
  0x73   : > { %2047 = vmatpush3.bf16.msra.mxu1 %v2209_v54  ;;  %2028 = vmatprep.subr.bf16.mxu0 %v2286_v2 }
  0x74   : > { %2048 = vmatprep.subr.bf16.mxu1 %v2286_v2 }
  0x76   : > { %2029 = vmatpush3.bf16.msra.mxu0 %v2210_v55 }
  0x77   : > { %2049 = vmatpush3.bf16.msra.mxu1 %v2211_v56  ;;  %2030 = vmatprep.subr.bf16.mxu0 %v2286_v2 }
  0x78   : > { %2050 = vmatprep.subr.bf16.mxu1 %v2286_v2 }
  0x7a   : > { %2031 = vmatpush3.bf16.msra.mxu0 %v2212_v57 }
  0x7b   : > { %2051 = vmatpush3.bf16.msra.mxu1 %v2213_v60  ;;  %2032 = vmatprep.subr.bf16.mxu0 %v2286_v2 }
  0x7c   : > { %2052 = vmatprep.subr.bf16.mxu1 %v2286_v2 }
  0x7e   : > { %2033 = vmatpush3.bf16.msra.mxu0 %v2214_v61 }
  0x7f   : > { %2053 = vmatpush3.bf16.msra.mxu1 %v2215_v1  ;;  %2034 = vmatprep.subr.bf16.mxu0 %v2286_v2 }
  0x80   : > { %2054 = vmatprep.subr.bf16.mxu1 %v2286_v2 }
  0x82   : > { %2035 = vmatpush3.bf16.msra.mxu0 %v2216_v3 }
  0x83   : > { %2055 = vmatpush3.bf16.msra.mxu1 %v2217_v6  ;;  %2060 = vmatprep.subr.bf16.mxu0 %v2286_v2 }
  0x84   : > { %2080 = vmatprep.subr.bf16.mxu1 %v2286_v2 }
  0x85   : > { %2037 = vmatmul.mubr.bf16.vlgmr.msra.gmra.mrb[8].mxu0 %v902_v9 }
  0x86   : > { %2061 = vmatpush3.bf16.msra.mxu0 %v2219_v10  ;;  %2057 = vmatmul.mubr.bf16.vlgmr.msra.gmra.mrb[8].mxu1 %v1014_v11 }
  0x87   : > { %2081 = vmatpush3.bf16.msra.mxu1 %v2220_v12  ;;  %2062 = vmatprep.subr.bf16.mxu0 %v2286_v2 }
  0x88   : > { %2082 = vmatprep.subr.bf16.mxu1 %v2286_v2  ;;  %2076 = vmatprep.mubr.msk.bf16.mxu0 %vm2287_vm0, %v2286_v2 }
  0x89   : > { %2096 = vmatprep.mubr.msk.bf16.mxu1 %vm2287_vm0, %v2286_v2 }
  0x8a   : > { %2063 = vmatpush3.bf16.msra.mxu0 %v2221_v13 }
  0x8b   : > { %2083 = vmatpush3.bf16.msra.mxu1 %v2222_v14  ;;  %2064 = vmatprep.subr.bf16.mxu0 %v2286_v2 }
  0x8c   : > { %2084 = vmatprep.subr.bf16.mxu1 %v2286_v2 }
  0x8e   : > { %2065 = vmatpush3.bf16.msra.mxu0 %v2223_v15 }
  0x8f   : > { %2085 = vmatpush3.bf16.msra.mxu1 %v2224_v16  ;;  %2066 = vmatprep.subr.bf16.mxu0 %v2286_v2 }
  0x90   : > { %2086 = vmatprep.subr.bf16.mxu1 %v2286_v2 }
  0x92   : > { %2067 = vmatpush3.bf16.msra.mxu0 %v2225_v17 }
  0x93   : > { %2087 = vmatpush3.bf16.msra.mxu1 %v2226_v18  ;;  %2068 = vmatprep.subr.bf16.mxu0 %v2286_v2 }
  0x94   : > { %2088 = vmatprep.subr.bf16.mxu1 %v2286_v2 }
  0x96   : > { %2069 = vmatpush3.bf16.msra.mxu0 %v2227_v19 }
  0x97   : > { %2089 = vmatpush3.bf16.msra.mxu1 %v2228_v20  ;;  %2070 = vmatprep.subr.bf16.mxu0 %v2286_v2 }
  0x98   : > { %2090 = vmatprep.subr.bf16.mxu1 %v2286_v2 }
  0x9a   : > { %2071 = vmatpush3.bf16.msra.mxu0 %v2229_v22 }
  0x9b   : > { %2091 = vmatpush3.bf16.msra.mxu1 %v2230_v23  ;;  %2072 = vmatprep.subr.bf16.mxu0 %v2286_v2 }
  0x9c   : > { %2092 = vmatprep.subr.bf16.mxu1 %v2286_v2 }
  0x9e   : > { %2073 = vmatpush3.bf16.msra.mxu0 %v2231_v26 }
  0x9f   : > { %2093 = vmatpush3.bf16.msra.mxu1 %v2232_v27  ;;  %2074 = vmatprep.subr.bf16.mxu0 %v2286_v2 }
  0xa0   : > { %2094 = vmatprep.subr.bf16.mxu1 %v2286_v2 }
  0xa2   : > { %2075 = vmatpush3.bf16.msra.mxu0 %v2233_v31 }
  0xa3   : > { %2095 = vmatpush3.bf16.msra.mxu1 %v2234_v32  ;;  %2100 = vmatprep.subr.bf16.mxu0 %v2286_v2 }
  0xa5   : > { %2077 = vmatmul.mubr.bf16.vlgmr.msra.gmra.mrb[12].mxu0 %v2235_v21 }
  0xa6   : > { %2101 = vmatpush3.bf16.msra.mxu0 %v2236_v35  ;;  %2097 = vmatmul.mubr.bf16.vlgmr.msra.gmra.mrb[12].mxu1 %v1252_v36 }
  0xa7   : > { %2102 = vmatprep.subr.bf16.mxu0 %v2286_v2  ;;  %2116 = vmatprep.mubr.msk.bf16.mxu0 %vm2287_vm0, %v2286_v2 }
  0xaa   : > { %2103 = vmatpush3.bf16.msra.mxu0 %v2238_v37 }
  0xab   : > { %2104 = vmatprep.subr.bf16.mxu0 %v2286_v2 }
  0xae   : > { %2105 = vmatpush3.bf16.msra.mxu0 %v2239_v38 }
  0xaf   : > { %2106 = vmatprep.subr.bf16.mxu0 %v2286_v2 }
  0xb2   : > { %2107 = vmatpush3.bf16.msra.mxu0 %v2240_v39 }
  0xb3   : > { %2108 = vmatprep.subr.bf16.mxu0 %v2286_v2 }
  0xb6   : > { %2109 = vmatpush3.bf16.msra.mxu0 %v2241_v40 }
  0xb7   : > { %2110 = vmatprep.subr.bf16.mxu0 %v2286_v2 }
  0xba   : > { %2111 = vmatpush3.bf16.msra.mxu0 %v2242_v41 }
  0xbb   : > { %2112 = vmatprep.subr.bf16.mxu0 %v2286_v2 }
  0xbe   : > { %2113 = vmatpush3.bf16.msra.mxu0 %v2243_v42 }
  0xbf   : > { %2114 = vmatprep.subr.bf16.mxu0 %v2286_v2 }
  0xc2   : > { %2115 = vmatpush3.bf16.msra.mxu0 %v2244_v43 }
  0xc5   : > { %2117 = vmatmul.mubr.bf16.vlgmr.msra.gmra.mrb[16].mxu0 %v1364_v46 }
 0x118   : > { %v547_v47 = vpop.f32.mrb[0].mxu0 }
 0x119   : > { %v637_v48 = vpop.f32.mrb[0].mxu1  ;;  %v1958_v49 = vpop.f32.mrb[1].mxu0 }
 0x11a   : > { %v638_v50 = vadd.f32 %v637_v48, %v547_v47  ;;  %v1978_v51 = vpop.f32.mrb[1].mxu1  ;;  %v550_v52 = vpop.f32.mrb[2].mxu0 }
 0x11b   : > { %v640_v53 = vpop.f32.mrb[2].mxu1  ;;  %v1959_v54 = vpop.f32.mrb[3].mxu0  ;;  %v1468_v51 = vld [vmem:[%s2770_s6] sm:$0x1] }
 0x11c   : > { %v641_v55 = vadd.f32 %v640_v53, %v550_v52  ;;  %v1979_v56 = vpop.f32.mrb[3].mxu1  ;;  %v1478_v54 = vld [vmem:[%s2771_s7] sm:$0x1] }
 0x138   : > { %v748_v57 = vpop.f32.mrb[4].mxu0 }
 0x139   : > { %v755_v58 = vadd.f32 %v748_v57, %v638_v50  ;;  %v1998_v59 = vpop.f32.mrb[5].mxu0  ;;  %v862_v60 = vpop.f32.mrb[4].mxu1 }
 0x13a   : > { %v751_v61 = vpop.f32.mrb[6].mxu0  ;;  %v2018_v2 = vpop.f32.mrb[5].mxu1 }
 0x13b   : > { %v756_v62 = vadd.f32 %v751_v61, %v641_v55  ;;  %v869_v63 = vadd.f32 %v862_v60, %v755_v58  ;;  %v1999_v0 = vpop.f32.mrb[7].mxu0  ;;  %v865_v1 = vpop.f32.mrb[6].mxu1 }
 0x13c   : > { %v2019_v3 = vpop.f32.mrb[7].mxu1 }
 0x13d   : > { %v870_v4 = vadd.f32 %v865_v1, %v756_v62 }
 0x158   : > { %v986_v5 = vpop.f32.mrb[8].mxu0 }
 0x159   : > { %v993_v6 = vadd.f32 %v986_v5, %v869_v63  ;;  %v2038_v7 = vpop.f32.mrb[9].mxu0  ;;  %v1098_v8 = vpop.f32.mrb[8].mxu1 }
 0x15a   : > { %v989_v9 = vpop.f32.mrb[10].mxu0  ;;  %v2058_v10 = vpop.f32.mrb[9].mxu1 }
 0x15b   : > { %v994_v11 = vadd.f32 %v989_v9, %v870_v4  ;;  %v1105_v12 = vadd.f32 %v1098_v8, %v993_v6  ;;  %v2039_v13 = vpop.f32.mrb[11].mxu0  ;;  %v1101_v14 = vpop.f32.mrb[10].mxu1 }
 0x15c   : > { %v2059_v15 = vpop.f32.mrb[11].mxu1 }
 0x15d   : > { %v1106_v16 = vadd.f32 %v1101_v14, %v994_v11 }
 0x178   : > { %v1212_v17 = vpop.f32.mrb[12].mxu0 }
 0x179   : > { %v1219_v18 = vadd.f32 %v1212_v17, %v1105_v12  ;;  %v2078_v19 = vpop.f32.mrb[13].mxu0  ;;  %v1336_v20 = vpop.f32.mrb[12].mxu1 }
 0x17a   : > { %v1215_v21 = vpop.f32.mrb[14].mxu0  ;;  %v2098_v22 = vpop.f32.mrb[13].mxu1 }
 0x17b   : > { %v1220_v23 = vadd.f32 %v1215_v21, %v1106_v16  ;;  %v1343_v24 = vadd.f32 %v1336_v20, %v1219_v18  ;;  %v2079_v25 = vpop.f32.mrb[15].mxu0  ;;  %v1339_v26 = vpop.f32.mrb[14].mxu1 }
 0x17c   : > { %v2099_v27 = vpop.f32.mrb[15].mxu1 }
 0x17d   : > { %v1344_v28 = vadd.f32 %v1339_v26, %v1220_v23 }
 0x198   : > { %v1448_v29 = vpop.f32.mrb[16].mxu0 }
 0x199   : > { %v1455_v31 = vadd.f32 %v1448_v29, %v1343_v24  ;;  %v2118_v32 = vpop.f32.mrb[17].mxu0 }
 0x19a   : > { %v1451_v33 = vpop.f32.mrb[18].mxu0 }
 0x19b   : > { %v1464_v34 = vadd.f32 %v1856_v30, %v1455_v31  ;;  %v1456_v35 = vadd.f32 %v1451_v33, %v1344_v28  ;;  %v2119_v36 = vpop.f32.mrb[19].mxu0 }
 0x19d   : > { %1466 = vst [vmem:[%s2390_s21] sm:$0xff] %v1464_v34  ;;  %v1465_v37 = vadd.f32 %v1856_v30, %v1456_v35  ;;  %v1479_v38 = vmul.f32 %v1464_v34, %v1464_v34 }
 0x19f   : > { %1467 = vst [vmem:[%s2390_s21 + $0x8] sm:$0xff] %v1465_v37  ;;  %v1469_v39 = vadd.f32 %v1465_v37, %v1464_v34  ;;  %v1480_v40 = vmul.f32 %v1465_v37, %v1465_v37 }
 0x1a1   : > { %v1470_v41 = vrot.slane %v1469_v39, 4  ;;  %v1481_v42 = vadd.f32 %v1480_v40, %v1479_v38 }
 0x1a3   : > { %v1471_v43 = vadd.f32 %v1470_v41, %v1469_v39  ;;  %v1482_v44 = vrot.slane %v1481_v42, 4 }
 0x1a5   : > { %v1472_v45 = vrot.slane %v1471_v43, 2  ;;  %v1483_v46 = vadd.f32 %v1482_v44, %v1481_v42 }
 0x1a7   : > { %v1473_v47 = vadd.f32 %v1472_v45, %v1471_v43  ;;  %v1484_v48 = vrot.slane %v1483_v46, 2 }
 0x1a9   : > { %v1474_v49 = vrot.slane %v1473_v47, 1  ;;  %v1485_v50 = vadd.f32 %v1484_v48, %v1483_v46 }
 0x1ab   : > { %v1475_v52 = vadd.f32 %v1474_v49, %v1473_v47  ;;  %v1486_v53 = vrot.slane %v1485_v50, 1 }
 0x1ad   : > { %v1476_v55 = vadd.f32 %v1475_v52, %v1468_v51  ;;  %v1487_v56 = vadd.f32 %v1486_v53, %v1485_v50 }
 0x1af   : > { %1477 = vst [vmem:[%s2770_s6] sm:$0x1] %v1476_v55  ;;  %v1488_v57 = vadd.f32 %v1487_v56, %v1478_v54 }
 0x1b1   : > { %1489 = vst [vmem:[%s2771_s7] sm:$0x1] %v1488_v57 }
 0x1b2 PF: > { %s18_s28 = sadd.s32 1, %s2283_s28   ;;  %s2776_s11 = sld [smem:[#allocation2_spill]] }
 0x1b3   : > { %p15_p13 = scmp.ge.s32.totalorder %s18_s28, 34   ;;  %s2777_s13 = sld [smem:[#allocation3_spill]] }
 0x1b4   : > { %s2778_s24 = smov %s2275_s26  ;;  %s2779_s25 = smov %s2279_s27 }
 0x1b5   :  { %17 = sbr.rel (!%p15_p13) target bundleno = 3 (0x3), region = 104 }
 0x1b8   : > { %s2780_s26 = smov %s2776_s11 }
 0x1b9   : > { %s2781_s27 = smov %s2777_s13 }

</bundles_post_ra>
